<compile_context>
chip_gen: v7x
topology: tpu7x:2x2x1
jax: 0.10.0
libtpu: 0.0.40
codegen_flags: <defaults>
</compile_context>

<pallas_src>
import math

import numpy as np
import jax
import jax.numpy as jnp
from jax.experimental import pallas as pl
from jax.experimental.pallas import tpu as pltpu

D_MODEL = 64
NHEAD = 8
NUM_LAYERS = 3
DIM_FF = 64
HEAD_DIM = D_MODEL // NHEAD
NEG_INF = -1e30          # additive causal mask value (exp() underflows to exactly 0)
LN_EPS = 1e-5


def positional_encoding(max_len, d_model):
    """Interleaved sin/cos table, identical to the PyTorch PositionalEncoding buffer."""
    position = np.arange(max_len, dtype=np.float32)[:, None]
    div_term = np.exp(np.arange(0, d_model, 2, dtype=np.float32) * (-np.log(10000.0) / d_model))
    pe = np.zeros((max_len, d_model), dtype=np.float32)
    pe[:, 0::2] = np.sin(position * div_term)
    pe[:, 1::2] = np.cos(position * div_term)
    return pe


def _layer_norm(x, w, b):
    mu = jnp.mean(x, axis=-1, keepdims=True)
    var = jnp.mean((x - mu) ** 2, axis=-1, keepdims=True)
    return (x - mu) * jax.lax.rsqrt(var + LN_EPS) * w + b


def generator_kernel(onehot_ref, pe_ref, emb_ref,
                     wqkv_ref, bqkv_ref, wo_ref, bo_ref,
                     ln1w_ref, ln1b_ref,
                     w1_ref, b1_ref, w2_ref, b2_ref,
                     ln2w_ref, ln2b_ref,
                     fcw_ref, fcb_ref,
                     o_ref):
    """Full Generator forward for ONE batch element (grid axis 0 = batch)."""
    S = onehot_ref.shape[1]
    scale = 1.0 / math.sqrt(HEAD_DIM)
    bf16 = jnp.bfloat16

    # ---- causal mask built in-kernel (iota + compare, no HBM input) ----
    row = jax.lax.broadcasted_iota(jnp.int32, (S, S), 0)
    col = jax.lax.broadcasted_iota(jnp.int32, (S, S), 1)
    causal = jnp.where(col > row, jnp.float32(NEG_INF), jnp.float32(0.0))      # (S, S) f32

    # ---- embedding (exact f32 one-hot row-select on the MXU) + positional encoding ----
    # TODO(synk): switch to a row-gather (scalar prefetch + pl.Element) for large vocabularies.
    x = jnp.dot(onehot_ref[0, :, :], emb_ref[...],
                preferred_element_type=jnp.float32) + pe_ref[...]              # (S, D) f32

    def split_heads(t):          # (S, D) -> (NHEAD, S, HEAD_DIM), static lane slices
        return jnp.concatenate(
            [t[:, h * HEAD_DIM:(h + 1) * HEAD_DIM][None] for h in range(NHEAD)], axis=0)

    for l in range(NUM_LAYERS):  # static unroll over the 3 encoder layers
        # ---------- fused QKV projection: (S, D) @ (D, 3D), contraction depth = D ----------
        qkv = jnp.dot(x.astype(bf16), wqkv_ref[l, :, :],
                      preferred_element_type=jnp.float32) + bqkv_ref[l, :, :]  # (S, 3D) f32
        q = split_heads(qkv[:, 0:D_MODEL]).astype(bf16)                        # (H, S, hd)
        k = split_heads(qkv[:, D_MODEL:2 * D_MODEL]).astype(bf16)
        v = split_heads(qkv[:, 2 * D_MODEL:3 * D_MODEL]).astype(bf16)

        # ---------- scaled dot-product attention, heads batched, f32 softmax ----------
        s = jnp.einsum('bqd,bkd->bqk', q, k,
                       preferred_element_type=jnp.float32) * scale + causal[None]
        s = s - jnp.max(s, axis=-1, keepdims=True)
        p = jnp.exp(s)
        p = p / jnp.sum(p, axis=-1, keepdims=True)          # exact normalisation (review concern)
        o = jnp.einsum('bqk,bkd->bqd', p.astype(bf16), v,
                       preferred_element_type=jnp.float32)                     # (H, S, hd) f32

        # ---------- fused output projection on concatenated heads: (S, D) @ (D, D) ----------
        o_cat = jnp.concatenate([o[h] for h in range(NHEAD)], axis=1)          # (S, D) f32
        attn = jnp.dot(o_cat.astype(bf16), wo_ref[l, :, :],
                       preferred_element_type=jnp.float32) + bo_ref[l, :, :]

        # TODO(synk): dropout omitted (eval-mode / deterministic semantics).
        y = _layer_norm(x + attn, ln1w_ref[l, :, :], ln1b_ref[l, :, :])

        # ---------- feed-forward (ReLU), f32 accumulation / elementwise ----------
        f = jnp.maximum(
            jnp.dot(y.astype(bf16), w1_ref[l, :, :],
                    preferred_element_type=jnp.float32) + b1_ref[l, :, :], 0.0)
        f = jnp.dot(f.astype(bf16), w2_ref[l, :, :],
                    preferred_element_type=jnp.float32) + b2_ref[l, :, :]
        x = _layer_norm(y + f, ln2w_ref[l, :, :], ln2b_ref[l, :, :])

    # ---------- output head ----------
    logits = jnp.dot(x.astype(bf16), fcw_ref[...],
                     preferred_element_type=jnp.float32) + fcb_ref[...]        # (S, V) f32
    o_ref[0, :, :] = logits


def init_params(key, vocab_size):
    def xavier(k, shape):
        lim = math.sqrt(6.0 / (shape[0] + shape[1]))
        return jax.random.uniform(k, shape, jnp.float32, -lim, lim)

    keys = jax.random.split(key, 2 + NUM_LAYERS)
    params = {"embedding": jax.random.normal(keys[0], (vocab_size, D_MODEL), jnp.float32)}

    wqkv, bqkv, wo, bo = [], [], [], []
    ln1w, ln1b, ln2w, ln2b = [], [], [], []
    w1, b1, w2, b2 = [], [], [], []
    for l in range(NUM_LAYERS):
        lk = jax.random.split(keys[2 + l], 4)
        in_w = xavier(lk[0], (3 * D_MODEL, D_MODEL))            # PyTorch in_proj layout (out, in)
        wqkv.append(jnp.transpose(in_w))                        # stored as (D, 3D) = W_in^T
        bqkv.append(jnp.zeros((1, 3 * D_MODEL), jnp.float32))
        wo.append(xavier(lk[1], (D_MODEL, D_MODEL)))            # stored as (in, out) = W_o^T
        bo.append(jnp.zeros((1, D_MODEL), jnp.float32))
        w1.append(xavier(lk[2], (D_MODEL, DIM_FF)))             # (in, out)
        b1.append(jnp.zeros((1, DIM_FF), jnp.float32))
        w2.append(xavier(lk[3], (DIM_FF, D_MODEL)))
        b2.append(jnp.zeros((1, D_MODEL), jnp.float32))
        ln1w.append(jnp.ones((1, D_MODEL), jnp.float32))
        ln1b.append(jnp.zeros((1, D_MODEL), jnp.float32))
        ln2w.append(jnp.ones((1, D_MODEL), jnp.float32))
        ln2b.append(jnp.zeros((1, D_MODEL), jnp.float32))

    params.update(
        wqkv=jnp.stack(wqkv), bqkv=jnp.stack(bqkv), wo=jnp.stack(wo), bo=jnp.stack(bo),
        ln1_w=jnp.stack(ln1w), ln1_b=jnp.stack(ln1b),
        ln2_w=jnp.stack(ln2w), ln2_b=jnp.stack(ln2b),
        ff1_w=jnp.stack(w1), ff1_b=jnp.stack(b1),
        ff2_w=jnp.stack(w2), ff2_b=jnp.stack(b2))

    fck = jax.random.split(keys[1], 2)
    lim = 1.0 / math.sqrt(D_MODEL)
    params["fc_w"] = jax.random.uniform(fck[0], (D_MODEL, vocab_size), jnp.float32, -lim, lim)
    params["fc_b"] = jax.random.uniform(fck[1], (1, vocab_size), jnp.float32, -lim, lim)
    return params


@jax.jit
def generator_forward(params, tokens):
    """tokens: (S, B) int32 token ids -> logits (S, B, vocab), PyTorch layout."""
    S, B = tokens.shape
    V = params["embedding"].shape[0]
    L = NUM_LAYERS
    bf16 = jnp.bfloat16

    # one-hot built in XLA (exact, 2 KiB at this size); PE is a trace-time constant (S, D).
    onehot = jax.nn.one_hot(jnp.transpose(tokens), V, dtype=jnp.float32)       # (B, S, V)
    pe = jnp.asarray(positional_encoding(S, D_MODEL))                          # (S, D)

    def full(shape):             # whole-array block, identical on every grid step
        return pl.BlockSpec(shape, lambda b, _s=shape: (0,) * len(_s))

    in_specs = [
        pl.BlockSpec((1, S, V), lambda b: (b, 0, 0)),          # one-hot tokens, per batch
        full((S, D_MODEL)),                                    # positional encoding
        full((V, D_MODEL)),                                    # embedding table (f32)
        full((L, D_MODEL, 3 * D_MODEL)),                       # W_qkv^T   (bf16)
        full((L, 1, 3 * D_MODEL)),                             # b_qkv     (f32)
        full((L, D_MODEL, D_MODEL)),                           # W_o^T     (bf16)
        full((L, 1, D_MODEL)),                                 # b_o
        full((L, 1, D_MODEL)), full((L, 1, D_MODEL)),          # ln1 w, b
        full((L, D_MODEL, DIM_FF)), full((L, 1, DIM_FF)),      # W1 (bf16), b1
        full((L, DIM_FF, D_MODEL)), full((L, 1, D_MODEL)),     # W2 (bf16), b2
        full((L, 1, D_MODEL)), full((L, 1, D_MODEL)),          # ln2 w, b
        full((D_MODEL, V)), full((1, V)),                      # fc_out W^T (bf16), bias
    ]

    out = pl.pallas_call(
        generator_kernel,
        grid=(B,),
        in_specs=in_specs,
        out_specs=pl.BlockSpec((1, S, V), lambda b: (b, 0, 0)),
        out_shape=jax.ShapeDtypeStruct((B, S, V), jnp.float32),
        compiler_params=pltpu.CompilerParams(
            dimension_semantics=("parallel",)),                # v7x: batch split across 2 TCs
    )(onehot, pe, params["embedding"],
      params["wqkv"].astype(bf16), params["bqkv"],
      params["wo"].astype(bf16), params["bo"],
      params["ln1_w"], params["ln1_b"],
      params["ff1_w"].astype(bf16), params["ff1_b"],
      params["ff2_w"].astype(bf16), params["ff2_b"],
      params["ln2_w"], params["ln2_b"],
      params["fc_w"].astype(bf16), params["fc_b"])

    return jnp.transpose(out, (1, 0, 2))                       # tiny (S, B, V) transpose in XLA


def reference_forward(params, tokens):
    """Pure-JAX f32 reference with identical semantics (eval-mode, no dropout)."""
    S, B = tokens.shape
    x = params["embedding"][tokens] + jnp.asarray(positional_encoding(S, D_MODEL))[:, None, :]
    causal = jnp.where(jnp.arange(S)[None, :] > jnp.arange(S)[:, None],
                       jnp.float32(NEG_INF), jnp.float32(0.0))
    for l in range(NUM_LAYERS):
        qkv = jnp.einsum('sbd,de->sbe', x, params["wqkv"][l]) + params["bqkv"][l][0]
        q, k, v = (t.reshape(S, B, NHEAD, HEAD_DIM) for t in
                   (qkv[..., :D_MODEL], qkv[..., D_MODEL:2 * D_MODEL], qkv[..., 2 * D_MODEL:]))
        s = jnp.einsum('qbhd,kbhd->bhqk', q, k) / math.sqrt(HEAD_DIM) + causal
        p = jax.nn.softmax(s, axis=-1)
        o = jnp.einsum('bhqk,kbhd->qbhd', p, v).reshape(S, B, D_MODEL)
        attn = jnp.einsum('sbd,de->sbe', o, params["wo"][l]) + params["bo"][l][0]
        y = _layer_norm(x + attn, params["ln1_w"][l][0], params["ln1_b"][l][0])
        f = jnp.maximum(jnp.einsum('sbd,df->sbf', y, params["ff1_w"][l]) + params["ff1_b"][l][0], 0.0)
        f = jnp.einsum('sbf,fd->sbd', f, params["ff2_w"][l]) + params["ff2_b"][l][0]
        x = _layer_norm(y + f, params["ln2_w"][l][0], params["ln2_b"][l][0])
    return jnp.einsum('sbd,dv->sbv', x, params["fc_w"]) + params["fc_b"][0]


if __name__ == "__main__":
    vocab_size = 32
    S, B = 8, 2

    key = jax.random.PRNGKey(0)
    pkey, tkey = jax.random.split(key)
    params = init_params(pkey, vocab_size)
    tokens = jax.random.randint(tkey, (S, B), 0, vocab_size, dtype=jnp.int32)

    out = generator_forward(params, tokens)
    jax.block_until_ready(out)

    assert out.shape == (S, B, vocab_size) and out.dtype == jnp.float32
    assert bool(jnp.all(jnp.isfinite(out)))
    ref = reference_forward(params, tokens)
    max_err = float(jnp.max(jnp.abs(out - ref)))
    assert max_err < 0.15, f"mismatch vs f32 reference: {max_err}"
    print("KERNEL_OK")
</pallas_src>

<mosaic_0001>
module attributes {stable_mosaic.version = 11 : i64} {
  func.func @generator_kernel(%arg0: i32, %arg1: memref<1x8x32xf32, #tpu.memory_space<vmem>>, %arg2: memref<8x64xf32, #tpu.memory_space<vmem>>, %arg3: memref<32x64xf32, #tpu.memory_space<vmem>>, %arg4: memref<3x64x192xbf16, #tpu.memory_space<vmem>>, %arg5: memref<3x1x192xf32, #tpu.memory_space<vmem>>, %arg6: memref<3x64x64xbf16, #tpu.memory_space<vmem>>, %arg7: memref<3x1x64xf32, #tpu.memory_space<vmem>>, %arg8: memref<3x1x64xf32, #tpu.memory_space<vmem>>, %arg9: memref<3x1x64xf32, #tpu.memory_space<vmem>>, %arg10: memref<3x64x64xbf16, #tpu.memory_space<vmem>>, %arg11: memref<3x1x64xf32, #tpu.memory_space<vmem>>, %arg12: memref<3x64x64xbf16, #tpu.memory_space<vmem>>, %arg13: memref<3x1x64xf32, #tpu.memory_space<vmem>>, %arg14: memref<3x1x64xf32, #tpu.memory_space<vmem>>, %arg15: memref<3x1x64xf32, #tpu.memory_space<vmem>>, %arg16: memref<64x32xbf16, #tpu.memory_space<vmem>>, %arg17: memref<1x32xf32, #tpu.memory_space<vmem>>, %arg18: memref<1x8x32xf32, #tpu.memory_space<vmem>>) attributes {dimension_semantics = [#tpu.dimension_semantics<parallel>], iteration_bounds = array<i64: 2>, scalar_prefetch = 0 : i64, scratch_operands = 0 : i64, tpu.core_type = #tpu.core_type<tc>, window_params = [{transform_indices = @transform_0, window_bounds = array<i64: 1, 8, 32>}, {pipeline_mode = #tpu.pipeline_mode<synchronous>, transform_indices = @transform_1, window_bounds = array<i64: 8, 64>}, {pipeline_mode = #tpu.pipeline_mode<synchronous>, transform_indices = @transform_2, window_bounds = array<i64: 32, 64>}, {pipeline_mode = #tpu.pipeline_mode<synchronous>, transform_indices = @transform_3, window_bounds = array<i64: 3, 64, 192>}, {pipeline_mode = #tpu.pipeline_mode<synchronous>, transform_indices = @transform_4, window_bounds = array<i64: 3, 1, 192>}, {pipeline_mode = #tpu.pipeline_mode<synchronous>, transform_indices = @transform_5, window_bounds = array<i64: 3, 64, 64>}, {pipeline_mode = #tpu.pipeline_mode<synchronous>, transform_indices = @transform_6, window_bounds = array<i64: 3, 1, 64>}, {pipeline_mode = #tpu.pipeline_mode<synchronous>, transform_indices = @transform_7, window_bounds = array<i64: 3, 1, 64>}, {pipeline_mode = #tpu.pipeline_mode<synchronous>, transform_indices = @transform_8, window_bounds = array<i64: 3, 1, 64>}, {pipeline_mode = #tpu.pipeline_mode<synchronous>, transform_indices = @transform_9, window_bounds = array<i64: 3, 64, 64>}, {pipeline_mode = #tpu.pipeline_mode<synchronous>, transform_indices = @transform_10, window_bounds = array<i64: 3, 1, 64>}, {pipeline_mode = #tpu.pipeline_mode<synchronous>, transform_indices = @transform_11, window_bounds = array<i64: 3, 64, 64>}, {pipeline_mode = #tpu.pipeline_mode<synchronous>, transform_indices = @transform_12, window_bounds = array<i64: 3, 1, 64>}, {pipeline_mode = #tpu.pipeline_mode<synchronous>, transform_indices = @transform_13, window_bounds = array<i64: 3, 1, 64>}, {pipeline_mode = #tpu.pipeline_mode<synchronous>, transform_indices = @transform_14, window_bounds = array<i64: 3, 1, 64>}, {pipeline_mode = #tpu.pipeline_mode<synchronous>, transform_indices = @transform_15, window_bounds = array<i64: 64, 32>}, {pipeline_mode = #tpu.pipeline_mode<synchronous>, transform_indices = @transform_16, window_bounds = array<i64: 1, 32>}, {transform_indices = @transform_17, window_bounds = array<i64: 1, 8, 32>}]} {
    %0 = tpu.iota {dimensions = array<i32: 0>} : vector<8x8xi32>
    %1 = tpu.iota {dimensions = array<i32: 1>} : vector<8x8xi32>
    %2 = arith.cmpi sgt, %1, %0 : vector<8x8xi32>
    %cst = arith.constant -1.000000e+30 : f32
    %cst_0 = arith.constant 0.000000e+00 : f32
    %3 = vector.broadcast %cst : f32 to vector<8x8xf32>
    %4 = vector.broadcast %cst_0 : f32 to vector<8x8xf32>
    %5 = arith.select %2, %3, %4 : vector<8x8xi1>, vector<8x8xf32>
    %c0 = arith.constant 0 : index
    %c0_1 = arith.constant 0 : index
    %c0_2 = arith.constant 0 : index
    %6 = vector.load %arg1[%c0, %c0_1, %c0_2] : memref<1x8x32xf32, #tpu.memory_space<vmem>>, vector<1x8x32xf32>
    %7 = vector.shape_cast %6 : vector<1x8x32xf32> to vector<8x32xf32>
    %c0_3 = arith.constant 0 : index
    %c0_4 = arith.constant 0 : index
    %8 = vector.load %arg3[%c0_3, %c0_4] : memref<32x64xf32, #tpu.memory_space<vmem>>, vector<32x64xf32>
    %cst_5 = arith.constant dense<0.000000e+00> : vector<8x64xf32>
    %9 = tpu.matmul %7, %8, %cst_5 {dimension_numbers = #tpu.dot_dimension_numbers<[1], [0], [0], [1], [0, 0, 1, 1], [], []>} : vector<8x32xf32>, vector<32x64xf32>, vector<8x64xf32> -> vector<8x64xf32>
    %c0_6 = arith.constant 0 : index
    %c0_7 = arith.constant 0 : index
    %10 = vector.load %arg2[%c0_6, %c0_7] : memref<8x64xf32, #tpu.memory_space<vmem>>, vector<8x64xf32>
    %11 = arith.addf %9, %10 : vector<8x64xf32>
    %12 = arith.truncf %11 : vector<8x64xf32> to vector<8x64xbf16>
    %c0_8 = arith.constant 0 : index
    %c0_9 = arith.constant 0 : index
    %c0_10 = arith.constant 0 : index
    %13 = vector.load %arg4[%c0_8, %c0_9, %c0_10] : memref<3x64x192xbf16, #tpu.memory_space<vmem>>, vector<1x64x192xbf16>
    %14 = vector.shape_cast %13 : vector<1x64x192xbf16> to vector<64x192xbf16>
    %cst_11 = arith.constant dense<0.000000e+00> : vector<8x192xf32>
    %15 = tpu.matmul %12, %14, %cst_11 {dimension_numbers = #tpu.dot_dimension_numbers<[1], [0], [0], [1], [0, 0, 1, 1], [], []>} : vector<8x64xbf16>, vector<64x192xbf16>, vector<8x192xf32> -> vector<8x192xf32>
    %c0_12 = arith.constant 0 : index
    %c0_13 = arith.constant 0 : index
    %c0_14 = arith.constant 0 : index
    %16 = vector.load %arg5[%c0_12, %c0_13, %c0_14] : memref<3x1x192xf32, #tpu.memory_space<vmem>>, vector<1x1x192xf32>
    %17 = vector.shape_cast %16 : vector<1x1x192xf32> to vector<1x192xf32>
    %18 = vector.broadcast %17 : vector<1x192xf32> to vector<8x192xf32>
    %19 = arith.addf %15, %18 : vector<8x192xf32>
    %20 = vector.extract_strided_slice %19 {offsets = [0, 0], sizes = [8, 64], strides = [1, 1]} : vector<8x192xf32> to vector<8x64xf32>
    %21 = vector.extract_strided_slice %20 {offsets = [0, 0], sizes = [8, 8], strides = [1, 1]} : vector<8x64xf32> to vector<8x8xf32>
    %22 = vector.shape_cast %21 : vector<8x8xf32> to vector<1x8x8xf32>
    %23 = vector.extract_strided_slice %20 {offsets = [0, 8], sizes = [8, 8], strides = [1, 1]} : vector<8x64xf32> to vector<8x8xf32>
    %24 = vector.shape_cast %23 : vector<8x8xf32> to vector<1x8x8xf32>
    %25 = vector.extract_strided_slice %20 {offsets = [0, 16], sizes = [8, 8], strides = [1, 1]} : vector<8x64xf32> to vector<8x8xf32>
    %26 = vector.shape_cast %25 : vector<8x8xf32> to vector<1x8x8xf32>
    %27 = vector.extract_strided_slice %20 {offsets = [0, 24], sizes = [8, 8], strides = [1, 1]} : vector<8x64xf32> to vector<8x8xf32>
    %28 = vector.shape_cast %27 : vector<8x8xf32> to vector<1x8x8xf32>
    %29 = vector.extract_strided_slice %20 {offsets = [0, 32], sizes = [8, 8], strides = [1, 1]} : vector<8x64xf32> to vector<8x8xf32>
    %30 = vector.shape_cast %29 : vector<8x8xf32> to vector<1x8x8xf32>
    %31 = vector.extract_strided_slice %20 {offsets = [0, 40], sizes = [8, 8], strides = [1, 1]} : vector<8x64xf32> to vector<8x8xf32>
    %32 = vector.shape_cast %31 : vector<8x8xf32> to vector<1x8x8xf32>
    %33 = vector.extract_strided_slice %20 {offsets = [0, 48], sizes = [8, 8], strides = [1, 1]} : vector<8x64xf32> to vector<8x8xf32>
    %34 = vector.shape_cast %33 : vector<8x8xf32> to vector<1x8x8xf32>
    %35 = vector.extract_strided_slice %20 {offsets = [0, 56], sizes = [8, 8], strides = [1, 1]} : vector<8x64xf32> to vector<8x8xf32>
    %36 = vector.shape_cast %35 : vector<8x8xf32> to vector<1x8x8xf32>
    %37 = tpu.concatenate %22, %24, %26, %28, %30, %32, %34, %36 in 0 : vector<1x8x8xf32>, vector<1x8x8xf32>, vector<1x8x8xf32>, vector<1x8x8xf32>, vector<1x8x8xf32>, vector<1x8x8xf32>, vector<1x8x8xf32>, vector<1x8x8xf32> -> vector<8x8x8xf32>
    %38 = arith.truncf %37 : vector<8x8x8xf32> to vector<8x8x8xbf16>
    %39 = vector.extract_strided_slice %19 {offsets = [0, 64], sizes = [8, 64], strides = [1, 1]} : vector<8x192xf32> to vector<8x64xf32>
    %40 = vector.extract_strided_slice %39 {offsets = [0, 0], sizes = [8, 8], strides = [1, 1]} : vector<8x64xf32> to vector<8x8xf32>
    %41 = vector.shape_cast %40 : vector<8x8xf32> to vector<1x8x8xf32>
    %42 = vector.extract_strided_slice %39 {offsets = [0, 8], sizes = [8, 8], strides = [1, 1]} : vector<8x64xf32> to vector<8x8xf32>
    %43 = vector.shape_cast %42 : vector<8x8xf32> to vector<1x8x8xf32>
    %44 = vector.extract_strided_slice %39 {offsets = [0, 16], sizes = [8, 8], strides = [1, 1]} : vector<8x64xf32> to vector<8x8xf32>
    %45 = vector.shape_cast %44 : vector<8x8xf32> to vector<1x8x8xf32>
    %46 = vector.extract_strided_slice %39 {offsets = [0, 24], sizes = [8, 8], strides = [1, 1]} : vector<8x64xf32> to vector<8x8xf32>
    %47 = vector.shape_cast %46 : vector<8x8xf32> to vector<1x8x8xf32>
    %48 = vector.extract_strided_slice %39 {offsets = [0, 32], sizes = [8, 8], strides = [1, 1]} : vector<8x64xf32> to vector<8x8xf32>
    %49 = vector.shape_cast %48 : vector<8x8xf32> to vector<1x8x8xf32>
    %50 = vector.extract_strided_slice %39 {offsets = [0, 40], sizes = [8, 8], strides = [1, 1]} : vector<8x64xf32> to vector<8x8xf32>
    %51 = vector.shape_cast %50 : vector<8x8xf32> to vector<1x8x8xf32>
    %52 = vector.extract_strided_slice %39 {offsets = [0, 48], sizes = [8, 8], strides = [1, 1]} : vector<8x64xf32> to vector<8x8xf32>
    %53 = vector.shape_cast %52 : vector<8x8xf32> to vector<1x8x8xf32>
    %54 = vector.extract_strided_slice %39 {offsets = [0, 56], sizes = [8, 8], strides = [1, 1]} : vector<8x64xf32> to vector<8x8xf32>
    %55 = vector.shape_cast %54 : vector<8x8xf32> to vector<1x8x8xf32>
    %56 = tpu.concatenate %41, %43, %45, %47, %49, %51, %53, %55 in 0 : vector<1x8x8xf32>, vector<1x8x8xf32>, vector<1x8x8xf32>, vector<1x8x8xf32>, vector<1x8x8xf32>, vector<1x8x8xf32>, vector<1x8x8xf32>, vector<1x8x8xf32> -> vector<8x8x8xf32>
    %57 = arith.truncf %56 : vector<8x8x8xf32> to vector<8x8x8xbf16>
    %58 = vector.extract_strided_slice %19 {offsets = [0, 128], sizes = [8, 64], strides = [1, 1]} : vector<8x192xf32> to vector<8x64xf32>
    %59 = vector.extract_strided_slice %58 {offsets = [0, 0], sizes = [8, 8], strides = [1, 1]} : vector<8x64xf32> to vector<8x8xf32>
    %60 = vector.shape_cast %59 : vector<8x8xf32> to vector<1x8x8xf32>
    %61 = vector.extract_strided_slice %58 {offsets = [0, 8], sizes = [8, 8], strides = [1, 1]} : vector<8x64xf32> to vector<8x8xf32>
    %62 = vector.shape_cast %61 : vector<8x8xf32> to vector<1x8x8xf32>
    %63 = vector.extract_strided_slice %58 {offsets = [0, 16], sizes = [8, 8], strides = [1, 1]} : vector<8x64xf32> to vector<8x8xf32>
    %64 = vector.shape_cast %63 : vector<8x8xf32> to vector<1x8x8xf32>
    %65 = vector.extract_strided_slice %58 {offsets = [0, 24], sizes = [8, 8], strides = [1, 1]} : vector<8x64xf32> to vector<8x8xf32>
    %66 = vector.shape_cast %65 : vector<8x8xf32> to vector<1x8x8xf32>
    %67 = vector.extract_strided_slice %58 {offsets = [0, 32], sizes = [8, 8], strides = [1, 1]} : vector<8x64xf32> to vector<8x8xf32>
    %68 = vector.shape_cast %67 : vector<8x8xf32> to vector<1x8x8xf32>
    %69 = vector.extract_strided_slice %58 {offsets = [0, 40], sizes = [8, 8], strides = [1, 1]} : vector<8x64xf32> to vector<8x8xf32>
    %70 = vector.shape_cast %69 : vector<8x8xf32> to vector<1x8x8xf32>
    %71 = vector.extract_strided_slice %58 {offsets = [0, 48], sizes = [8, 8], strides = [1, 1]} : vector<8x64xf32> to vector<8x8xf32>
    %72 = vector.shape_cast %71 : vector<8x8xf32> to vector<1x8x8xf32>
    %73 = vector.extract_strided_slice %58 {offsets = [0, 56], sizes = [8, 8], strides = [1, 1]} : vector<8x64xf32> to vector<8x8xf32>
    %74 = vector.shape_cast %73 : vector<8x8xf32> to vector<1x8x8xf32>
    %75 = tpu.concatenate %60, %62, %64, %66, %68, %70, %72, %74 in 0 : vector<1x8x8xf32>, vector<1x8x8xf32>, vector<1x8x8xf32>, vector<1x8x8xf32>, vector<1x8x8xf32>, vector<1x8x8xf32>, vector<1x8x8xf32>, vector<1x8x8xf32> -> vector<8x8x8xf32>
    %76 = arith.truncf %75 : vector<8x8x8xf32> to vector<8x8x8xbf16>
    "tpu.trace_start"() <{level = 10 : i32, message = "bqd,bkd->bqk"}> : () -> ()
    %cst_15 = arith.constant dense<0.000000e+00> : vector<8x8x8xf32>
    %77 = tpu.matmul %38, %57, %cst_15 {dimension_numbers = #tpu.dot_dimension_numbers<[2], [2], [1], [1], [0, 0, 0, 1, 1, 1], [0], [0]>} : vector<8x8x8xbf16>, vector<8x8x8xbf16>, vector<8x8x8xf32> -> vector<8x8x8xf32>
    "tpu.trace_stop"() : () -> ()
    %cst_16 = arith.constant 0.353553385 : f32
    %78 = vector.broadcast %cst_16 : f32 to vector<8x8x8xf32>
    %79 = arith.mulf %77, %78 : vector<8x8x8xf32>
    %80 = vector.shape_cast %5 : vector<8x8xf32> to vector<1x8x8xf32>
    %81 = vector.broadcast %80 : vector<1x8x8xf32> to vector<8x8x8xf32>
    %82 = arith.addf %79, %81 : vector<8x8x8xf32>
    %cst_17 = arith.constant dense<0xFF800000> : vector<8x8xf32>
    %83 = vector.multi_reduction <maximumf>, %82, %cst_17 [2] : vector<8x8x8xf32> to vector<8x8xf32>
    %84 = vector.shape_cast %83 : vector<8x8xf32> to vector<8x8x1xf32>
    %85 = vector.broadcast %84 : vector<8x8x1xf32> to vector<8x8x8xf32>
    %86 = arith.subf %82, %85 : vector<8x8x8xf32>
    %87 = math.exp %86 : vector<8x8x8xf32>
    %cst_18 = arith.constant dense<0.000000e+00> : vector<8x8xf32>
    %88 = vector.multi_reduction <add>, %87, %cst_18 [2] : vector<8x8x8xf32> to vector<8x8xf32>
    %89 = vector.shape_cast %88 : vector<8x8xf32> to vector<8x8x1xf32>
    %90 = vector.broadcast %89 : vector<8x8x1xf32> to vector<8x8x8xf32>
    %91 = arith.divf %87, %90 : vector<8x8x8xf32>
    %92 = arith.truncf %91 : vector<8x8x8xf32> to vector<8x8x8xbf16>
    "tpu.trace_start"() <{level = 10 : i32, message = "bqk,bkd->bqd"}> : () -> ()
    %cst_19 = arith.constant dense<0.000000e+00> : vector<8x8x8xf32>
    %93 = tpu.matmul %92, %76, %cst_19 {dimension_numbers = #tpu.dot_dimension_numbers<[2], [1], [1], [2], [0, 0, 0, 1, 1, 2], [0], [0]>} : vector<8x8x8xbf16>, vector<8x8x8xbf16>, vector<8x8x8xf32> -> vector<8x8x8xf32>
    "tpu.trace_stop"() : () -> ()
    %94 = vector.extract_strided_slice %93 {offsets = [0, 0, 0], sizes = [1, 8, 8], strides = [1, 1, 1]} : vector<8x8x8xf32> to vector<1x8x8xf32>
    %95 = vector.shape_cast %94 : vector<1x8x8xf32> to vector<8x8xf32>
    %96 = vector.extract_strided_slice %93 {offsets = [1, 0, 0], sizes = [1, 8, 8], strides = [1, 1, 1]} : vector<8x8x8xf32> to vector<1x8x8xf32>
    %97 = vector.shape_cast %96 : vector<1x8x8xf32> to vector<8x8xf32>
    %98 = vector.extract_strided_slice %93 {offsets = [2, 0, 0], sizes = [1, 8, 8], strides = [1, 1, 1]} : vector<8x8x8xf32> to vector<1x8x8xf32>
    %99 = vector.shape_cast %98 : vector<1x8x8xf32> to vector<8x8xf32>
    %100 = vector.extract_strided_slice %93 {offsets = [3, 0, 0], sizes = [1, 8, 8], strides = [1, 1, 1]} : vector<8x8x8xf32> to vector<1x8x8xf32>
    %101 = vector.shape_cast %100 : vector<1x8x8xf32> to vector<8x8xf32>
    %102 = vector.extract_strided_slice %93 {offsets = [4, 0, 0], sizes = [1, 8, 8], strides = [1, 1, 1]} : vector<8x8x8xf32> to vector<1x8x8xf32>
    %103 = vector.shape_cast %102 : vector<1x8x8xf32> to vector<8x8xf32>
    %104 = vector.extract_strided_slice %93 {offsets = [5, 0, 0], sizes = [1, 8, 8], strides = [1, 1, 1]} : vector<8x8x8xf32> to vector<1x8x8xf32>
    %105 = vector.shape_cast %104 : vector<1x8x8xf32> to vector<8x8xf32>
    %106 = vector.extract_strided_slice %93 {offsets = [6, 0, 0], sizes = [1, 8, 8], strides = [1, 1, 1]} : vector<8x8x8xf32> to vector<1x8x8xf32>
    %107 = vector.shape_cast %106 : vector<1x8x8xf32> to vector<8x8xf32>
    %108 = vector.extract_strided_slice %93 {offsets = [7, 0, 0], sizes = [1, 8, 8], strides = [1, 1, 1]} : vector<8x8x8xf32> to vector<1x8x8xf32>
    %109 = vector.shape_cast %108 : vector<1x8x8xf32> to vector<8x8xf32>
    %110 = tpu.concatenate %95, %97, %99, %101, %103, %105, %107, %109 in 1 : vector<8x8xf32>, vector<8x8xf32>, vector<8x8xf32>, vector<8x8xf32>, vector<8x8xf32>, vector<8x8xf32>, vector<8x8xf32>, vector<8x8xf32> -> vector<8x64xf32>
    %111 = arith.truncf %110 : vector<8x64xf32> to vector<8x64xbf16>
    %c0_20 = arith.constant 0 : index
    %c0_21 = arith.constant 0 : index
    %c0_22 = arith.constant 0 : index
    %112 = vector.load %arg6[%c0_20, %c0_21, %c0_22] : memref<3x64x64xbf16, #tpu.memory_space<vmem>>, vector<1x64x64xbf16>
    %113 = vector.shape_cast %112 : vector<1x64x64xbf16> to vector<64x64xbf16>
    %cst_23 = arith.constant dense<0.000000e+00> : vector<8x64xf32>
    %114 = tpu.matmul %111, %113, %cst_23 {dimension_numbers = #tpu.dot_dimension_numbers<[1], [0], [0], [1], [0, 0, 1, 1], [], []>} : vector<8x64xbf16>, vector<64x64xbf16>, vector<8x64xf32> -> vector<8x64xf32>
    %c0_24 = arith.constant 0 : index
    %c0_25 = arith.constant 0 : index
    %c0_26 = arith.constant 0 : index
    %115 = vector.load %arg7[%c0_24, %c0_25, %c0_26] : memref<3x1x64xf32, #tpu.memory_space<vmem>>, vector<1x1x64xf32>
    %116 = vector.shape_cast %115 : vector<1x1x64xf32> to vector<1x64xf32>
    %117 = vector.broadcast %116 : vector<1x64xf32> to vector<8x64xf32>
    %118 = arith.addf %114, %117 : vector<8x64xf32>
    %119 = arith.addf %11, %118 : vector<8x64xf32>
    %c0_27 = arith.constant 0 : index
    %c0_28 = arith.constant 0 : index
    %c0_29 = arith.constant 0 : index
    %120 = vector.load %arg8[%c0_27, %c0_28, %c0_29] : memref<3x1x64xf32, #tpu.memory_space<vmem>>, vector<1x1x64xf32>
    %121 = vector.shape_cast %120 : vector<1x1x64xf32> to vector<1x64xf32>
    %c0_30 = arith.constant 0 : index
    %c0_31 = arith.constant 0 : index
    %c0_32 = arith.constant 0 : index
    %122 = vector.load %arg9[%c0_30, %c0_31, %c0_32] : memref<3x1x64xf32, #tpu.memory_space<vmem>>, vector<1x1x64xf32>
    %123 = vector.shape_cast %122 : vector<1x1x64xf32> to vector<1x64xf32>
    %cst_33 = arith.constant dense<0.000000e+00> : vector<8xf32>
    %124 = vector.multi_reduction <add>, %119, %cst_33 [1] : vector<8x64xf32> to vector<8xf32>
    %125 = vector.shape_cast %124 : vector<8xf32> to vector<8x1xf32>
    %cst_34 = arith.constant 6.400000e+01 : f32
    %126 = vector.broadcast %cst_34 : f32 to vector<8x1xf32>
    %127 = arith.divf %125, %126 : vector<8x1xf32>
    %128 = vector.broadcast %127 : vector<8x1xf32> to vector<8x64xf32>
    %129 = arith.subf %119, %128 : vector<8x64xf32>
    %130 = arith.mulf %129, %129 : vector<8x64xf32>
    %cst_35 = arith.constant dense<0.000000e+00> : vector<8xf32>
    %131 = vector.multi_reduction <add>, %130, %cst_35 [1] : vector<8x64xf32> to vector<8xf32>
    %132 = vector.shape_cast %131 : vector<8xf32> to vector<8x1xf32>
    %cst_36 = arith.constant 6.400000e+01 : f32
    %133 = vector.broadcast %cst_36 : f32 to vector<8x1xf32>
    %134 = arith.divf %132, %133 : vector<8x1xf32>
    %135 = vector.broadcast %127 : vector<8x1xf32> to vector<8x64xf32>
    %136 = arith.subf %119, %135 : vector<8x64xf32>
    %cst_37 = arith.constant 9.99999974E-6 : f32
    %137 = vector.broadcast %cst_37 : f32 to vector<8x1xf32>
    %138 = arith.addf %134, %137 : vector<8x1xf32>
    %139 = math.rsqrt %138 : vector<8x1xf32>
    %140 = vector.broadcast %139 : vector<8x1xf32> to vector<8x64xf32>
    %141 = arith.mulf %136, %140 : vector<8x64xf32>
    %142 = vector.broadcast %121 : vector<1x64xf32> to vector<8x64xf32>
    %143 = arith.mulf %141, %142 : vector<8x64xf32>
    %144 = vector.broadcast %123 : vector<1x64xf32> to vector<8x64xf32>
    %145 = arith.addf %143, %144 : vector<8x64xf32>
    %146 = arith.truncf %145 : vector<8x64xf32> to vector<8x64xbf16>
    %c0_38 = arith.constant 0 : index
    %c0_39 = arith.constant 0 : index
    %c0_40 = arith.constant 0 : index
    %147 = vector.load %arg10[%c0_38, %c0_39, %c0_40] : memref<3x64x64xbf16, #tpu.memory_space<vmem>>, vector<1x64x64xbf16>
    %148 = vector.shape_cast %147 : vector<1x64x64xbf16> to vector<64x64xbf16>
    %cst_41 = arith.constant dense<0.000000e+00> : vector<8x64xf32>
    %149 = tpu.matmul %146, %148, %cst_41 {dimension_numbers = #tpu.dot_dimension_numbers<[1], [0], [0], [1], [0, 0, 1, 1], [], []>} : vector<8x64xbf16>, vector<64x64xbf16>, vector<8x64xf32> -> vector<8x64xf32>
    %c0_42 = arith.constant 0 : index
    %c0_43 = arith.constant 0 : index
    %c0_44 = arith.constant 0 : index
    %150 = vector.load %arg11[%c0_42, %c0_43, %c0_44] : memref<3x1x64xf32, #tpu.memory_space<vmem>>, vector<1x1x64xf32>
    %151 = vector.shape_cast %150 : vector<1x1x64xf32> to vector<1x64xf32>
    %152 = vector.broadcast %151 : vector<1x64xf32> to vector<8x64xf32>
    %153 = arith.addf %149, %152 : vector<8x64xf32>
    %cst_45 = arith.constant 0.000000e+00 : f32
    %154 = vector.broadcast %cst_45 : f32 to vector<8x64xf32>
    %155 = arith.maximumf %153, %154 : vector<8x64xf32>
    %156 = arith.truncf %155 : vector<8x64xf32> to vector<8x64xbf16>
    %c0_46 = arith.constant 0 : index
    %c0_47 = arith.constant 0 : index
    %c0_48 = arith.constant 0 : index
    %157 = vector.load %arg12[%c0_46, %c0_47, %c0_48] : memref<3x64x64xbf16, #tpu.memory_space<vmem>>, vector<1x64x64xbf16>
    %158 = vector.shape_cast %157 : vector<1x64x64xbf16> to vector<64x64xbf16>
    %cst_49 = arith.constant dense<0.000000e+00> : vector<8x64xf32>
    %159 = tpu.matmul %156, %158, %cst_49 {dimension_numbers = #tpu.dot_dimension_numbers<[1], [0], [0], [1], [0, 0, 1, 1], [], []>} : vector<8x64xbf16>, vector<64x64xbf16>, vector<8x64xf32> -> vector<8x64xf32>
    %c0_50 = arith.constant 0 : index
    %c0_51 = arith.constant 0 : index
    %c0_52 = arith.constant 0 : index
    %160 = vector.load %arg13[%c0_50, %c0_51, %c0_52] : memref<3x1x64xf32, #tpu.memory_space<vmem>>, vector<1x1x64xf32>
    %161 = vector.shape_cast %160 : vector<1x1x64xf32> to vector<1x64xf32>
    %162 = vector.broadcast %161 : vector<1x64xf32> to vector<8x64xf32>
    %163 = arith.addf %159, %162 : vector<8x64xf32>
    %164 = arith.addf %145, %163 : vector<8x64xf32>
    %c0_53 = arith.constant 0 : index
    %c0_54 = arith.constant 0 : index
    %c0_55 = arith.constant 0 : index
    %165 = vector.load %arg14[%c0_53, %c0_54, %c0_55] : memref<3x1x64xf32, #tpu.memory_space<vmem>>, vector<1x1x64xf32>
    %166 = vector.shape_cast %165 : vector<1x1x64xf32> to vector<1x64xf32>
    %c0_56 = arith.constant 0 : index
    %c0_57 = arith.constant 0 : index
    %c0_58 = arith.constant 0 : index
    %167 = vector.load %arg15[%c0_56, %c0_57, %c0_58] : memref<3x1x64xf32, #tpu.memory_space<vmem>>, vector<1x1x64xf32>
    %168 = vector.shape_cast %167 : vector<1x1x64xf32> to vector<1x64xf32>
    %cst_59 = arith.constant dense<0.000000e+00> : vector<8xf32>
    %169 = vector.multi_reduction <add>, %164, %cst_59 [1] : vector<8x64xf32> to vector<8xf32>
    %170 = vector.shape_cast %169 : vector<8xf32> to vector<8x1xf32>
    %cst_60 = arith.constant 6.400000e+01 : f32
    %171 = vector.broadcast %cst_60 : f32 to vector<8x1xf32>
    %172 = arith.divf %170, %171 : vector<8x1xf32>
    %173 = vector.broadcast %172 : vector<8x1xf32> to vector<8x64xf32>
    %174 = arith.subf %164, %173 : vector<8x64xf32>
    %175 = arith.mulf %174, %174 : vector<8x64xf32>
    %cst_61 = arith.constant dense<0.000000e+00> : vector<8xf32>
    %176 = vector.multi_reduction <add>, %175, %cst_61 [1] : vector<8x64xf32> to vector<8xf32>
    %177 = vector.shape_cast %176 : vector<8xf32> to vector<8x1xf32>
    %cst_62 = arith.constant 6.400000e+01 : f32
    %178 = vector.broadcast %cst_62 : f32 to vector<8x1xf32>
    %179 = arith.divf %177, %178 : vector<8x1xf32>
    %180 = vector.broadcast %172 : vector<8x1xf32> to vector<8x64xf32>
    %181 = arith.subf %164, %180 : vector<8x64xf32>
    %cst_63 = arith.constant 9.99999974E-6 : f32
    %182 = vector.broadcast %cst_63 : f32 to vector<8x1xf32>
    %183 = arith.addf %179, %182 : vector<8x1xf32>
    %184 = math.rsqrt %183 : vector<8x1xf32>
    %185 = vector.broadcast %184 : vector<8x1xf32> to vector<8x64xf32>
    %186 = arith.mulf %181, %185 : vector<8x64xf32>
    %187 = vector.broadcast %166 : vector<1x64xf32> to vector<8x64xf32>
    %188 = arith.mulf %186, %187 : vector<8x64xf32>
    %189 = vector.broadcast %168 : vector<1x64xf32> to vector<8x64xf32>
    %190 = arith.addf %188, %189 : vector<8x64xf32>
    %191 = arith.truncf %190 : vector<8x64xf32> to vector<8x64xbf16>
    %c1 = arith.constant 1 : index
    %c0_64 = arith.constant 0 : index
    %c0_65 = arith.constant 0 : index
    %192 = vector.load %arg4[%c1, %c0_64, %c0_65] : memref<3x64x192xbf16, #tpu.memory_space<vmem>>, vector<1x64x192xbf16>
    %193 = vector.shape_cast %192 : vector<1x64x192xbf16> to vector<64x192xbf16>
    %cst_66 = arith.constant dense<0.000000e+00> : vector<8x192xf32>
    %194 = tpu.matmul %191, %193, %cst_66 {dimension_numbers = #tpu.dot_dimension_numbers<[1], [0], [0], [1], [0, 0, 1, 1], [], []>} : vector<8x64xbf16>, vector<64x192xbf16>, vector<8x192xf32> -> vector<8x192xf32>
    %c1_67 = arith.constant 1 : index
    %c0_68 = arith.constant 0 : index
    %c0_69 = arith.constant 0 : index
    %195 = vector.load %arg5[%c1_67, %c0_68, %c0_69] : memref<3x1x192xf32, #tpu.memory_space<vmem>>, vector<1x1x192xf32>
    %196 = vector.shape_cast %195 : vector<1x1x192xf32> to vector<1x192xf32>
    %197 = vector.broadcast %196 : vector<1x192xf32> to vector<8x192xf32>
    %198 = arith.addf %194, %197 : vector<8x192xf32>
    %199 = vector.extract_strided_slice %198 {offsets = [0, 0], sizes = [8, 64], strides = [1, 1]} : vector<8x192xf32> to vector<8x64xf32>
    %200 = vector.extract_strided_slice %199 {offsets = [0, 0], sizes = [8, 8], strides = [1, 1]} : vector<8x64xf32> to vector<8x8xf32>
    %201 = vector.shape_cast %200 : vector<8x8xf32> to vector<1x8x8xf32>
    %202 = vector.extract_strided_slice %199 {offsets = [0, 8], sizes = [8, 8], strides = [1, 1]} : vector<8x64xf32> to vector<8x8xf32>
    %203 = vector.shape_cast %202 : vector<8x8xf32> to vector<1x8x8xf32>
    %204 = vector.extract_strided_slice %199 {offsets = [0, 16], sizes = [8, 8], strides = [1, 1]} : vector<8x64xf32> to vector<8x8xf32>
    %205 = vector.shape_cast %204 : vector<8x8xf32> to vector<1x8x8xf32>
    %206 = vector.extract_strided_slice %199 {offsets = [0, 24], sizes = [8, 8], strides = [1, 1]} : vector<8x64xf32> to vector<8x8xf32>
    %207 = vector.shape_cast %206 : vector<8x8xf32> to vector<1x8x8xf32>
    %208 = vector.extract_strided_slice %199 {offsets = [0, 32], sizes = [8, 8], strides = [1, 1]} : vector<8x64xf32> to vector<8x8xf32>
    %209 = vector.shape_cast %208 : vector<8x8xf32> to vector<1x8x8xf32>
    %210 = vector.extract_strided_slice %199 {offsets = [0, 40], sizes = [8, 8], strides = [1, 1]} : vector<8x64xf32> to vector<8x8xf32>
    %211 = vector.shape_cast %210 : vector<8x8xf32> to vector<1x8x8xf32>
    %212 = vector.extract_strided_slice %199 {offsets = [0, 48], sizes = [8, 8], strides = [1, 1]} : vector<8x64xf32> to vector<8x8xf32>
    %213 = vector.shape_cast %212 : vector<8x8xf32> to vector<1x8x8xf32>
    %214 = vector.extract_strided_slice %199 {offsets = [0, 56], sizes = [8, 8], strides = [1, 1]} : vector<8x64xf32> to vector<8x8xf32>
    %215 = vector.shape_cast %214 : vector<8x8xf32> to vector<1x8x8xf32>
    %216 = tpu.concatenate %201, %203, %205, %207, %209, %211, %213, %215 in 0 : vector<1x8x8xf32>, vector<1x8x8xf32>, vector<1x8x8xf32>, vector<1x8x8xf32>, vector<1x8x8xf32>, vector<1x8x8xf32>, vector<1x8x8xf32>, vector<1x8x8xf32> -> vector<8x8x8xf32>
    %217 = arith.truncf %216 : vector<8x8x8xf32> to vector<8x8x8xbf16>
    %218 = vector.extract_strided_slice %198 {offsets = [0, 64], sizes = [8, 64], strides = [1, 1]} : vector<8x192xf32> to vector<8x64xf32>
    %219 = vector.extract_strided_slice %218 {offsets = [0, 0], sizes = [8, 8], strides = [1, 1]} : vector<8x64xf32> to vector<8x8xf32>
    %220 = vector.shape_cast %219 : vector<8x8xf32> to vector<1x8x8xf32>
    %221 = vector.extract_strided_slice %218 {offsets = [0, 8], sizes = [8, 8], strides = [1, 1]} : vector<8x64xf32> to vector<8x8xf32>
    %222 = vector.shape_cast %221 : vector<8x8xf32> to vector<1x8x8xf32>
    %223 = vector.extract_strided_slice %218 {offsets = [0, 16], sizes = [8, 8], strides = [1, 1]} : vector<8x64xf32> to vector<8x8xf32>
    %224 = vector.shape_cast %223 : vector<8x8xf32> to vector<1x8x8xf32>
    %225 = vector.extract_strided_slice %218 {offsets = [0, 24], sizes = [8, 8], strides = [1, 1]} : vector<8x64xf32> to vector<8x8xf32>
    %226 = vector.shape_cast %225 : vector<8x8xf32> to vector<1x8x8xf32>
    %227 = vector.extract_strided_slice %218 {offsets = [0, 32], sizes = [8, 8], strides = [1, 1]} : vector<8x64xf32> to vector<8x8xf32>
    %228 = vector.shape_cast %227 : vector<8x8xf32> to vector<1x8x8xf32>
    %229 = vector.extract_strided_slice %218 {offsets = [0, 40], sizes = [8, 8], strides = [1, 1]} : vector<8x64xf32> to vector<8x8xf32>
    %230 = vector.shape_cast %229 : vector<8x8xf32> to vector<1x8x8xf32>
    %231 = vector.extract_strided_slice %218 {offsets = [0, 48], sizes = [8, 8], strides = [1, 1]} : vector<8x64xf32> to vector<8x8xf32>
    %232 = vector.shape_cast %231 : vector<8x8xf32> to vector<1x8x8xf32>
    %233 = vector.extract_strided_slice %218 {offsets = [0, 56], sizes = [8, 8], strides = [1, 1]} : vector<8x64xf32> to vector<8x8xf32>
    %234 = vector.shape_cast %233 : vector<8x8xf32> to vector<1x8x8xf32>
    %235 = tpu.concatenate %220, %222, %224, %226, %228, %230, %232, %234 in 0 : vector<1x8x8xf32>, vector<1x8x8xf32>, vector<1x8x8xf32>, vector<1x8x8xf32>, vector<1x8x8xf32>, vector<1x8x8xf32>, vector<1x8x8xf32>, vector<1x8x8xf32> -> vector<8x8x8xf32>
    %236 = arith.truncf %235 : vector<8x8x8xf32> to vector<8x8x8xbf16>
    %237 = vector.extract_strided_slice %198 {offsets = [0, 128], sizes = [8, 64], strides = [1, 1]} : vector<8x192xf32> to vector<8x64xf32>
    %238 = vector.extract_strided_slice %237 {offsets = [0, 0], sizes = [8, 8], strides = [1, 1]} : vector<8x64xf32> to vector<8x8xf32>
    %239 = vector.shape_cast %238 : vector<8x8xf32> to vector<1x8x8xf32>
    %240 = vector.extract_strided_slice %237 {offsets = [0, 8], sizes = [8, 8], strides = [1, 1]} : vector<8x64xf32> to vector<8x8xf32>
    %241 = vector.shape_cast %240 : vector<8x8xf32> to vector<1x8x8xf32>
    %242 = vector.extract_strided_slice %237 {offsets = [0, 16], sizes = [8, 8], strides = [1, 1]} : vector<8x64xf32> to vector<8x8xf32>
    %243 = vector.shape_cast %242 : vector<8x8xf32> to vector<1x8x8xf32>
    %244 = vector.extract_strided_slice %237 {offsets = [0, 24], sizes = [8, 8], strides = [1, 1]} : vector<8x64xf32> to vector<8x8xf32>
    %245 = vector.shape_cast %244 : vector<8x8xf32> to vector<1x8x8xf32>
    %246 = vector.extract_strided_slice %237 {offsets = [0, 32], sizes = [8, 8], strides = [1, 1]} : vector<8x64xf32> to vector<8x8xf32>
    %247 = vector.shape_cast %246 : vector<8x8xf32> to vector<1x8x8xf32>
    %248 = vector.extract_strided_slice %237 {offsets = [0, 40], sizes = [8, 8], strides = [1, 1]} : vector<8x64xf32> to vector<8x8xf32>
    %249 = vector.shape_cast %248 : vector<8x8xf32> to vector<1x8x8xf32>
    %250 = vector.extract_strided_slice %237 {offsets = [0, 48], sizes = [8, 8], strides = [1, 1]} : vector<8x64xf32> to vector<8x8xf32>
    %251 = vector.shape_cast %250 : vector<8x8xf32> to vector<1x8x8xf32>
    %252 = vector.extract_strided_slice %237 {offsets = [0, 56], sizes = [8, 8], strides = [1, 1]} : vector<8x64xf32> to vector<8x8xf32>
    %253 = vector.shape_cast %252 : vector<8x8xf32> to vector<1x8x8xf32>
    %254 = tpu.concatenate %239, %241, %243, %245, %247, %249, %251, %253 in 0 : vector<1x8x8xf32>, vector<1x8x8xf32>, vector<1x8x8xf32>, vector<1x8x8xf32>, vector<1x8x8xf32>, vector<1x8x8xf32>, vector<1x8x8xf32>, vector<1x8x8xf32> -> vector<8x8x8xf32>
    %255 = arith.truncf %254 : vector<8x8x8xf32> to vector<8x8x8xbf16>
    "tpu.trace_start"() <{level = 10 : i32, message = "bqd,bkd->bqk"}> : () -> ()
    %cst_70 = arith.constant dense<0.000000e+00> : vector<8x8x8xf32>
    %256 = tpu.matmul %217, %236, %cst_70 {dimension_numbers = #tpu.dot_dimension_numbers<[2], [2], [1], [1], [0, 0, 0, 1, 1, 1], [0], [0]>} : vector<8x8x8xbf16>, vector<8x8x8xbf16>, vector<8x8x8xf32> -> vector<8x8x8xf32>
    "tpu.trace_stop"() : () -> ()
    %cst_71 = arith.constant 0.353553385 : f32
    %257 = vector.broadcast %cst_71 : f32 to vector<8x8x8xf32>
    %258 = arith.mulf %256, %257 : vector<8x8x8xf32>
    %259 = vector.shape_cast %5 : vector<8x8xf32> to vector<1x8x8xf32>
    %260 = vector.broadcast %259 : vector<1x8x8xf32> to vector<8x8x8xf32>
    %261 = arith.addf %258, %260 : vector<8x8x8xf32>
    %cst_72 = arith.constant dense<0xFF800000> : vector<8x8xf32>
    %262 = vector.multi_reduction <maximumf>, %261, %cst_72 [2] : vector<8x8x8xf32> to vector<8x8xf32>
    %263 = vector.shape_cast %262 : vector<8x8xf32> to vector<8x8x1xf32>
    %264 = vector.broadcast %263 : vector<8x8x1xf32> to vector<8x8x8xf32>
    %265 = arith.subf %261, %264 : vector<8x8x8xf32>
    %266 = math.exp %265 : vector<8x8x8xf32>
    %cst_73 = arith.constant dense<0.000000e+00> : vector<8x8xf32>
    %267 = vector.multi_reduction <add>, %266, %cst_73 [2] : vector<8x8x8xf32> to vector<8x8xf32>
    %268 = vector.shape_cast %267 : vector<8x8xf32> to vector<8x8x1xf32>
    %269 = vector.broadcast %268 : vector<8x8x1xf32> to vector<8x8x8xf32>
    %270 = arith.divf %266, %269 : vector<8x8x8xf32>
    %271 = arith.truncf %270 : vector<8x8x8xf32> to vector<8x8x8xbf16>
    "tpu.trace_start"() <{level = 10 : i32, message = "bqk,bkd->bqd"}> : () -> ()
    %cst_74 = arith.constant dense<0.000000e+00> : vector<8x8x8xf32>
    %272 = tpu.matmul %271, %255, %cst_74 {dimension_numbers = #tpu.dot_dimension_numbers<[2], [1], [1], [2], [0, 0, 0, 1, 1, 2], [0], [0]>} : vector<8x8x8xbf16>, vector<8x8x8xbf16>, vector<8x8x8xf32> -> vector<8x8x8xf32>
    "tpu.trace_stop"() : () -> ()
    %273 = vector.extract_strided_slice %272 {offsets = [0, 0, 0], sizes = [1, 8, 8], strides = [1, 1, 1]} : vector<8x8x8xf32> to vector<1x8x8xf32>
    %274 = vector.shape_cast %273 : vector<1x8x8xf32> to vector<8x8xf32>
    %275 = vector.extract_strided_slice %272 {offsets = [1, 0, 0], sizes = [1, 8, 8], strides = [1, 1, 1]} : vector<8x8x8xf32> to vector<1x8x8xf32>
    %276 = vector.shape_cast %275 : vector<1x8x8xf32> to vector<8x8xf32>
    %277 = vector.extract_strided_slice %272 {offsets = [2, 0, 0], sizes = [1, 8, 8], strides = [1, 1, 1]} : vector<8x8x8xf32> to vector<1x8x8xf32>
    %278 = vector.shape_cast %277 : vector<1x8x8xf32> to vector<8x8xf32>
    %279 = vector.extract_strided_slice %272 {offsets = [3, 0, 0], sizes = [1, 8, 8], strides = [1, 1, 1]} : vector<8x8x8xf32> to vector<1x8x8xf32>
    %280 = vector.shape_cast %279 : vector<1x8x8xf32> to vector<8x8xf32>
    %281 = vector.extract_strided_slice %272 {offsets = [4, 0, 0], sizes = [1, 8, 8], strides = [1, 1, 1]} : vector<8x8x8xf32> to vector<1x8x8xf32>
    %282 = vector.shape_cast %281 : vector<1x8x8xf32> to vector<8x8xf32>
    %283 = vector.extract_strided_slice %272 {offsets = [5, 0, 0], sizes = [1, 8, 8], strides = [1, 1, 1]} : vector<8x8x8xf32> to vector<1x8x8xf32>
    %284 = vector.shape_cast %283 : vector<1x8x8xf32> to vector<8x8xf32>
    %285 = vector.extract_strided_slice %272 {offsets = [6, 0, 0], sizes = [1, 8, 8], strides = [1, 1, 1]} : vector<8x8x8xf32> to vector<1x8x8xf32>
    %286 = vector.shape_cast %285 : vector<1x8x8xf32> to vector<8x8xf32>
    %287 = vector.extract_strided_slice %272 {offsets = [7, 0, 0], sizes = [1, 8, 8], strides = [1, 1, 1]} : vector<8x8x8xf32> to vector<1x8x8xf32>
    %288 = vector.shape_cast %287 : vector<1x8x8xf32> to vector<8x8xf32>
    %289 = tpu.concatenate %274, %276, %278, %280, %282, %284, %286, %288 in 1 : vector<8x8xf32>, vector<8x8xf32>, vector<8x8xf32>, vector<8x8xf32>, vector<8x8xf32>, vector<8x8xf32>, vector<8x8xf32>, vector<8x8xf32> -> vector<8x64xf32>
    %290 = arith.truncf %289 : vector<8x64xf32> to vector<8x64xbf16>
    %c1_75 = arith.constant 1 : index
    %c0_76 = arith.constant 0 : index
    %c0_77 = arith.constant 0 : index
    %291 = vector.load %arg6[%c1_75, %c0_76, %c0_77] : memref<3x64x64xbf16, #tpu.memory_space<vmem>>, vector<1x64x64xbf16>
    %292 = vector.shape_cast %291 : vector<1x64x64xbf16> to vector<64x64xbf16>
    %cst_78 = arith.constant dense<0.000000e+00> : vector<8x64xf32>
    %293 = tpu.matmul %290, %292, %cst_78 {dimension_numbers = #tpu.dot_dimension_numbers<[1], [0], [0], [1], [0, 0, 1, 1], [], []>} : vector<8x64xbf16>, vector<64x64xbf16>, vector<8x64xf32> -> vector<8x64xf32>
    %c1_79 = arith.constant 1 : index
    %c0_80 = arith.constant 0 : index
    %c0_81 = arith.constant 0 : index
    %294 = vector.load %arg7[%c1_79, %c0_80, %c0_81] : memref<3x1x64xf32, #tpu.memory_space<vmem>>, vector<1x1x64xf32>
    %295 = vector.shape_cast %294 : vector<1x1x64xf32> to vector<1x64xf32>
    %296 = vector.broadcast %295 : vector<1x64xf32> to vector<8x64xf32>
    %297 = arith.addf %293, %296 : vector<8x64xf32>
    %298 = arith.addf %190, %297 : vector<8x64xf32>
    %c1_82 = arith.constant 1 : index
    %c0_83 = arith.constant 0 : index
    %c0_84 = arith.constant 0 : index
    %299 = vector.load %arg8[%c1_82, %c0_83, %c0_84] : memref<3x1x64xf32, #tpu.memory_space<vmem>>, vector<1x1x64xf32>
    %300 = vector.shape_cast %299 : vector<1x1x64xf32> to vector<1x64xf32>
    %c1_85 = arith.constant 1 : index
    %c0_86 = arith.constant 0 : index
    %c0_87 = arith.constant 0 : index
    %301 = vector.load %arg9[%c1_85, %c0_86, %c0_87] : memref<3x1x64xf32, #tpu.memory_space<vmem>>, vector<1x1x64xf32>
    %302 = vector.shape_cast %301 : vector<1x1x64xf32> to vector<1x64xf32>
    %cst_88 = arith.constant dense<0.000000e+00> : vector<8xf32>
    %303 = vector.multi_reduction <add>, %298, %cst_88 [1] : vector<8x64xf32> to vector<8xf32>
    %304 = vector.shape_cast %303 : vector<8xf32> to vector<8x1xf32>
    %cst_89 = arith.constant 6.400000e+01 : f32
    %305 = vector.broadcast %cst_89 : f32 to vector<8x1xf32>
    %306 = arith.divf %304, %305 : vector<8x1xf32>
    %307 = vector.broadcast %306 : vector<8x1xf32> to vector<8x64xf32>
    %308 = arith.subf %298, %307 : vector<8x64xf32>
    %309 = arith.mulf %308, %308 : vector<8x64xf32>
    %cst_90 = arith.constant dense<0.000000e+00> : vector<8xf32>
    %310 = vector.multi_reduction <add>, %309, %cst_90 [1] : vector<8x64xf32> to vector<8xf32>
    %311 = vector.shape_cast %310 : vector<8xf32> to vector<8x1xf32>
    %cst_91 = arith.constant 6.400000e+01 : f32
    %312 = vector.broadcast %cst_91 : f32 to vector<8x1xf32>
    %313 = arith.divf %311, %312 : vector<8x1xf32>
    %314 = vector.broadcast %306 : vector<8x1xf32> to vector<8x64xf32>
    %315 = arith.subf %298, %314 : vector<8x64xf32>
    %cst_92 = arith.constant 9.99999974E-6 : f32
    %316 = vector.broadcast %cst_92 : f32 to vector<8x1xf32>
    %317 = arith.addf %313, %316 : vector<8x1xf32>
    %318 = math.rsqrt %317 : vector<8x1xf32>
    %319 = vector.broadcast %318 : vector<8x1xf32> to vector<8x64xf32>
    %320 = arith.mulf %315, %319 : vector<8x64xf32>
    %321 = vector.broadcast %300 : vector<1x64xf32> to vector<8x64xf32>
    %322 = arith.mulf %320, %321 : vector<8x64xf32>
    %323 = vector.broadcast %302 : vector<1x64xf32> to vector<8x64xf32>
    %324 = arith.addf %322, %323 : vector<8x64xf32>
    %325 = arith.truncf %324 : vector<8x64xf32> to vector<8x64xbf16>
    %c1_93 = arith.constant 1 : index
    %c0_94 = arith.constant 0 : index
    %c0_95 = arith.constant 0 : index
    %326 = vector.load %arg10[%c1_93, %c0_94, %c0_95] : memref<3x64x64xbf16, #tpu.memory_space<vmem>>, vector<1x64x64xbf16>
    %327 = vector.shape_cast %326 : vector<1x64x64xbf16> to vector<64x64xbf16>
    %cst_96 = arith.constant dense<0.000000e+00> : vector<8x64xf32>
    %328 = tpu.matmul %325, %327, %cst_96 {dimension_numbers = #tpu.dot_dimension_numbers<[1], [0], [0], [1], [0, 0, 1, 1], [], []>} : vector<8x64xbf16>, vector<64x64xbf16>, vector<8x64xf32> -> vector<8x64xf32>
    %c1_97 = arith.constant 1 : index
    %c0_98 = arith.constant 0 : index
    %c0_99 = arith.constant 0 : index
    %329 = vector.load %arg11[%c1_97, %c0_98, %c0_99] : memref<3x1x64xf32, #tpu.memory_space<vmem>>, vector<1x1x64xf32>
    %330 = vector.shape_cast %329 : vector<1x1x64xf32> to vector<1x64xf32>
    %331 = vector.broadcast %330 : vector<1x64xf32> to vector<8x64xf32>
    %332 = arith.addf %328, %331 : vector<8x64xf32>
    %cst_100 = arith.constant 0.000000e+00 : f32
    %333 = vector.broadcast %cst_100 : f32 to vector<8x64xf32>
    %334 = arith.maximumf %332, %333 : vector<8x64xf32>
    %335 = arith.truncf %334 : vector<8x64xf32> to vector<8x64xbf16>
    %c1_101 = arith.constant 1 : index
    %c0_102 = arith.constant 0 : index
    %c0_103 = arith.constant 0 : index
    %336 = vector.load %arg12[%c1_101, %c0_102, %c0_103] : memref<3x64x64xbf16, #tpu.memory_space<vmem>>, vector<1x64x64xbf16>
    %337 = vector.shape_cast %336 : vector<1x64x64xbf16> to vector<64x64xbf16>
    %cst_104 = arith.constant dense<0.000000e+00> : vector<8x64xf32>
    %338 = tpu.matmul %335, %337, %cst_104 {dimension_numbers = #tpu.dot_dimension_numbers<[1], [0], [0], [1], [0, 0, 1, 1], [], []>} : vector<8x64xbf16>, vector<64x64xbf16>, vector<8x64xf32> -> vector<8x64xf32>
    %c1_105 = arith.constant 1 : index
    %c0_106 = arith.constant 0 : index
    %c0_107 = arith.constant 0 : index
    %339 = vector.load %arg13[%c1_105, %c0_106, %c0_107] : memref<3x1x64xf32, #tpu.memory_space<vmem>>, vector<1x1x64xf32>
    %340 = vector.shape_cast %339 : vector<1x1x64xf32> to vector<1x64xf32>
    %341 = vector.broadcast %340 : vector<1x64xf32> to vector<8x64xf32>
    %342 = arith.addf %338, %341 : vector<8x64xf32>
    %343 = arith.addf %324, %342 : vector<8x64xf32>
    %c1_108 = arith.constant 1 : index
    %c0_109 = arith.constant 0 : index
    %c0_110 = arith.constant 0 : index
    %344 = vector.load %arg14[%c1_108, %c0_109, %c0_110] : memref<3x1x64xf32, #tpu.memory_space<vmem>>, vector<1x1x64xf32>
    %345 = vector.shape_cast %344 : vector<1x1x64xf32> to vector<1x64xf32>
    %c1_111 = arith.constant 1 : index
    %c0_112 = arith.constant 0 : index
    %c0_113 = arith.constant 0 : index
    %346 = vector.load %arg15[%c1_111, %c0_112, %c0_113] : memref<3x1x64xf32, #tpu.memory_space<vmem>>, vector<1x1x64xf32>
    %347 = vector.shape_cast %346 : vector<1x1x64xf32> to vector<1x64xf32>
    %cst_114 = arith.constant dense<0.000000e+00> : vector<8xf32>
    %348 = vector.multi_reduction <add>, %343, %cst_114 [1] : vector<8x64xf32> to vector<8xf32>
    %349 = vector.shape_cast %348 : vector<8xf32> to vector<8x1xf32>
    %cst_115 = arith.constant 6.400000e+01 : f32
    %350 = vector.broadcast %cst_115 : f32 to vector<8x1xf32>
    %351 = arith.divf %349, %350 : vector<8x1xf32>
    %352 = vector.broadcast %351 : vector<8x1xf32> to vector<8x64xf32>
    %353 = arith.subf %343, %352 : vector<8x64xf32>
    %354 = arith.mulf %353, %353 : vector<8x64xf32>
    %cst_116 = arith.constant dense<0.000000e+00> : vector<8xf32>
    %355 = vector.multi_reduction <add>, %354, %cst_116 [1] : vector<8x64xf32> to vector<8xf32>
    %356 = vector.shape_cast %355 : vector<8xf32> to vector<8x1xf32>
    %cst_117 = arith.constant 6.400000e+01 : f32
    %357 = vector.broadcast %cst_117 : f32 to vector<8x1xf32>
    %358 = arith.divf %356, %357 : vector<8x1xf32>
    %359 = vector.broadcast %351 : vector<8x1xf32> to vector<8x64xf32>
    %360 = arith.subf %343, %359 : vector<8x64xf32>
    %cst_118 = arith.constant 9.99999974E-6 : f32
    %361 = vector.broadcast %cst_118 : f32 to vector<8x1xf32>
    %362 = arith.addf %358, %361 : vector<8x1xf32>
    %363 = math.rsqrt %362 : vector<8x1xf32>
    %364 = vector.broadcast %363 : vector<8x1xf32> to vector<8x64xf32>
    %365 = arith.mulf %360, %364 : vector<8x64xf32>
    %366 = vector.broadcast %345 : vector<1x64xf32> to vector<8x64xf32>
    %367 = arith.mulf %365, %366 : vector<8x64xf32>
    %368 = vector.broadcast %347 : vector<1x64xf32> to vector<8x64xf32>
    %369 = arith.addf %367, %368 : vector<8x64xf32>
    %370 = arith.truncf %369 : vector<8x64xf32> to vector<8x64xbf16>
    %c2 = arith.constant 2 : index
    %c0_119 = arith.constant 0 : index
    %c0_120 = arith.constant 0 : index
    %371 = vector.load %arg4[%c2, %c0_119, %c0_120] : memref<3x64x192xbf16, #tpu.memory_space<vmem>>, vector<1x64x192xbf16>
    %372 = vector.shape_cast %371 : vector<1x64x192xbf16> to vector<64x192xbf16>
    %cst_121 = arith.constant dense<0.000000e+00> : vector<8x192xf32>
    %373 = tpu.matmul %370, %372, %cst_121 {dimension_numbers = #tpu.dot_dimension_numbers<[1], [0], [0], [1], [0, 0, 1, 1], [], []>} : vector<8x64xbf16>, vector<64x192xbf16>, vector<8x192xf32> -> vector<8x192xf32>
    %c2_122 = arith.constant 2 : index
    %c0_123 = arith.constant 0 : index
    %c0_124 = arith.constant 0 : index
    %374 = vector.load %arg5[%c2_122, %c0_123, %c0_124] : memref<3x1x192xf32, #tpu.memory_space<vmem>>, vector<1x1x192xf32>
    %375 = vector.shape_cast %374 : vector<1x1x192xf32> to vector<1x192xf32>
    %376 = vector.broadcast %375 : vector<1x192xf32> to vector<8x192xf32>
    %377 = arith.addf %373, %376 : vector<8x192xf32>
    %378 = vector.extract_strided_slice %377 {offsets = [0, 0], sizes = [8, 64], strides = [1, 1]} : vector<8x192xf32> to vector<8x64xf32>
    %379 = vector.extract_strided_slice %378 {offsets = [0, 0], sizes = [8, 8], strides = [1, 1]} : vector<8x64xf32> to vector<8x8xf32>
    %380 = vector.shape_cast %379 : vector<8x8xf32> to vector<1x8x8xf32>
    %381 = vector.extract_strided_slice %378 {offsets = [0, 8], sizes = [8, 8], strides = [1, 1]} : vector<8x64xf32> to vector<8x8xf32>
    %382 = vector.shape_cast %381 : vector<8x8xf32> to vector<1x8x8xf32>
    %383 = vector.extract_strided_slice %378 {offsets = [0, 16], sizes = [8, 8], strides = [1, 1]} : vector<8x64xf32> to vector<8x8xf32>
    %384 = vector.shape_cast %383 : vector<8x8xf32> to vector<1x8x8xf32>
    %385 = vector.extract_strided_slice %378 {offsets = [0, 24], sizes = [8, 8], strides = [1, 1]} : vector<8x64xf32> to vector<8x8xf32>
    %386 = vector.shape_cast %385 : vector<8x8xf32> to vector<1x8x8xf32>
    %387 = vector.extract_strided_slice %378 {offsets = [0, 32], sizes = [8, 8], strides = [1, 1]} : vector<8x64xf32> to vector<8x8xf32>
    %388 = vector.shape_cast %387 : vector<8x8xf32> to vector<1x8x8xf32>
    %389 = vector.extract_strided_slice %378 {offsets = [0, 40], sizes = [8, 8], strides = [1, 1]} : vector<8x64xf32> to vector<8x8xf32>
    %390 = vector.shape_cast %389 : vector<8x8xf32> to vector<1x8x8xf32>
    %391 = vector.extract_strided_slice %378 {offsets = [0, 48], sizes = [8, 8], strides = [1, 1]} : vector<8x64xf32> to vector<8x8xf32>
    %392 = vector.shape_cast %391 : vector<8x8xf32> to vector<1x8x8xf32>
    %393 = vector.extract_strided_slice %378 {offsets = [0, 56], sizes = [8, 8], strides = [1, 1]} : vector<8x64xf32> to vector<8x8xf32>
    %394 = vector.shape_cast %393 : vector<8x8xf32> to vector<1x8x8xf32>
    %395 = tpu.concatenate %380, %382, %384, %386, %388, %390, %392, %394 in 0 : vector<1x8x8xf32>, vector<1x8x8xf32>, vector<1x8x8xf32>, vector<1x8x8xf32>, vector<1x8x8xf32>, vector<1x8x8xf32>, vector<1x8x8xf32>, vector<1x8x8xf32> -> vector<8x8x8xf32>
    %396 = arith.truncf %395 : vector<8x8x8xf32> to vector<8x8x8xbf16>
    %397 = vector.extract_strided_slice %377 {offsets = [0, 64], sizes = [8, 64], strides = [1, 1]} : vector<8x192xf32> to vector<8x64xf32>
    %398 = vector.extract_strided_slice %397 {offsets = [0, 0], sizes = [8, 8], strides = [1, 1]} : vector<8x64xf32> to vector<8x8xf32>
    %399 = vector.shape_cast %398 : vector<8x8xf32> to vector<1x8x8xf32>
    %400 = vector.extract_strided_slice %397 {offsets = [0, 8], sizes = [8, 8], strides = [1, 1]} : vector<8x64xf32> to vector<8x8xf32>
    %401 = vector.shape_cast %400 : vector<8x8xf32> to vector<1x8x8xf32>
    %402 = vector.extract_strided_slice %397 {offsets = [0, 16], sizes = [8, 8], strides = [1, 1]} : vector<8x64xf32> to vector<8x8xf32>
    %403 = vector.shape_cast %402 : vector<8x8xf32> to vector<1x8x8xf32>
    %404 = vector.extract_strided_slice %397 {offsets = [0, 24], sizes = [8, 8], strides = [1, 1]} : vector<8x64xf32> to vector<8x8xf32>
    %405 = vector.shape_cast %404 : vector<8x8xf32> to vector<1x8x8xf32>
    %406 = vector.extract_strided_slice %397 {offsets = [0, 32], sizes = [8, 8], strides = [1, 1]} : vector<8x64xf32> to vector<8x8xf32>
    %407 = vector.shape_cast %406 : vector<8x8xf32> to vector<1x8x8xf32>
    %408 = vector.extract_strided_slice %397 {offsets = [0, 40], sizes = [8, 8], strides = [1, 1]} : vector<8x64xf32> to vector<8x8xf32>
    %409 = vector.shape_cast %408 : vector<8x8xf32> to vector<1x8x8xf32>
    %410 = vector.extract_strided_slice %397 {offsets = [0, 48], sizes = [8, 8], strides = [1, 1]} : vector<8x64xf32> to vector<8x8xf32>
    %411 = vector.shape_cast %410 : vector<8x8xf32> to vector<1x8x8xf32>
    %412 = vector.extract_strided_slice %397 {offsets = [0, 56], sizes = [8, 8], strides = [1, 1]} : vector<8x64xf32> to vector<8x8xf32>
    %413 = vector.shape_cast %412 : vector<8x8xf32> to vector<1x8x8xf32>
    %414 = tpu.concatenate %399, %401, %403, %405, %407, %409, %411, %413 in 0 : vector<1x8x8xf32>, vector<1x8x8xf32>, vector<1x8x8xf32>, vector<1x8x8xf32>, vector<1x8x8xf32>, vector<1x8x8xf32>, vector<1x8x8xf32>, vector<1x8x8xf32> -> vector<8x8x8xf32>
    %415 = arith.truncf %414 : vector<8x8x8xf32> to vector<8x8x8xbf16>
    %416 = vector.extract_strided_slice %377 {offsets = [0, 128], sizes = [8, 64], strides = [1, 1]} : vector<8x192xf32> to vector<8x64xf32>
    %417 = vector.extract_strided_slice %416 {offsets = [0, 0], sizes = [8, 8], strides = [1, 1]} : vector<8x64xf32> to vector<8x8xf32>
    %418 = vector.shape_cast %417 : vector<8x8xf32> to vector<1x8x8xf32>
    %419 = vector.extract_strided_slice %416 {offsets = [0, 8], sizes = [8, 8], strides = [1, 1]} : vector<8x64xf32> to vector<8x8xf32>
    %420 = vector.shape_cast %419 : vector<8x8xf32> to vector<1x8x8xf32>
    %421 = vector.extract_strided_slice %416 {offsets = [0, 16], sizes = [8, 8], strides = [1, 1]} : vector<8x64xf32> to vector<8x8xf32>
    %422 = vector.shape_cast %421 : vector<8x8xf32> to vector<1x8x8xf32>
    %423 = vector.extract_strided_slice %416 {offsets = [0, 24], sizes = [8, 8], strides = [1, 1]} : vector<8x64xf32> to vector<8x8xf32>
    %424 = vector.shape_cast %423 : vector<8x8xf32> to vector<1x8x8xf32>
    %425 = vector.extract_strided_slice %416 {offsets = [0, 32], sizes = [8, 8], strides = [1, 1]} : vector<8x64xf32> to vector<8x8xf32>
    %426 = vector.shape_cast %425 : vector<8x8xf32> to vector<1x8x8xf32>
    %427 = vector.extract_strided_slice %416 {offsets = [0, 40], sizes = [8, 8], strides = [1, 1]} : vector<8x64xf32> to vector<8x8xf32>
    %428 = vector.shape_cast %427 : vector<8x8xf32> to vector<1x8x8xf32>
    %429 = vector.extract_strided_slice %416 {offsets = [0, 48], sizes = [8, 8], strides = [1, 1]} : vector<8x64xf32> to vector<8x8xf32>
    %430 = vector.shape_cast %429 : vector<8x8xf32> to vector<1x8x8xf32>
    %431 = vector.extract_strided_slice %416 {offsets = [0, 56], sizes = [8, 8], strides = [1, 1]} : vector<8x64xf32> to vector<8x8xf32>
    %432 = vector.shape_cast %431 : vector<8x8xf32> to vector<1x8x8xf32>
    %433 = tpu.concatenate %418, %420, %422, %424, %426, %428, %430, %432 in 0 : vector<1x8x8xf32>, vector<1x8x8xf32>, vector<1x8x8xf32>, vector<1x8x8xf32>, vector<1x8x8xf32>, vector<1x8x8xf32>, vector<1x8x8xf32>, vector<1x8x8xf32> -> vector<8x8x8xf32>
    %434 = arith.truncf %433 : vector<8x8x8xf32> to vector<8x8x8xbf16>
    "tpu.trace_start"() <{level = 10 : i32, message = "bqd,bkd->bqk"}> : () -> ()
    %cst_125 = arith.constant dense<0.000000e+00> : vector<8x8x8xf32>
    %435 = tpu.matmul %396, %415, %cst_125 {dimension_numbers = #tpu.dot_dimension_numbers<[2], [2], [1], [1], [0, 0, 0, 1, 1, 1], [0], [0]>} : vector<8x8x8xbf16>, vector<8x8x8xbf16>, vector<8x8x8xf32> -> vector<8x8x8xf32>
    "tpu.trace_stop"() : () -> ()
    %cst_126 = arith.constant 0.353553385 : f32
    %436 = vector.broadcast %cst_126 : f32 to vector<8x8x8xf32>
    %437 = arith.mulf %435, %436 : vector<8x8x8xf32>
    %438 = vector.shape_cast %5 : vector<8x8xf32> to vector<1x8x8xf32>
    %439 = vector.broadcast %438 : vector<1x8x8xf32> to vector<8x8x8xf32>
    %440 = arith.addf %437, %439 : vector<8x8x8xf32>
    %cst_127 = arith.constant dense<0xFF800000> : vector<8x8xf32>
    %441 = vector.multi_reduction <maximumf>, %440, %cst_127 [2] : vector<8x8x8xf32> to vector<8x8xf32>
    %442 = vector.shape_cast %441 : vector<8x8xf32> to vector<8x8x1xf32>
    %443 = vector.broadcast %442 : vector<8x8x1xf32> to vector<8x8x8xf32>
    %444 = arith.subf %440, %443 : vector<8x8x8xf32>
    %445 = math.exp %444 : vector<8x8x8xf32>
    %cst_128 = arith.constant dense<0.000000e+00> : vector<8x8xf32>
    %446 = vector.multi_reduction <add>, %445, %cst_128 [2] : vector<8x8x8xf32> to vector<8x8xf32>
    %447 = vector.shape_cast %446 : vector<8x8xf32> to vector<8x8x1xf32>
    %448 = vector.broadcast %447 : vector<8x8x1xf32> to vector<8x8x8xf32>
    %449 = arith.divf %445, %448 : vector<8x8x8xf32>
    %450 = arith.truncf %449 : vector<8x8x8xf32> to vector<8x8x8xbf16>
    "tpu.trace_start"() <{level = 10 : i32, message = "bqk,bkd->bqd"}> : () -> ()
    %cst_129 = arith.constant dense<0.000000e+00> : vector<8x8x8xf32>
    %451 = tpu.matmul %450, %434, %cst_129 {dimension_numbers = #tpu.dot_dimension_numbers<[2], [1], [1], [2], [0, 0, 0, 1, 1, 2], [0], [0]>} : vector<8x8x8xbf16>, vector<8x8x8xbf16>, vector<8x8x8xf32> -> vector<8x8x8xf32>
    "tpu.trace_stop"() : () -> ()
    %452 = vector.extract_strided_slice %451 {offsets = [0, 0, 0], sizes = [1, 8, 8], strides = [1, 1, 1]} : vector<8x8x8xf32> to vector<1x8x8xf32>
    %453 = vector.shape_cast %452 : vector<1x8x8xf32> to vector<8x8xf32>
    %454 = vector.extract_strided_slice %451 {offsets = [1, 0, 0], sizes = [1, 8, 8], strides = [1, 1, 1]} : vector<8x8x8xf32> to vector<1x8x8xf32>
    %455 = vector.shape_cast %454 : vector<1x8x8xf32> to vector<8x8xf32>
    %456 = vector.extract_strided_slice %451 {offsets = [2, 0, 0], sizes = [1, 8, 8], strides = [1, 1, 1]} : vector<8x8x8xf32> to vector<1x8x8xf32>
    %457 = vector.shape_cast %456 : vector<1x8x8xf32> to vector<8x8xf32>
    %458 = vector.extract_strided_slice %451 {offsets = [3, 0, 0], sizes = [1, 8, 8], strides = [1, 1, 1]} : vector<8x8x8xf32> to vector<1x8x8xf32>
    %459 = vector.shape_cast %458 : vector<1x8x8xf32> to vector<8x8xf32>
    %460 = vector.extract_strided_slice %451 {offsets = [4, 0, 0], sizes = [1, 8, 8], strides = [1, 1, 1]} : vector<8x8x8xf32> to vector<1x8x8xf32>
    %461 = vector.shape_cast %460 : vector<1x8x8xf32> to vector<8x8xf32>
    %462 = vector.extract_strided_slice %451 {offsets = [5, 0, 0], sizes = [1, 8, 8], strides = [1, 1, 1]} : vector<8x8x8xf32> to vector<1x8x8xf32>
    %463 = vector.shape_cast %462 : vector<1x8x8xf32> to vector<8x8xf32>
    %464 = vector.extract_strided_slice %451 {offsets = [6, 0, 0], sizes = [1, 8, 8], strides = [1, 1, 1]} : vector<8x8x8xf32> to vector<1x8x8xf32>
    %465 = vector.shape_cast %464 : vector<1x8x8xf32> to vector<8x8xf32>
    %466 = vector.extract_strided_slice %451 {offsets = [7, 0, 0], sizes = [1, 8, 8], strides = [1, 1, 1]} : vector<8x8x8xf32> to vector<1x8x8xf32>
    %467 = vector.shape_cast %466 : vector<1x8x8xf32> to vector<8x8xf32>
    %468 = tpu.concatenate %453, %455, %457, %459, %461, %463, %465, %467 in 1 : vector<8x8xf32>, vector<8x8xf32>, vector<8x8xf32>, vector<8x8xf32>, vector<8x8xf32>, vector<8x8xf32>, vector<8x8xf32>, vector<8x8xf32> -> vector<8x64xf32>
    %469 = arith.truncf %468 : vector<8x64xf32> to vector<8x64xbf16>
    %c2_130 = arith.constant 2 : index
    %c0_131 = arith.constant 0 : index
    %c0_132 = arith.constant 0 : index
    %470 = vector.load %arg6[%c2_130, %c0_131, %c0_132] : memref<3x64x64xbf16, #tpu.memory_space<vmem>>, vector<1x64x64xbf16>
    %471 = vector.shape_cast %470 : vector<1x64x64xbf16> to vector<64x64xbf16>
    %cst_133 = arith.constant dense<0.000000e+00> : vector<8x64xf32>
    %472 = tpu.matmul %469, %471, %cst_133 {dimension_numbers = #tpu.dot_dimension_numbers<[1], [0], [0], [1], [0, 0, 1, 1], [], []>} : vector<8x64xbf16>, vector<64x64xbf16>, vector<8x64xf32> -> vector<8x64xf32>
    %c2_134 = arith.constant 2 : index
    %c0_135 = arith.constant 0 : index
    %c0_136 = arith.constant 0 : index
    %473 = vector.load %arg7[%c2_134, %c0_135, %c0_136] : memref<3x1x64xf32, #tpu.memory_space<vmem>>, vector<1x1x64xf32>
    %474 = vector.shape_cast %473 : vector<1x1x64xf32> to vector<1x64xf32>
    %475 = vector.broadcast %474 : vector<1x64xf32> to vector<8x64xf32>
    %476 = arith.addf %472, %475 : vector<8x64xf32>
    %477 = arith.addf %369, %476 : vector<8x64xf32>
    %c2_137 = arith.constant 2 : index
    %c0_138 = arith.constant 0 : index
    %c0_139 = arith.constant 0 : index
    %478 = vector.load %arg8[%c2_137, %c0_138, %c0_139] : memref<3x1x64xf32, #tpu.memory_space<vmem>>, vector<1x1x64xf32>
    %479 = vector.shape_cast %478 : vector<1x1x64xf32> to vector<1x64xf32>
    %c2_140 = arith.constant 2 : index
    %c0_141 = arith.constant 0 : index
    %c0_142 = arith.constant 0 : index
    %480 = vector.load %arg9[%c2_140, %c0_141, %c0_142] : memref<3x1x64xf32, #tpu.memory_space<vmem>>, vector<1x1x64xf32>
    %481 = vector.shape_cast %480 : vector<1x1x64xf32> to vector<1x64xf32>
    %cst_143 = arith.constant dense<0.000000e+00> : vector<8xf32>
    %482 = vector.multi_reduction <add>, %477, %cst_143 [1] : vector<8x64xf32> to vector<8xf32>
    %483 = vector.shape_cast %482 : vector<8xf32> to vector<8x1xf32>
    %cst_144 = arith.constant 6.400000e+01 : f32
    %484 = vector.broadcast %cst_144 : f32 to vector<8x1xf32>
    %485 = arith.divf %483, %484 : vector<8x1xf32>
    %486 = vector.broadcast %485 : vector<8x1xf32> to vector<8x64xf32>
    %487 = arith.subf %477, %486 : vector<8x64xf32>
    %488 = arith.mulf %487, %487 : vector<8x64xf32>
    %cst_145 = arith.constant dense<0.000000e+00> : vector<8xf32>
    %489 = vector.multi_reduction <add>, %488, %cst_145 [1] : vector<8x64xf32> to vector<8xf32>
    %490 = vector.shape_cast %489 : vector<8xf32> to vector<8x1xf32>
    %cst_146 = arith.constant 6.400000e+01 : f32
    %491 = vector.broadcast %cst_146 : f32 to vector<8x1xf32>
    %492 = arith.divf %490, %491 : vector<8x1xf32>
    %493 = vector.broadcast %485 : vector<8x1xf32> to vector<8x64xf32>
    %494 = arith.subf %477, %493 : vector<8x64xf32>
    %cst_147 = arith.constant 9.99999974E-6 : f32
    %495 = vector.broadcast %cst_147 : f32 to vector<8x1xf32>
    %496 = arith.addf %492, %495 : vector<8x1xf32>
    %497 = math.rsqrt %496 : vector<8x1xf32>
    %498 = vector.broadcast %497 : vector<8x1xf32> to vector<8x64xf32>
    %499 = arith.mulf %494, %498 : vector<8x64xf32>
    %500 = vector.broadcast %479 : vector<1x64xf32> to vector<8x64xf32>
    %501 = arith.mulf %499, %500 : vector<8x64xf32>
    %502 = vector.broadcast %481 : vector<1x64xf32> to vector<8x64xf32>
    %503 = arith.addf %501, %502 : vector<8x64xf32>
    %504 = arith.truncf %503 : vector<8x64xf32> to vector<8x64xbf16>
    %c2_148 = arith.constant 2 : index
    %c0_149 = arith.constant 0 : index
    %c0_150 = arith.constant 0 : index
    %505 = vector.load %arg10[%c2_148, %c0_149, %c0_150] : memref<3x64x64xbf16, #tpu.memory_space<vmem>>, vector<1x64x64xbf16>
    %506 = vector.shape_cast %505 : vector<1x64x64xbf16> to vector<64x64xbf16>
    %cst_151 = arith.constant dense<0.000000e+00> : vector<8x64xf32>
    %507 = tpu.matmul %504, %506, %cst_151 {dimension_numbers = #tpu.dot_dimension_numbers<[1], [0], [0], [1], [0, 0, 1, 1], [], []>} : vector<8x64xbf16>, vector<64x64xbf16>, vector<8x64xf32> -> vector<8x64xf32>
    %c2_152 = arith.constant 2 : index
    %c0_153 = arith.constant 0 : index
    %c0_154 = arith.constant 0 : index
    %508 = vector.load %arg11[%c2_152, %c0_153, %c0_154] : memref<3x1x64xf32, #tpu.memory_space<vmem>>, vector<1x1x64xf32>
    %509 = vector.shape_cast %508 : vector<1x1x64xf32> to vector<1x64xf32>
    %510 = vector.broadcast %509 : vector<1x64xf32> to vector<8x64xf32>
    %511 = arith.addf %507, %510 : vector<8x64xf32>
    %cst_155 = arith.constant 0.000000e+00 : f32
    %512 = vector.broadcast %cst_155 : f32 to vector<8x64xf32>
    %513 = arith.maximumf %511, %512 : vector<8x64xf32>
    %514 = arith.truncf %513 : vector<8x64xf32> to vector<8x64xbf16>
    %c2_156 = arith.constant 2 : index
    %c0_157 = arith.constant 0 : index
    %c0_158 = arith.constant 0 : index
    %515 = vector.load %arg12[%c2_156, %c0_157, %c0_158] : memref<3x64x64xbf16, #tpu.memory_space<vmem>>, vector<1x64x64xbf16>
    %516 = vector.shape_cast %515 : vector<1x64x64xbf16> to vector<64x64xbf16>
    %cst_159 = arith.constant dense<0.000000e+00> : vector<8x64xf32>
    %517 = tpu.matmul %514, %516, %cst_159 {dimension_numbers = #tpu.dot_dimension_numbers<[1], [0], [0], [1], [0, 0, 1, 1], [], []>} : vector<8x64xbf16>, vector<64x64xbf16>, vector<8x64xf32> -> vector<8x64xf32>
    %c2_160 = arith.constant 2 : index
    %c0_161 = arith.constant 0 : index
    %c0_162 = arith.constant 0 : index
    %518 = vector.load %arg13[%c2_160, %c0_161, %c0_162] : memref<3x1x64xf32, #tpu.memory_space<vmem>>, vector<1x1x64xf32>
    %519 = vector.shape_cast %518 : vector<1x1x64xf32> to vector<1x64xf32>
    %520 = vector.broadcast %519 : vector<1x64xf32> to vector<8x64xf32>
    %521 = arith.addf %517, %520 : vector<8x64xf32>
    %522 = arith.addf %503, %521 : vector<8x64xf32>
    %c2_163 = arith.constant 2 : index
    %c0_164 = arith.constant 0 : index
    %c0_165 = arith.constant 0 : index
    %523 = vector.load %arg14[%c2_163, %c0_164, %c0_165] : memref<3x1x64xf32, #tpu.memory_space<vmem>>, vector<1x1x64xf32>
    %524 = vector.shape_cast %523 : vector<1x1x64xf32> to vector<1x64xf32>
    %c2_166 = arith.constant 2 : index
    %c0_167 = arith.constant 0 : index
    %c0_168 = arith.constant 0 : index
    %525 = vector.load %arg15[%c2_166, %c0_167, %c0_168] : memref<3x1x64xf32, #tpu.memory_space<vmem>>, vector<1x1x64xf32>
    %526 = vector.shape_cast %525 : vector<1x1x64xf32> to vector<1x64xf32>
    %cst_169 = arith.constant dense<0.000000e+00> : vector<8xf32>
    %527 = vector.multi_reduction <add>, %522, %cst_169 [1] : vector<8x64xf32> to vector<8xf32>
    %528 = vector.shape_cast %527 : vector<8xf32> to vector<8x1xf32>
    %cst_170 = arith.constant 6.400000e+01 : f32
    %529 = vector.broadcast %cst_170 : f32 to vector<8x1xf32>
    %530 = arith.divf %528, %529 : vector<8x1xf32>
    %531 = vector.broadcast %530 : vector<8x1xf32> to vector<8x64xf32>
    %532 = arith.subf %522, %531 : vector<8x64xf32>
    %533 = arith.mulf %532, %532 : vector<8x64xf32>
    %cst_171 = arith.constant dense<0.000000e+00> : vector<8xf32>
    %534 = vector.multi_reduction <add>, %533, %cst_171 [1] : vector<8x64xf32> to vector<8xf32>
    %535 = vector.shape_cast %534 : vector<8xf32> to vector<8x1xf32>
    %cst_172 = arith.constant 6.400000e+01 : f32
    %536 = vector.broadcast %cst_172 : f32 to vector<8x1xf32>
    %537 = arith.divf %535, %536 : vector<8x1xf32>
    %538 = vector.broadcast %530 : vector<8x1xf32> to vector<8x64xf32>
    %539 = arith.subf %522, %538 : vector<8x64xf32>
    %cst_173 = arith.constant 9.99999974E-6 : f32
    %540 = vector.broadcast %cst_173 : f32 to vector<8x1xf32>
    %541 = arith.addf %537, %540 : vector<8x1xf32>
    %542 = math.rsqrt %541 : vector<8x1xf32>
    %543 = vector.broadcast %542 : vector<8x1xf32> to vector<8x64xf32>
    %544 = arith.mulf %539, %543 : vector<8x64xf32>
    %545 = vector.broadcast %524 : vector<1x64xf32> to vector<8x64xf32>
    %546 = arith.mulf %544, %545 : vector<8x64xf32>
    %547 = vector.broadcast %526 : vector<1x64xf32> to vector<8x64xf32>
    %548 = arith.addf %546, %547 : vector<8x64xf32>
    %549 = arith.truncf %548 : vector<8x64xf32> to vector<8x64xbf16>
    %c0_174 = arith.constant 0 : index
    %c0_175 = arith.constant 0 : index
    %550 = vector.load %arg16[%c0_174, %c0_175] : memref<64x32xbf16, #tpu.memory_space<vmem>>, vector<64x32xbf16>
    %cst_176 = arith.constant dense<0.000000e+00> : vector<8x32xf32>
    %551 = tpu.matmul %549, %550, %cst_176 {dimension_numbers = #tpu.dot_dimension_numbers<[1], [0], [0], [1], [0, 0, 1, 1], [], []>} : vector<8x64xbf16>, vector<64x32xbf16>, vector<8x32xf32> -> vector<8x32xf32>
    %c0_177 = arith.constant 0 : index
    %c0_178 = arith.constant 0 : index
    %552 = vector.load %arg17[%c0_177, %c0_178] : memref<1x32xf32, #tpu.memory_space<vmem>>, vector<1x32xf32>
    %553 = vector.broadcast %552 : vector<1x32xf32> to vector<8x32xf32>
    %554 = arith.addf %551, %553 : vector<8x32xf32>
    %c0_179 = arith.constant 0 : index
    %c0_180 = arith.constant 0 : index
    %c0_181 = arith.constant 0 : index
    %555 = vector.load %arg18[%c0_179, %c0_180, %c0_181] : memref<1x8x32xf32, #tpu.memory_space<vmem>>, vector<1x8x32xf32>
    %556 = vector.shape_cast %555 : vector<1x8x32xf32> to vector<8x32xf32>
    %557 = vector.shape_cast %554 : vector<8x32xf32> to vector<1x8x32xf32>
    tpu.vector_store %arg18[%c0_179, %c0_180, %c0_181], %557 {strides = array<i32>} : memref<1x8x32xf32, #tpu.memory_space<vmem>>, vector<1x8x32xf32>,
    return
  }
  func.func @transform_0(%arg0: i32) -> (i32, i32, i32) {
    %c0_i32 = arith.constant 0 : i32
    %c0_i32_0 = arith.constant 0 : i32
    %c0_i32_1 = arith.constant 0 : i32
    return %arg0, %c0_i32, %c0_i32_0 : i32, i32, i32
  }
  func.func @transform_1(%arg0: i32) -> (i32, i32) {
    %c0_i32 = arith.constant 0 : i32
    %c0_i32_0 = arith.constant 0 : i32
    %c0_i32_1 = arith.constant 0 : i32
    return %c0_i32, %c0_i32_0 : i32, i32
  }
  func.func @transform_2(%arg0: i32) -> (i32, i32) {
    %c0_i32 = arith.constant 0 : i32
    %c0_i32_0 = arith.constant 0 : i32
    %c0_i32_1 = arith.constant 0 : i32
    return %c0_i32, %c0_i32_0 : i32, i32
  }
  func.func @transform_3(%arg0: i32) -> (i32, i32, i32) {
    %c0_i32 = arith.constant 0 : i32
    %c0_i32_0 = arith.constant 0 : i32
    %c0_i32_1 = arith.constant 0 : i32
    %c0_i32_2 = arith.constant 0 : i32
    return %c0_i32, %c0_i32_0, %c0_i32_1 : i32, i32, i32
  }
  func.func @transform_4(%arg0: i32) -> (i32, i32, i32) {
    %c0_i32 = arith.constant 0 : i32
    %c0_i32_0 = arith.constant 0 : i32
    %c0_i32_1 = arith.constant 0 : i32
    %c0_i32_2 = arith.constant 0 : i32
    return %c0_i32, %c0_i32_0, %c0_i32_1 : i32, i32, i32
  }
  func.func @transform_5(%arg0: i32) -> (i32, i32, i32) {
    %c0_i32 = arith.constant 0 : i32
    %c0_i32_0 = arith.constant 0 : i32
    %c0_i32_1 = arith.constant 0 : i32
    %c0_i32_2 = arith.constant 0 : i32
    return %c0_i32, %c0_i32_0, %c0_i32_1 : i32, i32, i32
  }
  func.func @transform_6(%arg0: i32) -> (i32, i32, i32) {
    %c0_i32 = arith.constant 0 : i32
    %c0_i32_0 = arith.constant 0 : i32
    %c0_i32_1 = arith.constant 0 : i32
    %c0_i32_2 = arith.constant 0 : i32
    return %c0_i32, %c0_i32_0, %c0_i32_1 : i32, i32, i32
  }
  func.func @transform_7(%arg0: i32) -> (i32, i32, i32) {
    %c0_i32 = arith.constant 0 : i32
    %c0_i32_0 = arith.constant 0 : i32
    %c0_i32_1 = arith.constant 0 : i32
    %c0_i32_2 = arith.constant 0 : i32
    return %c0_i32, %c0_i32_0, %c0_i32_1 : i32, i32, i32
  }
  func.func @transform_8(%arg0: i32) -> (i32, i32, i32) {
    %c0_i32 = arith.constant 0 : i32
    %c0_i32_0 = arith.constant 0 : i32
    %c0_i32_1 = arith.constant 0 : i32
    %c0_i32_2 = arith.constant 0 : i32
    return %c0_i32, %c0_i32_0, %c0_i32_1 : i32, i32, i32
  }
  func.func @transform_9(%arg0: i32) -> (i32, i32, i32) {
    %c0_i32 = arith.constant 0 : i32
    %c0_i32_0 = arith.constant 0 : i32
    %c0_i32_1 = arith.constant 0 : i32
    %c0_i32_2 = arith.constant 0 : i32
    return %c0_i32, %c0_i32_0, %c0_i32_1 : i32, i32, i32
  }
  func.func @transform_10(%arg0: i32) -> (i32, i32, i32) {
    %c0_i32 = arith.constant 0 : i32
    %c0_i32_0 = arith.constant 0 : i32
    %c0_i32_1 = arith.constant 0 : i32
    %c0_i32_2 = arith.constant 0 : i32
    return %c0_i32, %c0_i32_0, %c0_i32_1 : i32, i32, i32
  }
  func.func @transform_11(%arg0: i32) -> (i32, i32, i32) {
    %c0_i32 = arith.constant 0 : i32
    %c0_i32_0 = arith.constant 0 : i32
    %c0_i32_1 = arith.constant 0 : i32
    %c0_i32_2 = arith.constant 0 : i32
    return %c0_i32, %c0_i32_0, %c0_i32_1 : i32, i32, i32
  }
  func.func @transform_12(%arg0: i32) -> (i32, i32, i32) {
    %c0_i32 = arith.constant 0 : i32
    %c0_i32_0 = arith.constant 0 : i32
    %c0_i32_1 = arith.constant 0 : i32
    %c0_i32_2 = arith.constant 0 : i32
    return %c0_i32, %c0_i32_0, %c0_i32_1 : i32, i32, i32
  }
  func.func @transform_13(%arg0: i32) -> (i32, i32, i32) {
    %c0_i32 = arith.constant 0 : i32
    %c0_i32_0 = arith.constant 0 : i32
    %c0_i32_1 = arith.constant 0 : i32
    %c0_i32_2 = arith.constant 0 : i32
    return %c0_i32, %c0_i32_0, %c0_i32_1 : i32, i32, i32
  }
  func.func @transform_14(%arg0: i32) -> (i32, i32, i32) {
    %c0_i32 = arith.constant 0 : i32
    %c0_i32_0 = arith.constant 0 : i32
    %c0_i32_1 = arith.constant 0 : i32
    %c0_i32_2 = arith.constant 0 : i32
    return %c0_i32, %c0_i32_0, %c0_i32_1 : i32, i32, i32
  }
  func.func @transform_15(%arg0: i32) -> (i32, i32) {
    %c0_i32 = arith.constant 0 : i32
    %c0_i32_0 = arith.constant 0 : i32
    %c0_i32_1 = arith.constant 0 : i32
    return %c0_i32, %c0_i32_0 : i32, i32
  }
  func.func @transform_16(%arg0: i32) -> (i32, i32) {
    %c0_i32 = arith.constant 0 : i32
    %c0_i32_0 = arith.constant 0 : i32
    %c0_i32_1 = arith.constant 0 : i32
    return %c0_i32, %c0_i32_0 : i32, i32
  }
  func.func @transform_17(%arg0: i32) -> (i32, i32, i32) {
    %c0_i32 = arith.constant 0 : i32
    %c0_i32_0 = arith.constant 0 : i32
    %c0_i32_1 = arith.constant 0 : i32
    return %arg0, %c0_i32, %c0_i32_0 : i32, i32, i32
  }
}

</mosaic_0001>

<bundles_post_ra>
// kernel: generator_forward.1
= control target key start
LH: loop header
LB: loop body
LE: loop exit
PB: predicated region body
PF: predicated region fallthrough
CT: control target
= control target key end

     0   :  { %s6088_s24 = smov 0   ;;  %s7089_s0 = inlined_call_operand.vmem [shape: f32[2,8,32], index: 0, kind: input, shape index: {}]   ;;  %s7090_s1 = inlined_call_operand.vmem [shape: f32[8,64], index: 1, kind: input, shape index: {}]   ;;  %s7091_s2 = inlined_call_operand.vmem [shape: f32[32,64], index: 2, kind: input, shape index: {}]   ;;  %s7092_s3 = inlined_call_operand.vmem [shape: bf16[3,64,192], index: 3, kind: input, shape index: {}]   ;;  %s7093_s4 = inlined_call_operand.vmem [shape: f32[3,1,192], index: 4, kind: input, shape index: {}]   ;;  %s7094_s5 = inlined_call_operand.vmem [shape: bf16[3,64,64], index: 5, kind: input, shape index: {}]   ;;  %s7095_s6 = inlined_call_operand.vmem [shape: f32[3,1,64], index: 6, kind: input, shape index: {}]   ;;  %s7096_s7 = inlined_call_operand.vmem [shape: f32[3,1,64], index: 7, kind: input, shape index: {}]   ;;  %s7097_s8 = inlined_call_operand.vmem [shape: f32[3,1,64], index: 8, kind: input, shape index: {}]   ;;  %s7098_s9 = inlined_call_operand.vmem [shape: bf16[3,64,64], index: 9, kind: input, shape index: {}]   ;;  %s7099_s10 = inlined_call_operand.vmem [shape: f32[3,1,64], index: 10, kind: input, shape index: {}]   ;;  %s7100_s11 = inlined_call_operand.vmem [shape: bf16[3,64,64], index: 11, kind: input, shape index: {}]   ;;  %s7101_s12 = inlined_call_operand.vmem [shape: f32[3,1,64], index: 12, kind: input, shape index: {}]   ;;  %s7102_s13 = inlined_call_operand.vmem [shape: f32[3,1,64], index: 13, kind: input, shape index: {}]   ;;  %s7103_s14 = inlined_call_operand.vmem [shape: f32[3,1,64], index: 14, kind: input, shape index: {}]   ;;  %s7104_s15 = inlined_call_operand.vmem [shape: bf16[64,32], index: 15, kind: input, shape index: {}]   ;;  %s7105_s16 = inlined_call_operand.vmem [shape: f32[1,32], index: 16, kind: input, shape index: {}]   ;;  %s7106_s17 = inlined_call_operand.vmem [shape: f32[2,8,32], index: 17, kind: output, shape index: {}]  }
   0x1   :  { %7141 = sst [smem:[#allocation4_spill]] %s7089_s0 }
   0x2   :  { %7142 = sst [smem:[#allocation5_spill]] %s7090_s1 }
   0x3   :  { %7143 = sst [smem:[#allocation6_spill]] %s7091_s2 }
   0x4   :  { %7144 = sst [smem:[#allocation7_spill]] %s7095_s6 }
   0x5   :  { %7145 = sst [smem:[#allocation8_spill]] %s7099_s10 }
   0x6   :  { %7146 = sst [smem:[#allocation9_spill]] %s7101_s12 }
   0x7   :  { %7147 = sst [smem:[#allocation10_spill]] %s7104_s15 }
   0x8   :  { %7148 = sst [smem:[#allocation11_spill]] %s7105_s16 }
   0x9   :  { %7149 = sst [smem:[#allocation12_spill]] %s7106_s17 }
   0xa LB: > { %7150 = sst [smem:[#allocation2_spill]] %s5977_s24  ;;  %s4947_s25 = sadd.s32 4294967295, %s5977_s24   ;;  %s5977_s24 = sphi %s6088_s24, %s27_s24  }
   0xb   : > { %p4951_p0 = scmp.ge.s32.totalorder %s5977_s24, 1  ;;  %p486_p1 = scmp.lt.s32.totalorder %s5977_s24, 3 }
   0xd   : > { %p487_p2 = pnand %p4951_p0, %p486_p1 }
   0xf   : > { %490 = sbr.rel (%p487_p2) target bundleno = 8420 (0x20e4), region = 88 }
  0x16   : > { %s7151_s2 = sld [smem:[#allocation6_spill]]  ;;  %v5979_v3 = vmov 0.0|0.0   ;;  %vm5980_vm0 = vmmov 0   ;;  %v5981_v6 = vmov 0.0   ;;  %p536_p3 = scmp.lt.s32.totalorder %s4947_s25, 1  ;;  %vm557_vm1 = vcmask 261120  }
  0x17   : > { %5754 = vmatprep.subr.bf16.mxu0 %v5979_v3  ;;  %5343 = vmatprep.mubr.msk.f32.mxu0 %vm5980_vm0, %v5981_v6  ;;  %v5787_v7 = vld [vmem:[%s7092_s3 + $0x4] ss:$8 sps:$4 sm:$0xff]   ;;  %v5789_v8 = vld [vmem:[%s7092_s3] ss:$8 sps:$4 sm:$0xff]   ;;  %v5790_v10 = vld [vmem:[%s7092_s3 + $0x14] ss:$8 sps:$4 sm:$0xff]   ;;  %v545_v23 = vlaneseq }
  0x18   : > { %s7184_s25 = smov (!%p536_p3, %s4947_s25), 1  ;;  %696 = vmatprep.subr.bf16.mxu1 %v5787_v7  ;;  %v5792_v11 = vld [vmem:[%s7092_s3 + $0x10] ss:$8 sps:$4 sm:$0xff]   ;;  %v5793_v12 = vld [vmem:[%s7092_s3 + $0x24] ss:$8 sps:$4 sm:$0xff]   ;;  %s7153_s1 = sld [smem:[#allocation4_spill]] }
  0x19   : > { %7152 = sst [smem:[#allocation3_spill]] %s7184_s25  ;;  %s7107_s27 = sshll.u32 %s7184_s25, 3  ;;  %697 = vmatpush1.bf16.msra.mxu1 %v5789_v8  ;;  %v5795_v14 = vld [vmem:[%s7092_s3 + $0x20] ss:$8 sps:$4 sm:$0xff]   ;;  %v5796_v15 = vld [vmem:[%s7092_s3 + $0x34] ss:$8 sps:$4 sm:$0xff]  }
  0x1a   : > { %698 = vmatprep.subr.bf16.mxu1 %v5790_v10  ;;  %v5798_v16 = vld [vmem:[%s7092_s3 + $0x30] ss:$8 sps:$4 sm:$0xff]   ;;  %v5982_v17 = vmov 0   ;;  %s7154_s18 = sld [smem:[#allocation5_spill]]  ;;  %vm692_vm2 = vcmask 523264   ;;  %v6159_v24 = vshrl.u32 %v545_v23, 7 }
  0x1b   : > { %728 = vmatprep.mubr.bf16.mxu1 %v5982_v17  ;;  %v640_v26 = vld [vmem:[%s7093_s4] sm:$0x3]  ;;  %s7134_s21 = smov 120   ;;  %s7130_s22 = smov 96   ;;  %vm800_vm3 = vcmask 64512   ;;  %vm1305_vm4 = vcmask 1043456  }
  0x1c   : > { %v552_v0 = vld [vmem:[%s7151_s2] sm:$0xff]  ;;  %v553_v1 = vld [vmem:[%s7151_s2 + $0x8] sm:$0xff]  ;;  %v554_v2 = vld [vmem:[%s7151_s2 + $0x10] sm:$0xff]  ;;  %v6162_v25 = vsub.s32 0, %v6159_v24  ;;  %s7136_s23 = smov 112   ;;  %s7126_s26 = smov 80  }
  0x1d   : > { %v5755_v4 = vpack.c.bf16 %v553_v1, %v552_v0  ;;  %v555_v5 = vld [vmem:[%s7151_s2 + $0x18] sm:$0xff]  ;;  %699 = vmatpush1.bf16.msra.mxu1 %v5792_v11  ;;  %s7128_s28 = smov 88   ;;  %s7112_s29 = smov 72   ;;  %v6180_v43 = vsub.s32 1, %v6159_v24  ;;  %vm1700_vm6 = vcmask 130048   ;;  %vm1702_vm7 = vcmask 195584  }
  0x1e   : > { %v5758_v9 = vpack.c.bf16 %v555_v5, %v554_v2  ;;  %s539_s20 = scalar_lea.vmem %s7153_s1, %s7107_s27  ;;  %700 = vmatprep.subr.bf16.mxu1 %v5793_v12  ;;  %v645_v27 = vrot.slane %v640_v26, %v6162_v25  ;;  %s7108_s0 = smov 64   ;;  %vm1705_vm8 = vcmask 326656   ;;  %vm1707_vm9 = vcmask 392192  }
  0x1f   : > { %5756 = vmatpush3.bf16.msra.mxu0 %v5755_v4  ;;  %v551_v13 = vld [vmem:[%s539_s20] sm:$0xff]  ;;  %s7132_s20 = smov 104   ;;  %v649_v48 = vrot.slane %v640_v26, %v6180_v43  ;;  %s7110_s30 = smov 8   ;;  %vm1709_vm10 = vcmask 457728  }
  0x20   : > { %5757 = vmatprep.subr.bf16.mxu0 %v5979_v3  ;;  %v556_v18 = vld [vmem:[%s7154_s18] sm:$0xff]  ;;  %s7114_s18 = smov 16   ;;  %s7116_s1 = smov 56  }
  0x21   : > { %701 = vmatpush1.bf16.msra.mxu1 %v5795_v14  ;;  %s7155_s6 = sld [smem:[#allocation7_spill]]  ;;  %s7156_s10 = sld [smem:[#allocation8_spill]] }
  0x22   : > { %702 = vmatprep.subr.bf16.mxu1 %v5796_v15  ;;  %s7157_s12 = sld [smem:[#allocation9_spill]]  ;;  %s7159_s27 = smov 88  }
  0x23   : > { %5759 = vmatpush3.bf16.msra.mxu0 %v5758_v9  ;;  %v548_v9 = vand.u32 127, %v545_v23  ;;  %s7169_s2 = smov 56   ;;  %s7170_s17 = smov 112  }
  0x24   : > { %5346 = vmatprep.subr.bf16.mxu0 %v5981_v6  ;;  %s7171_s19 = smov 120   ;;  %s7176_s24 = sld [smem:[#allocation10_spill]] }
  0x25   : > { %703 = vmatpush1.bf16.msra.mxu1 %v5798_v16  ;;  %vm549_vm5 = vcmp.gt.s32.totalorder %v548_v9, %v6159_v24 }
  0x26   : > { %5344 = vmatmul.mubr.msk.f32.vlgmr.msra.gmra.mrb[0].mxu0 %vm557_vm1, %v551_v13  ;;  %5358 = vmatprep.subr.bf16.mxu1 %v5981_v6  ;;  %v6240_v10 = vsel %vm549_vm5, -1e+30, %v5981_v6 }
  0x27   : > { %5348 = vmatprep.mubr.msk.bf16.mxu0 %vm5980_vm0, %v5981_v6 }
  0xf9   : > { %v627_v19 = vpop.f32.mrb[0].mxu0 }
  0xfa   : > { %v6151_v20 = vadd.f32 %v627_v19, %v556_v18  ;;  %v5345_v21 = vpop.f32.mrb[1].mxu0 }
  0xfc   : > { %v631_v22 = vpack.c.bf16 %v6151_v20, %v6151_v20 }
  0xfe   : > { %4963 = vmatmul.mubr.msk.bf16.vlgmr.msra.gmra.mrb[0].mxu1 %vm692_vm2, %v631_v22 }
  0xff   : > { %5360 = vmatprep.mubr.msk.bf16.mxu1 %vm5980_vm0, %v5981_v6 }
 0x1d1   : > { %v730_v28 = vpop.f32.mrb[0].mxu1 }
 0x1d2   : > { %v731_v29 = vadd.f32 %v730_v28, %v645_v27  ;;  %v732_v30 = vpop.f32.mrb[1].mxu1 }
 0x1d3   : > { %v734_v31 = vpop.f32.mrb[2].mxu1  ;;  %v6189_v52 = vadd.f32 %v732_v30, %v649_v48 }
 0x1d4   : > { %v735_v32 = vpop.f32.mrb[3].mxu1  ;;  %744 = vrot.lane.b32.xlu1 %v731_v29, %s7132_s20  ;;  %738 = vrot.lane.b32.xlu0 %v731_v29, %s7134_s21  ;;  %v759_v33 = vpack.c.bf16 %v731_v29, %v731_v29 }
 0x1d5   : > { %v789_v3 = vpack.c.bf16 %v6189_v52, %v6189_v52 }
 0x1d7   : > { %v1307_v7 = vsel %vm1305_vm4, %v789_v3, 0 }
 0x1d8   : > { %747 = vrot.lane.b32.xlu1 %v731_v29, %s7130_s22  ;;  %741 = vrot.lane.b32.xlu0 %v731_v29, %s7136_s23 }
 0x1dc   : > { %753 = vrot.lane.b32.xlu1 %v731_v29, %s7126_s26  ;;  %750 = vrot.lane.b32.xlu0 %v731_v29, %s7128_s28 }
 0x1e0   : > { %756 = vrot.lane.b32.xlu0 %v731_v29, %s7112_s29  ;;  %798 = vrot.lane.b32.xlu1 %v759_v33, %s7108_s0 }
 0x246   : > { %v745_v34 = vpop.permute.xlu1 %744  ;;  %v739_v35 = vpop.permute.xlu0 %738 }
 0x247   : > { %v760_v36 = vpack.c.bf16 %v739_v35, %v739_v35  ;;  %v762_v39 = vpack.c.bf16 %v745_v34, %v745_v34 }
 0x249   : > { %848 = vrot.lane.b32.xlu0 %v760_v36, %s7108_s0 }
 0x24a   : > { %v748_v37 = vpop.permute.xlu1 %747  ;;  %v742_v38 = vpop.permute.xlu0 %741 }
 0x24b   : > { %v761_v40 = vpack.c.bf16 %v742_v38, %v742_v38  ;;  %v763_v44 = vpack.c.bf16 %v748_v37, %v748_v37 }
 0x24d   : > { %946 = vrot.lane.b32.xlu0 %v762_v39, %s7108_s0  ;;  %897 = vrot.lane.b32.xlu1 %v761_v40, %s7108_s0 }
 0x24e   : > { %v754_v41 = vpop.permute.xlu1 %753  ;;  %v751_v42 = vpop.permute.xlu0 %750 }
 0x24f   : > { %v764_v45 = vpack.c.bf16 %v751_v42, %v751_v42  ;;  %v765_v49 = vpack.c.bf16 %v754_v41, %v754_v41 }
 0x251   : > { %1044 = vrot.lane.b32.xlu0 %v764_v45, %s7108_s0  ;;  %995 = vrot.lane.b32.xlu1 %v763_v44, %s7108_s0 }
 0x252   : > { %v757_v46 = vpop.permute.xlu0 %756  ;;  %v799_v47 = vpop.permute.xlu1 %798 }
 0x253   : > { %v766_v50 = vpack.c.bf16 %v757_v46, %v757_v46  ;;  %v805_v51 = vsel %vm800_vm3, %v799_v47, 0 }
 0x254   : > { %5347 = vmatpush3.bf16.xpose.msra.mxu0 %v805_v51 }
 0x255   : > { %1142 = vrot.lane.b32.xlu0 %v766_v50, %s7108_s0  ;;  %1093 = vrot.lane.b32.xlu1 %v765_v49, %s7108_s0  ;;  %s7124_s0 = smov 32  }
 0x256   : > { %5352 = vmatprep.subr.bf16.mxu0 %v5981_v6 }
 0x259   : > { %768 = vrot.lane.b32.xlu0 %v6189_v52, %s7134_s21 }
 0x25b   : > { %5349 = vmatmul.mubr.msk.bf16.vlgmr.msra.gmra.mrb[4].mxu0 %vm800_vm3, %v759_v33 }
 0x25c   : > { %5354 = vmatprep.mubr.msk.bf16.mxu0 %vm5980_vm0, %v5981_v6 }
 0x2bb   : > { %v849_v53 = vpop.permute.xlu0 %848 }
 0x2bc   : > { %v854_v54 = vsel %vm800_vm3, %v849_v53, 0 }
 0x2bd   : > { %5353 = vmatpush3.bf16.xpose.msra.mxu0 %v854_v54 }
 0x2be   : > { %5364 = vmatprep.subr.bf16.mxu0 %v5981_v6 }
 0x2bf   : > { %v898_v55 = vpop.permute.xlu1 %897  ;;  %v947_v57 = vpop.permute.xlu0 %946 }
 0x2c0   : > { %v903_v56 = vsel %vm800_vm3, %v898_v55, 0  ;;  %v952_v58 = vsel %vm800_vm3, %v947_v57, 0 }
 0x2c1   : > { %5359 = vmatpush3.bf16.xpose.msra.mxu1 %v903_v56 }
 0x2c2   : > { %5370 = vmatprep.subr.bf16.mxu1 %v5981_v6 }
 0x2c3   : > { %v996_v59 = vpop.permute.xlu1 %995  ;;  %v1045_v61 = vpop.permute.xlu0 %1044 }
 0x2c4   : > { %5355 = vmatmul.mubr.msk.bf16.vlgmr.msra.gmra.mrb[8].mxu0 %vm800_vm3, %v760_v36  ;;  %v1001_v60 = vsel %vm800_vm3, %v996_v59, 0  ;;  %v1050_v62 = vsel %vm800_vm3, %v1045_v61, 0 }
 0x2c5   : > { %5365 = vmatpush3.bf16.xpose.msra.mxu0 %v952_v58  ;;  %5366 = vmatprep.mubr.msk.bf16.mxu0 %vm5980_vm0, %v5981_v6 }
 0x2c6   : > { %5376 = vmatprep.subr.bf16.mxu0 %v5981_v6 }
 0x2c7   : > { %v1094_v63 = vpop.permute.xlu1 %1093  ;;  %v1143_v0 = vpop.permute.xlu0 %1142 }
 0x2c8   : > { %5361 = vmatmul.mubr.msk.bf16.vlgmr.msra.gmra.mrb[4].mxu1 %vm800_vm3, %v761_v40  ;;  %v1099_v1 = vsel %vm800_vm3, %v1094_v63, 0  ;;  %v1148_v2 = vsel %vm800_vm3, %v1143_v0, 0 }
 0x2c9   : > { %5371 = vmatpush3.bf16.xpose.msra.mxu1 %v1001_v60  ;;  %5372 = vmatprep.mubr.msk.bf16.mxu1 %vm5980_vm0, %v5981_v6 }
 0x2ca   : > { %5382 = vmatprep.subr.bf16.mxu1 %v5981_v6 }
 0x2cb   : > { %v769_v4 = vpop.permute.xlu0 %768 }
 0x2cc   : > { %5367 = vmatmul.mubr.msk.bf16.vlgmr.msra.gmra.mrb[12].mxu0 %vm800_vm3, %v762_v39  ;;  %v790_v5 = vpack.c.bf16 %v769_v4, %v769_v4 }
 0x2cd   : > { %5377 = vmatpush3.bf16.xpose.msra.mxu0 %v1050_v62  ;;  %5378 = vmatprep.mubr.msk.bf16.mxu0 %vm5980_vm0, %v5981_v6 }
 0x2ce   : > { %5388 = vmatprep.subr.bf16.mxu0 %v5981_v6  ;;  %v1353_v8 = vsel %vm1305_vm4, %v790_v5, 0 }
 0x2d0   : > { %5373 = vmatmul.mubr.msk.bf16.vlgmr.msra.gmra.mrb[8].mxu1 %vm800_vm3, %v763_v44 }
 0x2d1   : > { %5383 = vmatpush3.bf16.xpose.msra.mxu1 %v1099_v1  ;;  %5384 = vmatprep.mubr.msk.bf16.mxu1 %vm5980_vm0, %v5981_v6 }
 0x2d2   : > { %5394 = vmatprep.subr.bf16.mxu1 %v5981_v6 }
 0x2d4   : > { %5379 = vmatmul.mubr.msk.bf16.vlgmr.msra.gmra.mrb[16].mxu0 %vm800_vm3, %v764_v45 }
 0x2d5   : > { %5389 = vmatpush3.bf16.xpose.msra.mxu0 %v1148_v2  ;;  %5390 = vmatprep.mubr.msk.bf16.mxu0 %vm5980_vm0, %v5981_v6 }
 0x2d6   : > { %5400 = vmatprep.subr.bf16.mxu0 %v5981_v6 }
 0x2d8   : > { %5385 = vmatmul.mubr.msk.bf16.vlgmr.msra.gmra.mrb[12].mxu1 %vm800_vm3, %v765_v49 }
 0x2d9   : > { %5395 = vmatpush3.bf16.msra.mxu1 %v1307_v7  ;;  %5396 = vmatprep.mubr.msk.bf16.mxu1 %vm5980_vm0, %v5981_v6 }
 0x2da   : > { %5406 = vmatprep.subr.bf16.mxu1 %v5981_v6 }
 0x2dc   : > { %5391 = vmatmul.mubr.msk.bf16.vlgmr.msra.gmra.mrb[20].mxu0 %vm800_vm3, %v766_v50 }
 0x2dd   : > { %5401 = vmatpush3.bf16.msra.mxu0 %v1353_v8  ;;  %5402 = vmatprep.mubr.msk.bf16.mxu0 %vm5980_vm0, %v5981_v6 }
 0x2de   : > { %5412 = vmatprep.subr.bf16.mxu0 %v5981_v6 }
 0x32e   : > { %v841_v11 = vpop.f32.mrb[4].mxu0 }
 0x32f   : > { %v1190_v12 = vmul.f32 0.35355338, %v841_v11  ;;  %v5350_v13 = vpop.f32.mrb[5].mxu0 }
 0x330   : > { %v844_v14 = vpop.f32.mrb[6].mxu0 }
 0x331   : > { %v5351_v15 = vpop.f32.mrb[7].mxu0  ;;  %v6243_v16 = vadd.f32 %v1190_v12, %v6240_v10 }
 0x333   : > { %v1206_v18 = vsel %vm800_vm3, %v6243_v16, -inf }
 0x334   : > { %1207 = vmax.xlane.f32.xlu1 %v1206_v18 }
 0x397   : > { %v890_v19 = vpop.f32.mrb[8].mxu0 }
 0x398   : > { %v1191_v21 = vmul.f32 0.35355338, %v890_v19  ;;  %v5356_v22 = vpop.f32.mrb[9].mxu0 }
 0x399   : > { %v893_v23 = vpop.f32.mrb[10].mxu0 }
 0x39a   : > { %v5357_v24 = vpop.f32.mrb[11].mxu0  ;;  %v1199_v26 = vadd.f32 %v1191_v21, %v6240_v10 }
 0x39b   : > { %v939_v27 = vpop.f32.mrb[4].mxu1 }
 0x39c   : > { %v1192_v28 = vmul.f32 0.35355338, %v939_v27  ;;  %v5362_v29 = vpop.f32.mrb[5].mxu1  ;;  %v1209_v30 = vsel %vm800_vm3, %v1199_v26, -inf }
 0x39d   : > { %v942_v31 = vpop.f32.mrb[6].mxu1  ;;  %1210 = vmax.xlane.f32.xlu0 %v1209_v30 }
 0x39e   : > { %v5363_v32 = vpop.f32.mrb[7].mxu1  ;;  %v1200_v33 = vadd.f32 %v1192_v28, %v6240_v10 }
 0x39f   : > { %v988_v34 = vpop.f32.mrb[12].mxu0 }
 0x3a0   : > { %v1193_v35 = vmul.f32 0.35355338, %v988_v34  ;;  %v5368_v36 = vpop.f32.mrb[13].mxu0  ;;  %v1212_v37 = vsel %vm800_vm3, %v1200_v33, -inf }
 0x3a1   : > { %1213 = vmax.xlane.f32.xlu0 %v1212_v37  ;;  %v991_v38 = vpop.f32.mrb[14].mxu0 }
 0x3a2   : > { %v5369_v39 = vpop.f32.mrb[15].mxu0  ;;  %v6252_v40 = vadd.f32 %v1193_v35, %v6240_v10 }
 0x3a3   : > { %v1037_v41 = vpop.f32.mrb[8].mxu1 }
 0x3a4   : > { %v1194_v42 = vmul.f32 0.35355338, %v1037_v41  ;;  %v5374_v44 = vpop.f32.mrb[9].mxu1  ;;  %v1215_v45 = vsel %vm800_vm3, %v6252_v40, -inf }
 0x3a5   : > { %v1040_v46 = vpop.f32.mrb[10].mxu1  ;;  %1216 = vmax.xlane.f32.xlu1 %v1215_v45 }
 0x3a6   : > { %v5375_v47 = vpop.f32.mrb[11].mxu1  ;;  %v1202_v48 = vadd.f32 %v1194_v42, %v6240_v10 }
 0x3a7   : > { %v1086_v49 = vpop.f32.mrb[16].mxu0 }
 0x3a8   : > { %v1195_v50 = vmul.f32 0.35355338, %v1086_v49  ;;  %v5380_v51 = vpop.f32.mrb[17].mxu0  ;;  %v1218_v53 = vsel %vm800_vm3, %v1202_v48, -inf }
 0x3a9   : > { %1219 = vmax.xlane.f32.xlu0 %v1218_v53  ;;  %v1089_v54 = vpop.f32.mrb[18].mxu0 }
 0x3aa   : > { %v5381_v55 = vpop.f32.mrb[19].mxu0  ;;  %v1203_v56 = vadd.f32 %v1195_v50, %v6240_v10 }
 0x3ab   : > { %v1135_v57 = vpop.f32.mrb[12].mxu1 }
 0x3ac   : > { %v1196_v58 = vmul.f32 0.35355338, %v1135_v57  ;;  %v5386_v59 = vpop.f32.mrb[13].mxu1  ;;  %v1221_v60 = vsel %vm800_vm3, %v1203_v56, -inf }
 0x3ad   : > { %v1138_v61 = vpop.f32.mrb[14].mxu1  ;;  %1222 = vmax.xlane.f32.xlu1 %v1221_v60 }
 0x3ae   : > { %v5387_v62 = vpop.f32.mrb[15].mxu1  ;;  %v1204_v63 = vadd.f32 %v1196_v58, %v6240_v10 }
 0x3af   : > { %v1184_v0 = vpop.f32.mrb[20].mxu0 }
 0x3b0   : > { %v1197_v1 = vmul.f32 0.35355338, %v1184_v0  ;;  %v5392_v2 = vpop.f32.mrb[21].mxu0  ;;  %v1224_v3 = vsel %vm800_vm3, %v1204_v63, -inf }
 0x3b1   : > { %1225 = vmax.xlane.f32.xlu0 %v1224_v3  ;;  %v1187_v4 = vpop.f32.mrb[22].mxu0 }
 0x3b2   : > { %v5393_v5 = vpop.f32.mrb[23].mxu0  ;;  %v1205_v7 = vadd.f32 %v1197_v1, %v6240_v10 }
 0x3b4   : > { %v1227_v8 = vsel %vm800_vm3, %v1205_v7, -inf }
 0x3b5   : > { %1228 = vmax.xlane.f32.xlu1 %v1227_v8 }
 0x3c1   : > { %v1208_v9 = vpop.xlane.xlu1 %1207 }
 0x3c2   : > { %v1230_v11 = vsub.f32 %v6243_v16, %v1208_v9 }
 0x3c4   : > { %v1238_v12 = vmul.f32 1.442695, %v1230_v11 }
 0x3c6   : > { %771 = vrot.lane.b32.xlu1 %v6189_v52, %s7136_s23  ;;  %5863 = vpow2.f32 %v1238_v12 }
 0x3c7   : > { %774 = vrot.lane.b32.xlu0 %v6189_v52, %s7132_s20 }
 0x3d0   : > { %v5864_v13 = vpop.eup %5863 }
 0x3d1   : > { %v1254_v14 = vsel %vm800_vm3, %v5864_v13, 0.0 }
 0x3e6   : > { %1255 = vadd.xlane.f32.xlu0 %v1254_v14 }
 0x42a   : > { %v1211_v15 = vpop.xlane.xlu0 %1210 }
 0x42b   : > { %v1231_v18 = vsub.f32 %v1199_v26, %v1211_v15 }
 0x42d   : > { %v1240_v19 = vmul.f32 1.442695, %v1231_v18 }
 0x42e   : > { %v1214_v21 = vpop.xlane.xlu0 %1213 }
 0x42f   : > { %5865 = vpow2.f32 %v1240_v19  ;;  %v1232_v22 = vsub.f32 %v1200_v33, %v1214_v21 }
 0x431   : > { %v1242_v23 = vmul.f32 1.442695, %v1232_v22 }
 0x432   : > { %v1217_v26 = vpop.xlane.xlu1 %1216 }
 0x433   : > { %5867 = vpow2.f32 %v1242_v23  ;;  %v1233_v29 = vsub.f32 %v6252_v40, %v1217_v26 }
 0x435   : > { %v1244_v33 = vmul.f32 1.442695, %v1233_v29 }
 0x436   : > { %v1220_v30 = vpop.xlane.xlu0 %1219 }
 0x437   : > { %v1234_v32 = vsub.f32 %v1202_v48, %v1220_v30  ;;  %5869 = vpow2.f32 %v1244_v33 }
 0x439   : > { %v6270_v24 = vpop.eup %5865  ;;  %v1246_v36 = vmul.f32 1.442695, %v1234_v32 }
 0x43a   : > { %v1257_v27 = vsel %vm800_vm3, %v6270_v24, 0.0  ;;  %v1223_v31 = vpop.xlane.xlu1 %1222 }
 0x43b   : > { %1258 = vadd.xlane.f32.xlu1 %v1257_v27  ;;  %v1235_v34 = vsub.f32 %v1203_v56, %v1223_v31  ;;  %5871 = vpow2.f32 %v1246_v36 }
 0x43d   : > { %v6274_v16 = vpop.eup %5867  ;;  %v1248_v37 = vmul.f32 1.442695, %v1235_v34 }
 0x43e   : > { %v1260_v28 = vsel %vm800_vm3, %v6274_v16, 0.0  ;;  %v1226_v35 = vpop.xlane.xlu0 %1225 }
 0x43f   : > { %1261 = vadd.xlane.f32.xlu0 %v1260_v28  ;;  %v1236_v38 = vsub.f32 %v1204_v63, %v1226_v35  ;;  %5873 = vpow2.f32 %v1248_v37 }
 0x441   : > { %v1250_v41 = vmul.f32 1.442695, %v1236_v38  ;;  %v6283_v45 = vpop.eup %5869 }
 0x442   : > { %v1229_v39 = vpop.xlane.xlu1 %1228  ;;  %v775_v46 = vpop.permute.xlu0 %774  ;;  %v1263_v47 = vsel %vm800_vm3, %v6283_v45, 0.0 }
 0x443   : > { %v1237_v42 = vsub.f32 %v1205_v7, %v1229_v39  ;;  %5875 = vpow2.f32 %v1250_v41  ;;  %v792_v2 = vpack.c.bf16 %v775_v46, %v775_v46 }
 0x445   : > { %v1252_v44 = vmul.f32 1.442695, %v1237_v42  ;;  %v6285_v40 = vpop.eup %5871  ;;  %v1445_v9 = vsel %vm1305_vm4, %v792_v2, 0  ;;  %v5802_v2 = vld [vmem:[%s7094_s5 + $0x18] sm:$0xff]  }
 0x446   : > { %v1266_v50 = vsel %vm800_vm3, %v6285_v40, 0.0  ;;  %v772_v57 = vpop.permute.xlu1 %771 }
 0x447   : > { %5877 = vpow2.f32 %v1252_v44  ;;  %v791_v59 = vpack.c.bf16 %v772_v57, %v772_v57 }
 0x449   : > { %v6289_v48 = vpop.eup %5873  ;;  %v1399_v62 = vsel %vm1305_vm4, %v791_v59, 0  ;;  %v5799_v59 = vld [vmem:[%s7094_s5] sm:$0xff]  }
 0x44a   : > { %v1269_v51 = vsel %vm800_vm3, %v6289_v48, 0.0 }
 0x44c   : > { %780 = vrot.lane.b32.xlu1 %v6189_v52, %s7128_s28  ;;  %s7167_s28 = smov 40  }
 0x44d   : > { %v6295_v53 = vpop.eup %5875 }
 0x44e   : > { %v1272_v54 = vsel %vm800_vm3, %v6295_v53, 0.0 }
 0x451   : > { %v6299_v55 = vpop.eup %5877 }
 0x452   : > { %v1275_v56 = vsel %vm800_vm3, %v6299_v55, 0.0 }
 0x455   : > { %777 = vrot.lane.b32.xlu0 %v6189_v52, %s7130_s22  ;;  %s7162_s22 = smov 64  }
 0x470   : > { %1264 = vadd.xlane.f32.xlu1 %v1263_v47 }
 0x473   : > { %v1256_v49 = vpop.xlane.xlu0 %1255 }
 0x474   : > { %5879 = vrcp.f32 %v1256_v49  ;;  %1267 = vadd.xlane.f32.xlu0 %v1266_v50  ;;  %1270 = vadd.xlane.f32.xlu1 %v1269_v51 }
 0x478   : > { %1273 = vadd.xlane.f32.xlu1 %v1272_v54 }
 0x47c   : > { %1276 = vadd.xlane.f32.xlu1 %v1275_v56 }
 0x47e   : > { %v5880_v58 = vpop.eup %5879 }
 0x47f   : > { %v1279_v60 = vmul.f32 %v5880_v58, %v5864_v13 }
 0x481   : > { %v1294_v61 = vpack.c.bf16 %v1279_v60, %v1279_v60  ;;  %v5800_v60 = vld [vmem:[%s7094_s5 + $0x8] sm:$0xff]  }
 0x483   : > { %5397 = vmatmul.mubr.msk.bf16.vlgmr.msra.gmra.mrb[16].mxu1 %vm800_vm3, %v1294_v61  ;;  %v5801_v61 = vld [vmem:[%s7094_s5 + $0x10] sm:$0xff]  }
 0x484   : > { %5407 = vmatpush3.bf16.msra.mxu1 %v1399_v62  ;;  %5408 = vmatprep.mubr.msk.bf16.mxu1 %vm5980_vm0, %v5981_v6 }
 0x485   : > { %5418 = vmatprep.subr.bf16.mxu1 %v5981_v6 }
 0x48a   : > { %783 = vrot.lane.b32.xlu0 %v6189_v52, %s7126_s26  ;;  %s7160_s26 = smov 80  }
 0x48d   : > { %786 = vrot.lane.b32.xlu1 %v6189_v52, %s7112_s29  ;;  %s7120_s29 = smov 40  }
 0x4c8   : > { %v1259_v63 = vpop.xlane.xlu1 %1258 }
 0x4c9   : > { %5881 = vrcp.f32 %v1259_v63 }
 0x4cc   : > { %v1262_v0 = vpop.xlane.xlu0 %1261  ;;  %v781_v13 = vpop.permute.xlu1 %780 }
 0x4cd   : > { %5883 = vrcp.f32 %v1262_v0  ;;  %v794_v22 = vpack.c.bf16 %v781_v13, %v781_v13 }
 0x4cf   : > { %v1537_v30 = vsel %vm1305_vm4, %v794_v22, 0 }
 0x4d0   : > { %v778_v4 = vpop.permute.xlu0 %777 }
 0x4d1   : > { %v793_v8 = vpack.c.bf16 %v778_v4, %v778_v4 }
 0x4d3   : > { %v5882_v1 = vpop.eup %5881  ;;  %v1491_v12 = vsel %vm1305_vm4, %v793_v8, 0 }
 0x4d4   : > { %v1281_v3 = vmul.f32 %v5882_v1, %v6270_v24 }
 0x4d6   : > { %v1295_v5 = vpack.c.bf16 %v1281_v3, %v1281_v3 }
 0x4d7   : > { %v5884_v7 = vpop.eup %5883 }
 0x4d8   : > { %5403 = vmatmul.mubr.msk.bf16.vlgmr.msra.gmra.mrb[24].mxu0 %vm800_vm3, %v1295_v5  ;;  %v1283_v11 = vmul.f32 %v5884_v7, %v6274_v16 }
 0x4d9   : > { %5413 = vmatpush3.bf16.msra.mxu0 %v1445_v9  ;;  %5414 = vmatprep.mubr.msk.bf16.mxu0 %vm5980_vm0, %v5981_v6 }
 0x4da   : > { %v1296_v52 = vpack.c.bf16 %v1283_v11, %v1283_v11  ;;  %5424 = vmatprep.subr.bf16.mxu0 %v5981_v6 }
 0x4dc   : > { %5409 = vmatmul.mubr.msk.bf16.vlgmr.msra.gmra.mrb[20].mxu1 %vm800_vm3, %v1296_v52 }
 0x4dd   : > { %5419 = vmatpush3.bf16.msra.mxu1 %v1491_v12  ;;  %5420 = vmatprep.mubr.msk.bf16.mxu1 %vm5980_vm0, %v5981_v6 }
 0x4de   : > { %5430 = vmatprep.subr.bf16.mxu1 %v5981_v6 }
 0x4fd   : > { %v1265_v14 = vpop.xlane.xlu1 %1264 }
 0x4fe   : > { %5885 = vrcp.f32 %v1265_v14 }
 0x501   : > { %v1268_v15 = vpop.xlane.xlu0 %1267  ;;  %v1271_v18 = vpop.xlane.xlu1 %1270 }
 0x502   : > { %5887 = vrcp.f32 %v1268_v15 }
 0x503   : > { %5889 = vrcp.f32 %v1271_v18 }
 0x505   : > { %v1274_v19 = vpop.xlane.xlu1 %1273  ;;  %v784_v27 = vpop.permute.xlu0 %783 }
 0x506   : > { %5891 = vrcp.f32 %v1274_v19  ;;  %v795_v29 = vpack.c.bf16 %v784_v27, %v784_v27 }
 0x508   : > { %v5886_v21 = vpop.eup %5885  ;;  %v1583_v37 = vsel %vm1305_vm4, %v795_v29, 0 }
 0x509   : > { %v1277_v23 = vpop.xlane.xlu1 %1276  ;;  %v1285_v24 = vmul.f32 %v5886_v21, %v6283_v45 }
 0x50a   : > { %5893 = vrcp.f32 %v1277_v23 }
 0x50b   : > { %v1297_v16 = vpack.c.bf16 %v1285_v24, %v1285_v24 }
 0x50c   : > { %v5888_v28 = vpop.eup %5887 }
 0x50d   : > { %v5890_v26 = vpop.eup %5889  ;;  %5415 = vmatmul.mubr.msk.bf16.vlgmr.msra.gmra.mrb[28].mxu0 %vm800_vm3, %v1297_v16  ;;  %v1287_v31 = vmul.f32 %v5888_v28, %v6285_v40  ;;  %v787_v32 = vpop.permute.xlu1 %786 }
 0x50e   : > { %5425 = vmatpush3.bf16.msra.mxu0 %v1537_v30  ;;  %5426 = vmatprep.mubr.msk.bf16.mxu0 %vm5980_vm0, %v5981_v6  ;;  %v1289_v34 = vmul.f32 %v5890_v26, %v6289_v48  ;;  %v796_v36 = vpack.c.bf16 %v787_v32, %v787_v32 }
 0x50f   : > { %v1298_v33 = vpack.c.bf16 %v1287_v31, %v1287_v31  ;;  %5436 = vmatprep.subr.bf16.mxu0 %v5981_v6 }
 0x510   : > { %v5892_v35 = vpop.eup %5891  ;;  %v1299_v38 = vpack.c.bf16 %v1289_v34, %v1289_v34  ;;  %v1629_v42 = vsel %vm1305_vm4, %v796_v36, 0 }
 0x511   : > { %5421 = vmatmul.mubr.msk.bf16.vlgmr.msra.gmra.mrb[24].mxu1 %vm800_vm3, %v1298_v33  ;;  %v1291_v39 = vmul.f32 %v5892_v35, %v6295_v53 }
 0x512   : > { %5431 = vmatpush3.bf16.msra.mxu1 %v1583_v37  ;;  %5432 = vmatprep.mubr.msk.bf16.mxu1 %vm5980_vm0, %v5981_v6 }
 0x513   : > { %5442 = vmatprep.subr.bf16.mxu1 %v5981_v6  ;;  %v1300_v44 = vpack.c.bf16 %v1291_v39, %v1291_v39 }
 0x514   : > { %v5894_v41 = vpop.eup %5893 }
 0x515   : > { %5427 = vmatmul.mubr.msk.bf16.vlgmr.msra.gmra.mrb[32].mxu0 %vm800_vm3, %v1299_v38  ;;  %v1293_v45 = vmul.f32 %v5894_v41, %v6299_v55  ;;  %v4980_v38 = vld [vmem:[%s7155_s6] ss:$0 sm:$0xff] }
 0x516   : > { %5437 = vmatpush3.bf16.msra.mxu0 %v1629_v42  ;;  %5438 = vmatprep.mubr.msk.bf16.mxu0 %vm5980_vm0, %v5981_v6 }
 0x517   : > { %5454 = vmatprep.subr.bf16.mxu0 %v5981_v6  ;;  %v1301_v40 = vpack.c.bf16 %v1293_v45, %v1293_v45 }
 0x519   : > { %5433 = vmatmul.mubr.msk.bf16.vlgmr.msra.gmra.mrb[28].mxu1 %vm800_vm3, %v1300_v44 }
 0x51a   : > { %5450 = vmatprep.mubr.msk.bf16.mxu1 %vm5980_vm0, %v5981_v6  ;;  %5443 = vmatpush3.bf16.msra.mxu1 %v5799_v59 }
 0x51b   : > { %5444 = vmatprep.subr.bf16.mxu1 %v5981_v6 }
 0x51d   : > { %5439 = vmatmul.mubr.msk.bf16.vlgmr.msra.gmra.mrb[36].mxu0 %vm800_vm3, %v1301_v40 }
 0x51e   : > { %5462 = vmatprep.mubr.msk.bf16.mxu0 %vm5980_vm0, %v5981_v6  ;;  %5445 = vmatpush3.bf16.msra.mxu1 %v5800_v60 }
 0x51f   : > { %5446 = vmatprep.subr.bf16.mxu1 %v5981_v6 }
 0x522   : > { %5447 = vmatpush3.bf16.msra.mxu1 %v5801_v61 }
 0x523   : > { %5448 = vmatprep.subr.bf16.mxu1 %v5981_v6 }
 0x526   : > { %5449 = vmatpush3.bf16.msra.mxu1 %v5802_v2 }
 0x527   : > { %5466 = vmatprep.subr.bf16.mxu1 %v5981_v6 }
 0x556   : > { %v6350_v46 = vpop.f32.mrb[16].mxu1 }
 0x557   : > { %v5398_v47 = vpop.f32.mrb[17].mxu1 }
 0x558   : > { %v1346_v48 = vpop.f32.mrb[18].mxu1 }
 0x559   : > { %v5399_v49 = vpop.f32.mrb[19].mxu1 }
 0x5ab   : > { %v1389_v50 = vpop.f32.mrb[24].mxu0 }
 0x5ac   : > { %1672 = vrot.lane.b32.xlu0 %v1389_v50, %s7110_s30  ;;  %v5404_v51 = vpop.f32.mrb[25].mxu0  ;;  %s7118_s30 = smov 48  }
 0x5ad   : > { %v1392_v53 = vpop.f32.mrb[26].mxu0 }
 0x5ae   : > { %v5405_v54 = vpop.f32.mrb[27].mxu0  ;;  %v5803_v53 = vld [vmem:[%s7098_s9] sm:$0xff]  }
 0x5af   : > { %v1435_v55 = vpop.f32.mrb[20].mxu1  ;;  %5455 = vmatpush3.bf16.msra.mxu0 %v5803_v53  ;;  %v5805_v54 = vld [vmem:[%s7098_s9 + $0x10] sm:$0xff]  }
 0x5b0   : > { %1676 = vrot.lane.b32.xlu1 %v1435_v55, %s7114_s18  ;;  %v5410_v56 = vpop.f32.mrb[21].mxu1  ;;  %s7122_s18 = smov 24   ;;  %5456 = vmatprep.subr.bf16.mxu0 %v5981_v6  ;;  %v5806_v55 = vld [vmem:[%s7098_s9 + $0x18] sm:$0xff]  }
 0x5b1   : > { %v1438_v57 = vpop.f32.mrb[22].mxu1  ;;  %v5807_v56 = vld [vmem:[%s7100_s11] sm:$0xff]  }
 0x5b2   : > { %v5411_v58 = vpop.f32.mrb[23].mxu1  ;;  %v5808_v57 = vld [vmem:[%s7100_s11 + $0x8] sm:$0xff]  }
 0x5e0   : > { %v1481_v62 = vpop.f32.mrb[28].mxu0 }
 0x5e1   : > { %1680 = vrot.lane.b32.xlu0 %v1481_v62, %s7122_s18  ;;  %v5416_v63 = vpop.f32.mrb[29].mxu0  ;;  %v4986_v62 = vld [vmem:[%s7096_s7] ss:$0 sm:$0xff]  ;;  %s7161_s18 = smov 72  }
 0x5e2   : > { %v1484_v0 = vpop.f32.mrb[30].mxu0 }
 0x5e3   : > { %v5417_v1 = vpop.f32.mrb[31].mxu0  ;;  %v4987_v0 = vld [vmem:[%s7097_s8] ss:$0 sm:$0xff] }
 0x5e4   : > { %v1527_v3 = vpop.f32.mrb[24].mxu1 }
 0x5e5   : > { %1684 = vrot.lane.b32.xlu1 %v1527_v3, %s7124_s0  ;;  %v5422_v4 = vpop.f32.mrb[25].mxu1  ;;  %s7168_s0 = smov 48  }
 0x5e6   : > { %v1530_v5 = vpop.f32.mrb[26].mxu1  ;;  %v5809_v4 = vld [vmem:[%s7100_s11 + $0x10] sm:$0xff]  }
 0x5e7   : > { %v5423_v7 = vpop.f32.mrb[27].mxu1  ;;  %v5810_v5 = vld [vmem:[%s7100_s11 + $0x18] sm:$0xff]  }
 0x5e8   : > { %v1573_v8 = vpop.f32.mrb[32].mxu0  ;;  %v4988_v7 = vld [vmem:[%s7156_s10] ss:$0 sm:$0xff] }
 0x5e9   : > { %1688 = vrot.lane.b32.xlu0 %v1573_v8, %s7120_s29  ;;  %v5428_v9 = vpop.f32.mrb[33].mxu0  ;;  %s7163_s29 = smov 8  }
 0x5ea   : > { %v1576_v11 = vpop.f32.mrb[34].mxu0 }
 0x5eb   : > { %v5429_v52 = vpop.f32.mrb[35].mxu0 }
 0x5ec   : > { %v1619_v12 = vpop.f32.mrb[28].mxu1 }
 0x5ed   : > { %1692 = vrot.lane.b32.xlu1 %v1619_v12, %s7118_s30  ;;  %v5434_v13 = vpop.f32.mrb[29].mxu1  ;;  %s7158_s30 = smov 96  }
 0x5ee   : > { %v1622_v14 = vpop.f32.mrb[30].mxu1 }
 0x5ef   : > { %v5435_v15 = vpop.f32.mrb[31].mxu1 }
 0x5f0   : > { %v1665_v18 = vpop.f32.mrb[36].mxu0  ;;  %v4994_v15 = vld [vmem:[%s7157_s12] ss:$0 sm:$0xff] }
 0x5f1   : > { %1696 = vrot.lane.b32.xlu0 %v1665_v18, %s7116_s1  ;;  %v5440_v19 = vpop.f32.mrb[37].mxu0  ;;  %s7164_s1 = smov 16  }
 0x5f2   : > { %v1668_v21 = vpop.f32.mrb[38].mxu0 }
 0x5f3   : > { %v5441_v22 = vpop.f32.mrb[39].mxu0 }
 0x61e   : > { %v1673_v23 = vpop.permute.xlu0 %1672 }
 0x61f   : > { %v1699_v28 = vsel %vm800_vm3, %v6350_v46, %v1673_v23 }
 0x622   : > { %v1677_v24 = vpop.permute.xlu1 %1676 }
 0x623   : > { %v1701_v26 = vsel %vm1700_vm6, %v1699_v28, %v1677_v24 }
 0x653   : > { %v1681_v27 = vpop.permute.xlu0 %1680 }
 0x654   : > { %v1703_v30 = vsel %vm1702_vm7, %v1701_v26, %v1681_v27 }
 0x657   : > { %v1685_v16 = vpop.permute.xlu1 %1684 }
 0x658   : > { %v1704_v32 = vsel %vm557_vm1, %v1703_v30, %v1685_v16 }
 0x65b   : > { %v1689_v29 = vpop.permute.xlu0 %1688 }
 0x65c   : > { %v1706_v33 = vsel %vm1705_vm8, %v1704_v32, %v1689_v29  ;;  %v5811_v32 = vld [vmem:[%s7092_s3 + $0x40] ss:$8 sps:$4 sm:$0xff]  }
 0x65f   : > { %v1693_v31 = vpop.permute.xlu1 %1692 }
 0x660   : > { %v1708_v34 = vsel %vm1707_vm9, %v1706_v33, %v1693_v31  ;;  %v5813_v31 = vld [vmem:[%s7092_s3 + $0x44] ss:$8 sps:$4 sm:$0xff]   ;;  %v5816_v33 = vld [vmem:[%s7092_s3 + $0x54] ss:$8 sps:$4 sm:$0xff]  }
 0x663   : > { %v1697_v35 = vpop.permute.xlu0 %1696 }
 0x664   : > { %v1710_v36 = vsel %vm1709_vm10, %v1708_v34, %v1697_v35  ;;  %v5814_v34 = vld [vmem:[%s7092_s3 + $0x50] ss:$8 sps:$4 sm:$0xff]   ;;  %v5819_v35 = vld [vmem:[%s7092_s3 + $0x64] ss:$8 sps:$4 sm:$0xff]  }
 0x665   : > { %v1711_v37 = vpack.c.bf16 %v1710_v36, %v1710_v36  ;;  %v5817_v36 = vld [vmem:[%s7092_s3 + $0x60] ss:$8 sps:$4 sm:$0xff]  }
 0x667   : > { %5451 = vmatmul.mubr.msk.bf16.vlgmr.msra.gmra.mrb[32].mxu1 %vm692_vm2, %v1711_v37  ;;  %v5820_v37 = vld [vmem:[%s7092_s3 + $0x70] ss:$8 sps:$4 sm:$0xff]  }
 0x668   : > { %5474 = vmatprep.mubr.msk.bf16.mxu1 %vm5980_vm0, %v5981_v6  ;;  %5467 = vmatpush3.bf16.msra.mxu1 %v5807_v56 }
 0x669   : > { %5468 = vmatprep.subr.bf16.mxu1 %v5981_v6 }
 0x66c   : > { %5469 = vmatpush3.bf16.msra.mxu1 %v5808_v57 }
 0x66d   : > { %5470 = vmatprep.subr.bf16.mxu1 %v5981_v6 }
 0x670   : > { %5471 = vmatpush3.bf16.msra.mxu1 %v5809_v4 }
 0x671   : > { %5472 = vmatprep.subr.bf16.mxu1 %v5981_v6 }
 0x674   : > { %5473 = vmatpush3.bf16.msra.mxu1 %v5810_v5 }
 0x675   : > { %5478 = vmatprep.subr.bf16.mxu1 %v5981_v6 }
 0x73a   : > { %v1788_v39 = vpop.f32.mrb[32].mxu1 }
 0x73b   : > { %v1789_v41 = vadd.f32 %v4980_v38, %v1788_v39  ;;  %v5452_v42 = vpop.f32.mrb[33].mxu1  ;;  %v5822_v38 = vld [vmem:[%s7092_s3 + $0x74] ss:$8 sps:$4 sm:$0xff]  }
 0x73c   : > { %v1791_v44 = vpop.f32.mrb[34].mxu1 }
 0x73d   : > { %v5453_v45 = vpop.f32.mrb[35].mxu1  ;;  %v1794_v40 = vadd.f32 %v1789_v41, %v6151_v20  ;;  %v5804_v20 = vld [vmem:[%s7098_s9 + $0x8] sm:$0xff]  }
 0x73e   : > { %5457 = vmatpush3.bf16.msra.mxu0 %v5804_v20  ;;  %v5000_v45 = vld [vmem:[%s7102_s13] ss:$0 sm:$0xff] }
 0x73f   : > { %v1797_v46 = vsel %vm692_vm2, %v1794_v40, 0.0  ;;  %5458 = vmatprep.subr.bf16.mxu0 %v5981_v6 }
 0x740   : > { %1798 = vadd.xlane.f32.xlu1 %v1797_v46  ;;  %v5001_v46 = vld [vmem:[%s7103_s14] ss:$0 sm:$0xff] }
 0x742   : > { %5459 = vmatpush3.bf16.msra.mxu0 %v5805_v54 }
 0x743   : > { %5460 = vmatprep.subr.bf16.mxu0 %v5981_v6 }
 0x746   : > { %5461 = vmatpush3.bf16.msra.mxu0 %v5806_v55 }
 0x747   : > { %2088 = vmatprep.subr.bf16.mxu0 %v5813_v31 }
 0x7cd   : > { %v1799_v47 = vpop.xlane.xlu1 %1798 }
 0x7ce   : > { %v1801_v48 = vmul.f32 0.015625, %v1799_v47 }
 0x7d0   : > { %v1802_v49 = vsub.f32 %v1794_v40, %v1801_v48 }
 0x7d2   : > { %v1803_v50 = vmul.f32 %v1802_v49, %v1802_v49 }
 0x7d4   : > { %v1804_v51 = vsel %vm692_vm2, %v1803_v50, 0.0  ;;  %v6483_v50 = vld [vmem:[%s7093_s4 + $0x2] sm:$0x3] }
 0x7d5   : > { %1805 = vadd.xlane.f32.xlu0 %v1804_v51  ;;  %v2038_v51 = vrot.slane %v6483_v50, %v6162_v25 }
 0x862   : > { %v1806_v58 = vpop.xlane.xlu0 %1805 }
 0x863   : > { %v1807_v59 = vmul.f32 0.015625, %v1806_v58 }
 0x865   : > { %v1808_v60 = vadd.f32 1e-05, %v1807_v59 }
 0x867   : > { %5895 = vrsqrt.f32 %v1808_v60 }
 0x871   : > { %v5896_v61 = vpop.eup %5895 }
 0x872   : > { %v1810_v63 = vmul.f32 %v5896_v61, %v1802_v49 }
 0x874   : > { %v1817_v1 = vmul.f32 %v4986_v62, %v1810_v63 }
 0x876   : > { %v1824_v2 = vadd.f32 %v4987_v0, %v1817_v1 }
 0x878   : > { %v1825_v3 = vpack.c.bf16 %v1824_v2, %v1824_v2 }
 0x87a   : > { %5463 = vmatmul.mubr.msk.bf16.vlgmr.msra.gmra.mrb[40].mxu0 %vm692_vm2, %v1825_v3 }
 0x87b   : > { %2120 = vmatprep.mubr.bf16.mxu0 %v5982_v17  ;;  %2089 = vmatpush1.bf16.msra.mxu0 %v5811_v32 }
 0x87c   : > { %2090 = vmatprep.subr.bf16.mxu0 %v5816_v33 }
 0x87f   : > { %2091 = vmatpush1.bf16.msra.mxu0 %v5814_v34 }
 0x880   : > { %2092 = vmatprep.subr.bf16.mxu0 %v5819_v35 }
 0x883   : > { %2093 = vmatpush1.bf16.msra.mxu0 %v5817_v36 }
 0x884   : > { %2094 = vmatprep.subr.bf16.mxu0 %v5822_v38 }
 0x887   : > { %2095 = vmatpush1.bf16.msra.mxu0 %v5820_v37 }
 0x888   : > { %5484 = vmatprep.subr.bf16.mxu0 %v5981_v6 }
 0x94d   : > { %v1902_v8 = vpop.f32.mrb[40].mxu0 }
 0x94e   : > { %v1903_v9 = vadd.f32 %v4988_v7, %v1902_v8  ;;  %v5464_v11 = vpop.f32.mrb[41].mxu0 }
 0x94f   : > { %v1905_v52 = vpop.f32.mrb[42].mxu0 }
 0x950   : > { %v1908_v12 = vmax.f32 %v1903_v9, 0.0  ;;  %v5465_v13 = vpop.f32.mrb[43].mxu0 }
 0x952   : > { %v1909_v14 = vpack.c.bf16 %v1908_v12, %v1908_v12 }
 0x954   : > { %5475 = vmatmul.mubr.msk.bf16.vlgmr.msra.gmra.mrb[36].mxu1 %vm692_vm2, %v1909_v14 }
 0x955   : > { %5480 = vmatprep.mubr.msk.bf16.mxu1 %vm5980_vm0, %v5981_v6 }
 0xa27   : > { %v1986_v18 = vpop.f32.mrb[36].mxu1 }
 0xa28   : > { %v1987_v19 = vadd.f32 %v4994_v15, %v1986_v18  ;;  %v5476_v21 = vpop.f32.mrb[37].mxu1 }
 0xa29   : > { %v1989_v22 = vpop.f32.mrb[38].mxu1 }
 0xa2a   : > { %v5477_v23 = vpop.f32.mrb[39].mxu1  ;;  %v1992_v24 = vadd.f32 %v1987_v19, %v1824_v2  ;;  %v2042_v22 = vrot.slane %v6483_v50, %v6180_v43 }
 0xa2c   : > { %v1995_v27 = vsel %vm692_vm2, %v1992_v24, 0.0 }
 0xa2d   : > { %1996 = vadd.xlane.f32.xlu0 %v1995_v27 }
 0xaba   : > { %v1997_v16 = vpop.xlane.xlu0 %1996 }
 0xabb   : > { %v1998_v28 = vmul.f32 0.015625, %v1997_v16 }
 0xabd   : > { %v1999_v26 = vsub.f32 %v1992_v24, %v1998_v28 }
 0xabf   : > { %v2000_v29 = vmul.f32 %v1999_v26, %v1999_v26 }
 0xac1   : > { %v2001_v30 = vsel %vm692_vm2, %v2000_v29, 0.0 }
 0xac2   : > { %2002 = vadd.xlane.f32.xlu1 %v2001_v30 }
 0xb4f   : > { %v2003_v39 = vpop.xlane.xlu1 %2002 }
 0xb50   : > { %v2004_v41 = vmul.f32 0.015625, %v2003_v39 }
 0xb52   : > { %v2005_v42 = vadd.f32 1e-05, %v2004_v41 }
 0xb54   : > { %5897 = vrsqrt.f32 %v2005_v42 }
 0xb5e   : > { %v5898_v44 = vpop.eup %5897 }
 0xb5f   : > { %v2007_v40 = vmul.f32 %v5898_v44, %v1999_v26 }
 0xb61   : > { %v2014_v47 = vmul.f32 %v5000_v45, %v2007_v40 }
 0xb63   : > { %v6473_v48 = vadd.f32 %v5001_v46, %v2014_v47 }
 0xb65   : > { %v2022_v49 = vpack.c.bf16 %v6473_v48, %v6473_v48 }
 0xb67   : > { %5019 = vmatmul.mubr.msk.bf16.vlgmr.msra.gmra.mrb[44].mxu0 %vm692_vm2, %v2022_v49 }
 0xb68   : > { %5486 = vmatprep.mubr.msk.bf16.mxu0 %vm5980_vm0, %v5981_v6 }
 0xc3a   : > { %v2122_v53 = vpop.f32.mrb[44].mxu0 }
 0xc3b   : > { %v2123_v20 = vadd.f32 %v2122_v53, %v2038_v51  ;;  %v2124_v54 = vpop.f32.mrb[45].mxu0 }
 0xc3c   : > { %v2126_v55 = vpop.f32.mrb[46].mxu0  ;;  %v6523_v27 = vadd.f32 %v2124_v54, %v2042_v22 }
 0xc3d   : > { %v2127_v56 = vpop.f32.mrb[47].mxu0  ;;  %2133 = vrot.lane.b32.xlu1 %v2123_v20, %s7136_s23  ;;  %2130 = vrot.lane.b32.xlu0 %v2123_v20, %s7134_s21  ;;  %v2151_v57 = vpack.c.bf16 %v2123_v20, %v2123_v20 }
 0xc3e   : > { %v2181_v26 = vpack.c.bf16 %v6523_v27, %v6523_v27 }
 0xc40   : > { %v2697_v31 = vsel %vm1305_vm4, %v2181_v26, 0 }
 0xc41   : > { %2136 = vrot.lane.b32.xlu1 %v2123_v20, %s7132_s20  ;;  %2139 = vrot.lane.b32.xlu0 %v2123_v20, %s7158_s30 }
 0xc45   : > { %2142 = vrot.lane.b32.xlu1 %v2123_v20, %s7159_s27  ;;  %2145 = vrot.lane.b32.xlu0 %v2123_v20, %s7160_s26 }
 0xc49   : > { %2148 = vrot.lane.b32.xlu1 %v2123_v20, %s7161_s18  ;;  %2190 = vrot.lane.b32.xlu0 %v2151_v57, %s7162_s22 }
 0xcaf   : > { %v2134_v58 = vpop.permute.xlu1 %2133  ;;  %v2131_v59 = vpop.permute.xlu0 %2130 }
 0xcb0   : > { %v2153_v60 = vpack.c.bf16 %v2134_v58, %v2134_v58  ;;  %v2152_v61 = vpack.c.bf16 %v2131_v59, %v2131_v59 }
 0xcb2   : > { %2239 = vrot.lane.b32.xlu1 %v2152_v61, %s7162_s22  ;;  %2288 = vrot.lane.b32.xlu0 %v2153_v60, %s7162_s22 }
 0xcb3   : > { %v2137_v62 = vpop.permute.xlu1 %2136  ;;  %v2140_v63 = vpop.permute.xlu0 %2139 }
 0xcb4   : > { %v2154_v0 = vpack.c.bf16 %v2137_v62, %v2137_v62  ;;  %v2155_v1 = vpack.c.bf16 %v2140_v63, %v2140_v63 }
 0xcb6   : > { %2337 = vrot.lane.b32.xlu1 %v2154_v0, %s7162_s22  ;;  %2386 = vrot.lane.b32.xlu0 %v2155_v1, %s7162_s22 }
 0xcb7   : > { %v2143_v2 = vpop.permute.xlu1 %2142  ;;  %v2146_v3 = vpop.permute.xlu0 %2145 }
 0xcb8   : > { %v2156_v4 = vpack.c.bf16 %v2143_v2, %v2143_v2  ;;  %v2157_v5 = vpack.c.bf16 %v2146_v3, %v2146_v3 }
 0xcba   : > { %2435 = vrot.lane.b32.xlu1 %v2156_v4, %s7162_s22  ;;  %2484 = vrot.lane.b32.xlu0 %v2157_v5, %s7162_s22 }
 0xcbb   : > { %v2149_v7 = vpop.permute.xlu1 %2148  ;;  %v2191_v8 = vpop.permute.xlu0 %2190 }
 0xcbc   : > { %v2158_v9 = vpack.c.bf16 %v2149_v7, %v2149_v7  ;;  %v2196_v11 = vsel %vm800_vm3, %v2191_v8, 0 }
 0xcbd   : > { %5479 = vmatpush3.bf16.xpose.msra.mxu1 %v2196_v11 }
 0xcbe   : > { %2533 = vrot.lane.b32.xlu1 %v2158_v9, %s7162_s22  ;;  %5490 = vmatprep.subr.bf16.mxu1 %v5981_v6 }
 0xcc4   : > { %5481 = vmatmul.mubr.msk.bf16.vlgmr.msra.gmra.mrb[40].mxu1 %vm800_vm3, %v2151_v57 }
 0xcc5   : > { %5492 = vmatprep.mubr.msk.bf16.mxu1 %vm5980_vm0, %v5981_v6 }
 0xd24   : > { %v2240_v52 = vpop.permute.xlu1 %2239  ;;  %v2289_v12 = vpop.permute.xlu0 %2288 }
 0xd25   : > { %v2245_v13 = vsel %vm800_vm3, %v2240_v52, 0  ;;  %v2294_v14 = vsel %vm800_vm3, %v2289_v12, 0 }
 0xd26   : > { %5485 = vmatpush3.bf16.xpose.msra.mxu0 %v2245_v13  ;;  %5491 = vmatpush3.bf16.xpose.msra.mxu1 %v2294_v14 }
 0xd27   : > { %5496 = vmatprep.subr.bf16.mxu0 %v5981_v6  ;;  %5502 = vmatprep.subr.bf16.mxu1 %v5981_v6 }
 0xd28   : > { %v2338_v15 = vpop.permute.xlu1 %2337  ;;  %v2387_v18 = vpop.permute.xlu0 %2386 }
 0xd29   : > { %v2343_v19 = vsel %vm800_vm3, %v2338_v15, 0  ;;  %v2392_v21 = vsel %vm800_vm3, %v2387_v18, 0 }
 0xd2c   : > { %v2436_v23 = vpop.permute.xlu1 %2435  ;;  %v2485_v24 = vpop.permute.xlu0 %2484 }
 0xd2d   : > { %5487 = vmatmul.mubr.msk.bf16.vlgmr.msra.gmra.mrb[48].mxu0 %vm800_vm3, %v2152_v61  ;;  %5493 = vmatmul.mubr.msk.bf16.vlgmr.msra.gmra.mrb[44].mxu1 %vm800_vm3, %v2153_v60  ;;  %v2441_v16 = vsel %vm800_vm3, %v2436_v23, 0  ;;  %v2490_v28 = vsel %vm800_vm3, %v2485_v24, 0 }
 0xd2e   : > { %5497 = vmatpush3.bf16.xpose.msra.mxu0 %v2343_v19  ;;  %5503 = vmatpush3.bf16.xpose.msra.mxu1 %v2392_v21 }
 0xd2f   : > { %5498 = vmatprep.mubr.msk.bf16.mxu0 %vm5980_vm0, %v5981_v6  ;;  %5504 = vmatprep.mubr.msk.bf16.mxu1 %vm5980_vm0, %v5981_v6 }
 0xd30   : > { %5508 = vmatprep.subr.bf16.mxu0 %v5981_v6  ;;  %5514 = vmatprep.subr.bf16.mxu1 %v5981_v6  ;;  %v2534_v29 = vpop.permute.xlu1 %2533 }
 0xd31   : > { %v2539_v30 = vsel %vm800_vm3, %v2534_v29, 0 }
 0xd35   : > { %5499 = vmatmul.mubr.msk.bf16.vlgmr.msra.gmra.mrb[52].mxu0 %vm800_vm3, %v2154_v0  ;;  %5505 = vmatmul.mubr.msk.bf16.vlgmr.msra.gmra.mrb[48].mxu1 %vm800_vm3, %v2155_v1 }
 0xd36   : > { %5509 = vmatpush3.bf16.xpose.msra.mxu0 %v2441_v16  ;;  %5515 = vmatpush3.bf16.xpose.msra.mxu1 %v2490_v28 }
 0xd37   : > { %5510 = vmatprep.mubr.msk.bf16.mxu0 %vm5980_vm0, %v5981_v6  ;;  %5516 = vmatprep.mubr.msk.bf16.mxu1 %vm5980_vm0, %v5981_v6 }
 0xd38   : > { %5520 = vmatprep.subr.bf16.mxu0 %v5981_v6  ;;  %5526 = vmatprep.subr.bf16.mxu1 %v5981_v6 }
 0xd3d   : > { %5511 = vmatmul.mubr.msk.bf16.vlgmr.msra.gmra.mrb[56].mxu0 %vm800_vm3, %v2156_v4  ;;  %5517 = vmatmul.mubr.msk.bf16.vlgmr.msra.gmra.mrb[52].mxu1 %vm800_vm3, %v2157_v5 }
 0xd3e   : > { %5521 = vmatpush3.bf16.xpose.msra.mxu0 %v2539_v30  ;;  %5527 = vmatpush3.bf16.msra.mxu1 %v2697_v31 }
 0xd3f   : > { %5522 = vmatprep.mubr.msk.bf16.mxu0 %vm5980_vm0, %v5981_v6  ;;  %5532 = vmatprep.subr.bf16.mxu0 %v5981_v6 }
 0xd40   : > { %5528 = vmatprep.mubr.msk.bf16.mxu1 %vm5980_vm0, %v5981_v6  ;;  %5538 = vmatprep.subr.bf16.mxu1 %v5981_v6 }
 0xd45   : > { %5523 = vmatmul.mubr.msk.bf16.vlgmr.msra.gmra.mrb[60].mxu0 %vm800_vm3, %v2158_v9 }
 0xd46   : > { %5534 = vmatprep.mubr.msk.bf16.mxu0 %vm5980_vm0, %v5981_v6 }
 0xd97   : > { %v2232_v32 = vpop.f32.mrb[40].mxu1 }
 0xd98   : > { %v2581_v33 = vmul.f32 0.35355338, %v2232_v32  ;;  %v5482_v34 = vpop.f32.mrb[41].mxu1 }
 0xd99   : > { %v2235_v35 = vpop.f32.mrb[42].mxu1 }
 0xd9a   : > { %v5483_v36 = vpop.f32.mrb[43].mxu1  ;;  %v6551_v37 = vadd.f32 %v2581_v33, %v6240_v10 }
 0xd9c   : > { %v2597_v38 = vsel %vm800_vm3, %v6551_v37, -inf }
 0xd9d   : > { %2598 = vmax.xlane.f32.xlu0 %v2597_v38 }
 0xe00   : > { %v2281_v39 = vpop.f32.mrb[48].mxu0  ;;  %v2330_v41 = vpop.f32.mrb[44].mxu1 }
 0xe01   : > { %v2582_v42 = vmul.f32 0.35355338, %v2281_v39  ;;  %v2583_v44 = vmul.f32 0.35355338, %v2330_v41  ;;  %v5488_v45 = vpop.f32.mrb[49].mxu0  ;;  %v5494_v40 = vpop.f32.mrb[45].mxu1 }
 0xe02   : > { %v2284_v46 = vpop.f32.mrb[50].mxu0  ;;  %v2333_v47 = vpop.f32.mrb[46].mxu1 }
 0xe03   : > { %v5489_v49 = vpop.f32.mrb[51].mxu0  ;;  %v5495_v50 = vpop.f32.mrb[47].mxu1  ;;  %v2590_v51 = vadd.f32 %v2582_v42, %v6240_v10  ;;  %v2591_v53 = vadd.f32 %v2583_v44, %v6240_v10 }
 0xe05   : > { %v2600_v20 = vsel %vm800_vm3, %v2590_v51, -inf  ;;  %v2603_v54 = vsel %vm800_vm3, %v2591_v53, -inf }
 0xe06   : > { %2601 = vmax.xlane.f32.xlu1 %v2600_v20  ;;  %2604 = vmax.xlane.f32.xlu0 %v2603_v54 }
 0xe08   : > { %v2379_v55 = vpop.f32.mrb[52].mxu0  ;;  %v2428_v56 = vpop.f32.mrb[48].mxu1 }
 0xe09   : > { %v2584_v57 = vmul.f32 0.35355338, %v2379_v55  ;;  %v2585_v58 = vmul.f32 0.35355338, %v2428_v56  ;;  %v5500_v59 = vpop.f32.mrb[53].mxu0  ;;  %v5506_v60 = vpop.f32.mrb[49].mxu1 }
 0xe0a   : > { %v2382_v61 = vpop.f32.mrb[54].mxu0  ;;  %v2431_v62 = vpop.f32.mrb[50].mxu1 }
 0xe0b   : > { %v5501_v63 = vpop.f32.mrb[55].mxu0  ;;  %v5507_v0 = vpop.f32.mrb[51].mxu1  ;;  %v2592_v1 = vadd.f32 %v2584_v57, %v6240_v10  ;;  %v2593_v2 = vadd.f32 %v2585_v58, %v6240_v10 }
 0xe0d   : > { %v2606_v3 = vsel %vm800_vm3, %v2592_v1, -inf  ;;  %v2609_v4 = vsel %vm800_vm3, %v2593_v2, -inf }
 0xe0e   : > { %2607 = vmax.xlane.f32.xlu0 %v2606_v3  ;;  %2610 = vmax.xlane.f32.xlu1 %v2609_v4 }
 0xe10   : > { %v2477_v5 = vpop.f32.mrb[56].mxu0  ;;  %v2526_v7 = vpop.f32.mrb[52].mxu1 }
 0xe11   : > { %v2586_v8 = vmul.f32 0.35355338, %v2477_v5  ;;  %v2587_v9 = vmul.f32 0.35355338, %v2526_v7  ;;  %v5512_v11 = vpop.f32.mrb[57].mxu0  ;;  %v5518_v52 = vpop.f32.mrb[53].mxu1 }
 0xe12   : > { %v2480_v12 = vpop.f32.mrb[58].mxu0  ;;  %v2529_v13 = vpop.f32.mrb[54].mxu1 }
 0xe13   : > { %v5513_v14 = vpop.f32.mrb[59].mxu0  ;;  %v5519_v15 = vpop.f32.mrb[55].mxu1  ;;  %v2594_v18 = vadd.f32 %v2586_v8, %v6240_v10  ;;  %v2595_v19 = vadd.f32 %v2587_v9, %v6240_v10 }
 0xe15   : > { %v2612_v21 = vsel %vm800_vm3, %v2594_v18, -inf  ;;  %v2615_v22 = vsel %vm800_vm3, %v2595_v19, -inf }
 0xe16   : > { %2613 = vmax.xlane.f32.xlu0 %v2612_v21  ;;  %2616 = vmax.xlane.f32.xlu1 %v2615_v22 }
 0xe18   : > { %v2575_v23 = vpop.f32.mrb[60].mxu0 }
 0xe19   : > { %v2588_v24 = vmul.f32 0.35355338, %v2575_v23  ;;  %v5524_v16 = vpop.f32.mrb[61].mxu0 }
 0xe1a   : > { %v2578_v28 = vpop.f32.mrb[62].mxu0 }
 0xe1b   : > { %v5525_v26 = vpop.f32.mrb[63].mxu0  ;;  %v2596_v29 = vadd.f32 %v2588_v24, %v6240_v10 }
 0xe1d   : > { %v2618_v30 = vsel %vm800_vm3, %v2596_v29, -inf }
 0xe1e   : > { %2619 = vmax.xlane.f32.xlu0 %v2618_v30 }
 0xe27   : > { %2160 = vrot.lane.b32.xlu1 %v6523_v27, %s7134_s21  ;;  %s7165_s21 = smov 32  }
 0xe2a   : > { %v2599_v31 = vpop.xlane.xlu0 %2598 }
 0xe2b   : > { %2166 = vrot.lane.b32.xlu1 %v6523_v27, %s7132_s20  ;;  %v2621_v32 = vsub.f32 %v6551_v37, %v2599_v31  ;;  %s7177_s20 = smov %s7176_s24 }
 0xe2d   : > { %v2629_v33 = vmul.f32 1.442695, %v2621_v32 }
 0xe2f   : > { %2169 = vrot.lane.b32.xlu1 %v6523_v27, %s7158_s30  ;;  %5899 = vpow2.f32 %v2629_v33 }
 0xe34   : > { %2163 = vrot.lane.b32.xlu0 %v6523_v27, %s7136_s23  ;;  %s7166_s23 = smov 24  }
 0xe39   : > { %v6578_v34 = vpop.eup %5899 }
 0xe3a   : > { %v2645_v35 = vsel %vm800_vm3, %v6578_v34, 0.0 }
 0xe53   : > { %2646 = vadd.xlane.f32.xlu1 %v2645_v35 }
 0xe64   : > { %2172 = vrot.lane.b32.xlu1 %v6523_v27, %s7159_s27 }
 0xe93   : > { %v2602_v36 = vpop.xlane.xlu1 %2601  ;;  %v2605_v38 = vpop.xlane.xlu0 %2604 }
 0xe94   : > { %v2622_v39 = vsub.f32 %v2590_v51, %v2602_v36  ;;  %v2623_v41 = vsub.f32 %v2591_v53, %v2605_v38 }
 0xe96   : > { %v2631_v42 = vmul.f32 1.442695, %v2622_v39  ;;  %v2633_v44 = vmul.f32 1.442695, %v2623_v41 }
 0xe98   : > { %5901 = vpow2.f32 %v2631_v42 }
 0xe99   : > { %5903 = vpow2.f32 %v2633_v44 }
 0xe9b   : > { %v2611_v37 = vpop.xlane.xlu1 %2610  ;;  %v2608_v45 = vpop.xlane.xlu0 %2607 }
 0xe9c   : > { %v2625_v40 = vsub.f32 %v2593_v2, %v2611_v37  ;;  %v2624_v46 = vsub.f32 %v2592_v1, %v2608_v45 }
 0xe9e   : > { %v2637_v47 = vmul.f32 1.442695, %v2625_v40  ;;  %v2635_v49 = vmul.f32 1.442695, %v2624_v46 }
 0xea0   : > { %5905 = vpow2.f32 %v2637_v47 }
 0xea1   : > { %5907 = vpow2.f32 %v2635_v49 }
 0xea2   : > { %v6584_v50 = vpop.eup %5901 }
 0xea3   : > { %v6586_v20 = vpop.eup %5903  ;;  %v2617_v54 = vpop.xlane.xlu1 %2616  ;;  %v2648_v51 = vsel %vm800_vm3, %v6584_v50, 0.0 }
 0xea4   : > { %v2614_v55 = vpop.xlane.xlu0 %2613  ;;  %v2627_v53 = vsub.f32 %v2595_v19, %v2617_v54  ;;  %2649 = vadd.xlane.f32.xlu0 %v2648_v51  ;;  %v2651_v57 = vsel %vm800_vm3, %v6586_v20, 0.0 }
 0xea5   : > { %v2626_v56 = vsub.f32 %v2594_v18, %v2614_v55  ;;  %2652 = vadd.xlane.f32.xlu1 %v2651_v57 }
 0xea6   : > { %v2641_v59 = vmul.f32 1.442695, %v2627_v53 }
 0xea7   : > { %v2639_v58 = vmul.f32 1.442695, %v2626_v56  ;;  %v2161_v60 = vpop.permute.xlu1 %2160 }
 0xea8   : > { %v2182_v61 = vpack.c.bf16 %v2161_v60, %v2161_v60 }
 0xea9   : > { %5909 = vpow2.f32 %v2639_v58 }
 0xeaa   : > { %v6592_v62 = vpop.eup %5905  ;;  %v2743_v63 = vsel %vm1305_vm4, %v2182_v61, 0  ;;  %5911 = vpow2.f32 %v2641_v59 }
 0xeab   : > { %v6595_v0 = vpop.eup %5907  ;;  %5533 = vmatpush3.bf16.msra.mxu0 %v2743_v63  ;;  %v2620_v1 = vpop.xlane.xlu0 %2619  ;;  %v2657_v2 = vsel %vm800_vm3, %v6592_v62, 0.0 }
 0xeac   : > { %v2628_v3 = vsub.f32 %v2596_v29, %v2620_v1  ;;  %2658 = vadd.xlane.f32.xlu1 %v2657_v2  ;;  %v2654_v4 = vsel %vm800_vm3, %v6595_v0, 0.0  ;;  %5544 = vmatprep.subr.bf16.mxu0 %v5981_v6  ;;  %v2167_v13 = vpop.permute.xlu1 %2166 }
 0xead   : > { %2655 = vadd.xlane.f32.xlu0 %v2654_v4  ;;  %v2184_v32 = vpack.c.bf16 %v2167_v13, %v2167_v13 }
 0xeae   : > { %v2643_v5 = vmul.f32 1.442695, %v2628_v3 }
 0xeaf   : > { %v2164_v18 = vpop.permute.xlu0 %2163  ;;  %v2835_v39 = vsel %vm1305_vm4, %v2184_v32, 0 }
 0xeb0   : > { %5913 = vpow2.f32 %v2643_v5  ;;  %v2170_v14 = vpop.permute.xlu1 %2169  ;;  %v2183_v21 = vpack.c.bf16 %v2164_v18, %v2164_v18 }
 0xeb2   : > { %v2789_v24 = vsel %vm1305_vm4, %v2183_v21, 0  ;;  %v5824_v21 = vld [vmem:[%s7094_s5 + $0x28] sm:$0xff]  }
 0xeb3   : > { %v6602_v7 = vpop.eup %5909 }
 0xeb4   : > { %v2660_v8 = vsel %vm800_vm3, %v6602_v7, 0.0  ;;  %v6606_v9 = vpop.eup %5911 }
 0xeb5   : > { %2661 = vadd.xlane.f32.xlu0 %v2660_v8  ;;  %v2663_v11 = vsel %vm800_vm3, %v6606_v9, 0.0 }
 0xeb9   : > { %2664 = vadd.xlane.f32.xlu0 %v2663_v11 }
 0xeba   : > { %v6610_v52 = vpop.eup %5913 }
 0xebb   : > { %v2666_v12 = vsel %vm800_vm3, %v6610_v52, 0.0 }
 0xebd   : > { %2667 = vadd.xlane.f32.xlu0 %v2666_v12  ;;  %2175 = vrot.lane.b32.xlu1 %v6523_v27, %s7160_s26 }
 0xed3   : > { %2178 = vrot.lane.b32.xlu0 %v6523_v27, %s7161_s18 }
 0xee0   : > { %v2647_v15 = vpop.xlane.xlu1 %2646 }
 0xee1   : > { %5915 = vrcp.f32 %v2647_v15 }
 0xee4   : > { %v2173_v27 = vpop.permute.xlu1 %2172 }
 0xee5   : > { %v2186_v46 = vpack.c.bf16 %v2173_v27, %v2173_v27 }
 0xee7   : > { %v2927_v55 = vsel %vm1305_vm4, %v2186_v46, 0 }
 0xeeb   : > { %v5916_v19 = vpop.eup %5915 }
 0xeec   : > { %v2670_v22 = vmul.f32 %v5916_v19, %v6578_v34  ;;  %v2185_v34 = vpack.c.bf16 %v2170_v14, %v2170_v14 }
 0xeee   : > { %v2685_v23 = vpack.c.bf16 %v2670_v22, %v2670_v22  ;;  %v2881_v41 = vsel %vm1305_vm4, %v2185_v34, 0  ;;  %v5825_v22 = vld [vmem:[%s7094_s5 + $0x30] sm:$0xff]  }
 0xef0   : > { %5529 = vmatmul.mubr.msk.bf16.vlgmr.msra.gmra.mrb[56].mxu1 %vm800_vm3, %v2685_v23 }
 0xef1   : > { %5539 = vmatpush3.bf16.msra.mxu1 %v2789_v24  ;;  %5540 = vmatprep.mubr.msk.bf16.mxu1 %vm5980_vm0, %v5981_v6 }
 0xef2   : > { %5550 = vmatprep.subr.bf16.mxu1 %v5981_v6 }
 0xf31   : > { %v2650_v16 = vpop.xlane.xlu0 %2649 }
 0xf32   : > { %v2653_v28 = vpop.xlane.xlu1 %2652  ;;  %5917 = vrcp.f32 %v2650_v16 }
 0xf33   : > { %5919 = vrcp.f32 %v2653_v28 }
 0xf39   : > { %v2659_v26 = vpop.xlane.xlu1 %2658 }
 0xf3a   : > { %5921 = vrcp.f32 %v2659_v26  ;;  %v2656_v29 = vpop.xlane.xlu0 %2655 }
 0xf3b   : > { %5923 = vrcp.f32 %v2656_v29 }
 0xf3c   : > { %v5918_v30 = vpop.eup %5917 }
 0xf3d   : > { %v5920_v31 = vpop.eup %5919  ;;  %v2672_v33 = vmul.f32 %v5918_v30, %v6584_v50  ;;  %v2176_v44 = vpop.permute.xlu1 %2175 }
 0xf3e   : > { %v2674_v35 = vmul.f32 %v5920_v31, %v6586_v20  ;;  %v2187_v49 = vpack.c.bf16 %v2176_v44, %v2176_v44  ;;  %v5826_v31 = vld [vmem:[%s7094_s5 + $0x38] sm:$0xff]  }
 0xf3f   : > { %v2686_v36 = vpack.c.bf16 %v2672_v33, %v2672_v33 }
 0xf40   : > { %v2687_v38 = vpack.c.bf16 %v2674_v35, %v2674_v35  ;;  %v2973_v51 = vsel %vm1305_vm4, %v2187_v49, 0 }
 0xf41   : > { %5535 = vmatmul.mubr.msk.bf16.vlgmr.msra.gmra.mrb[64].mxu0 %vm800_vm3, %v2686_v36 }
 0xf42   : > { %5541 = vmatmul.mubr.msk.bf16.vlgmr.msra.gmra.mrb[60].mxu1 %vm800_vm3, %v2687_v38  ;;  %5545 = vmatpush3.bf16.msra.mxu0 %v2835_v39  ;;  %v2662_v42 = vpop.xlane.xlu0 %2661 }
 0xf43   : > { %5551 = vmatpush3.bf16.msra.mxu1 %v2881_v41  ;;  %5925 = vrcp.f32 %v2662_v42  ;;  %5546 = vmatprep.mubr.msk.bf16.mxu0 %vm5980_vm0, %v5981_v6 }
 0xf44   : > { %v5922_v37 = vpop.eup %5921  ;;  %5552 = vmatprep.mubr.msk.bf16.mxu1 %vm5980_vm0, %v5981_v6  ;;  %5556 = vmatprep.subr.bf16.mxu0 %v5981_v6 }
 0xf45   : > { %v5924_v45 = vpop.eup %5923  ;;  %v2678_v40 = vmul.f32 %v5922_v37, %v6592_v62  ;;  %5562 = vmatprep.subr.bf16.mxu1 %v5981_v6 }
 0xf46   : > { %v2676_v47 = vmul.f32 %v5924_v45, %v6595_v0  ;;  %v2665_v50 = vpop.xlane.xlu0 %2664 }
 0xf47   : > { %5927 = vrcp.f32 %v2665_v50  ;;  %v2689_v20 = vpack.c.bf16 %v2678_v40, %v2678_v40 }
 0xf48   : > { %v2688_v54 = vpack.c.bf16 %v2676_v47, %v2676_v47 }
 0xf4a   : > { %5547 = vmatmul.mubr.msk.bf16.vlgmr.msra.gmra.mrb[68].mxu0 %vm800_vm3, %v2688_v54  ;;  %5553 = vmatmul.mubr.msk.bf16.vlgmr.msra.gmra.mrb[64].mxu1 %vm800_vm3, %v2689_v20  ;;  %v2668_v53 = vpop.xlane.xlu0 %2667 }
 0xf4b   : > { %5557 = vmatpush3.bf16.msra.mxu0 %v2927_v55  ;;  %5563 = vmatpush3.bf16.msra.mxu1 %v2973_v51  ;;  %5929 = vrcp.f32 %v2668_v53 }
 0xf4c   : > { %5558 = vmatprep.mubr.msk.bf16.mxu0 %vm5980_vm0, %v5981_v6  ;;  %5568 = vmatprep.subr.bf16.mxu0 %v5981_v6 }
 0xf4d   : > { %v5926_v56 = vpop.eup %5925  ;;  %5564 = vmatprep.mubr.msk.bf16.mxu1 %vm5980_vm0, %v5981_v6  ;;  %5574 = vmatprep.subr.bf16.mxu1 %v5981_v6 }
 0xf4e   : > { %v2680_v57 = vmul.f32 %v5926_v56, %v6602_v7  ;;  %v2179_v58 = vpop.permute.xlu0 %2178 }
 0xf4f   : > { %v2188_v59 = vpack.c.bf16 %v2179_v58, %v2179_v58 }
 0xf50   : > { %v2690_v60 = vpack.c.bf16 %v2680_v57, %v2680_v57 }
 0xf51   : > { %v5928_v61 = vpop.eup %5927  ;;  %v3019_v62 = vsel %vm1305_vm4, %v2188_v59, 0 }
 0xf52   : > { %v2682_v63 = vmul.f32 %v5928_v61, %v6606_v9  ;;  %5559 = vmatmul.mubr.msk.bf16.vlgmr.msra.gmra.mrb[72].mxu0 %vm800_vm3, %v2690_v60  ;;  %v5823_v9 = vld [vmem:[%s7094_s5 + $0x20] sm:$0xff]  }
 0xf53   : > { %5569 = vmatpush3.bf16.msra.mxu0 %v3019_v62  ;;  %5570 = vmatprep.mubr.msk.bf16.mxu0 %vm5980_vm0, %v5981_v6  ;;  %v5045_v61 = vld [vmem:[%s7155_s6 + $0x1] ss:$0 sm:$0xff]  ;;  %s7172_s6 = smov 104  }
 0xf54   : > { %v2691_v0 = vpack.c.bf16 %v2682_v63, %v2682_v63  ;;  %5586 = vmatprep.subr.bf16.mxu0 %v5981_v6 }
 0xf55   : > { %v5930_v1 = vpop.eup %5929 }
 0xf56   : > { %v2684_v2 = vmul.f32 %v5930_v1, %v6610_v52  ;;  %5565 = vmatmul.mubr.msk.bf16.vlgmr.msra.gmra.mrb[68].mxu1 %vm800_vm3, %v2691_v0 }
 0xf57   : > { %5582 = vmatprep.mubr.msk.bf16.mxu1 %vm5980_vm0, %v5981_v6  ;;  %5575 = vmatpush3.bf16.msra.mxu1 %v5823_v9 }
 0xf58   : > { %v2692_v3 = vpack.c.bf16 %v2684_v2, %v2684_v2  ;;  %5576 = vmatprep.subr.bf16.mxu1 %v5981_v6 }
 0xf5a   : > { %5571 = vmatmul.mubr.msk.bf16.vlgmr.msra.gmra.mrb[76].mxu0 %vm800_vm3, %v2692_v3 }
 0xf5b   : > { %5594 = vmatprep.mubr.msk.bf16.mxu0 %vm5980_vm0, %v5981_v6  ;;  %5577 = vmatpush3.bf16.msra.mxu1 %v5824_v21 }
 0xf5c   : > { %5578 = vmatprep.subr.bf16.mxu1 %v5981_v6 }
 0xf5f   : > { %5579 = vmatpush3.bf16.msra.mxu1 %v5825_v22 }
 0xf60   : > { %5580 = vmatprep.subr.bf16.mxu1 %v5981_v6 }
 0xf63   : > { %5581 = vmatpush3.bf16.msra.mxu1 %v5826_v31  ;;  %v5064_v31 = vld [vmem:[%s7156_s10 + $0x1] ss:$0 sm:$0xff] }
 0xf64   : > { %5598 = vmatprep.subr.bf16.mxu1 %v5981_v6 }
 0xfc3   : > { %v2733_v4 = vpop.f32.mrb[56].mxu1 }
 0xfc4   : > { %v5530_v5 = vpop.f32.mrb[57].mxu1 }
 0xfc5   : > { %v2736_v7 = vpop.f32.mrb[58].mxu1 }
 0xfc6   : > { %v5531_v8 = vpop.f32.mrb[59].mxu1 }
0x1014   : > { %v2779_v11 = vpop.f32.mrb[64].mxu0 }
0x1015   : > { %v2825_v52 = vpop.f32.mrb[60].mxu1  ;;  %3062 = vrot.lane.b32.xlu1 %v2779_v11, %s7163_s29  ;;  %v5536_v12 = vpop.f32.mrb[65].mxu0 }
0x1016   : > { %3066 = vrot.lane.b32.xlu0 %v2825_v52, %s7164_s1  ;;  %v5542_v13 = vpop.f32.mrb[61].mxu1  ;;  %v2782_v14 = vpop.f32.mrb[66].mxu0  ;;  %v5827_v52 = vld [vmem:[%s7098_s9 + $0x20] sm:$0xff]   ;;  %v5829_v12 = vld [vmem:[%s7098_s9 + $0x30] sm:$0xff]  }
0x1017   : > { %v2828_v15 = vpop.f32.mrb[62].mxu1  ;;  %v5537_v18 = vpop.f32.mrb[67].mxu0  ;;  %5587 = vmatpush3.bf16.msra.mxu0 %v5827_v52  ;;  %v5830_v13 = vld [vmem:[%s7098_s9 + $0x38] sm:$0xff]   ;;  %v5831_v14 = vld [vmem:[%s7100_s11 + $0x20] sm:$0xff]  }
0x1018   : > { %v5543_v19 = vpop.f32.mrb[63].mxu1  ;;  %5588 = vmatprep.subr.bf16.mxu0 %v5981_v6  ;;  %v5832_v15 = vld [vmem:[%s7100_s11 + $0x28] sm:$0xff]  }
0x101d   : > { %v2871_v23 = vpop.f32.mrb[68].mxu0  ;;  %v2917_v24 = vpop.f32.mrb[64].mxu1 }
0x101e   : > { %3074 = vrot.lane.b32.xlu0 %v2917_v24, %s7165_s21  ;;  %v5554_v27 = vpop.f32.mrb[65].mxu1  ;;  %3070 = vrot.lane.b32.xlu1 %v2871_v23, %s7166_s23  ;;  %v5548_v16 = vpop.f32.mrb[69].mxu0  ;;  %v5053_v23 = vld [vmem:[%s7096_s7 + $0x1] ss:$0 sm:$0xff] }
0x101f   : > { %v2874_v28 = vpop.f32.mrb[70].mxu0  ;;  %v2920_v26 = vpop.f32.mrb[66].mxu1  ;;  %v5054_v27 = vld [vmem:[%s7097_s8 + $0x1] ss:$0 sm:$0xff] }
0x1020   : > { %v5549_v29 = vpop.f32.mrb[71].mxu0  ;;  %v5555_v30 = vpop.f32.mrb[67].mxu1 }
0x1021   : > { %v5833_v29 = vld [vmem:[%s7100_s11 + $0x30] sm:$0xff]   ;;  %v5834_v30 = vld [vmem:[%s7100_s11 + $0x38] sm:$0xff]  }
0x1025   : > { %v2963_v32 = vpop.f32.mrb[72].mxu0 }
0x1026   : > { %3078 = vrot.lane.b32.xlu1 %v2963_v32, %s7167_s28  ;;  %v5560_v33 = vpop.f32.mrb[73].mxu0 }
0x1027   : > { %v2966_v34 = vpop.f32.mrb[74].mxu0 }
0x1028   : > { %v5561_v35 = vpop.f32.mrb[75].mxu0 }
0x1029   : > { %v3009_v36 = vpop.f32.mrb[68].mxu1 }
0x102a   : > { %3082 = vrot.lane.b32.xlu0 %v3009_v36, %s7168_s0  ;;  %v5566_v38 = vpop.f32.mrb[69].mxu1 }
0x102b   : > { %v3012_v39 = vpop.f32.mrb[70].mxu1 }
0x102c   : > { %v5567_v41 = vpop.f32.mrb[71].mxu1  ;;  %v5079_v39 = vld [vmem:[%s7157_s12 + $0x1] ss:$0 sm:$0xff]  ;;  %s7175_s12 = sld [smem:[#allocation9_spill]] }
0x102d   : > { %v3055_v42 = vpop.f32.mrb[76].mxu0 }
0x102e   : > { %3086 = vrot.lane.b32.xlu1 %v3055_v42, %s7169_s2  ;;  %v5572_v44 = vpop.f32.mrb[77].mxu0 }
0x102f   : > { %v3058_v37 = vpop.f32.mrb[78].mxu0 }
0x1030   : > { %v5573_v45 = vpop.f32.mrb[79].mxu0 }
0x1087   : > { %v3063_v40 = vpop.permute.xlu1 %3062 }
0x1088   : > { %v3067_v46 = vpop.permute.xlu0 %3066  ;;  %v3089_v47 = vsel %vm800_vm3, %v2733_v4, %v3063_v40 }
0x1089   : > { %v3090_v20 = vsel %vm1700_vm6, %v3089_v47, %v3067_v46 }
0x1090   : > { %v3071_v49 = vpop.permute.xlu1 %3070  ;;  %v3075_v50 = vpop.permute.xlu0 %3074 }
0x1091   : > { %v3091_v54 = vsel %vm1702_vm7, %v3090_v20, %v3071_v49 }
0x1092   : > { %v3092_v53 = vsel %vm557_vm1, %v3091_v54, %v3075_v50 }
0x1098   : > { %v3079_v55 = vpop.permute.xlu1 %3078 }
0x1099   : > { %v3093_v56 = vsel %vm1705_vm8, %v3092_v53, %v3079_v55  ;;  %v5837_v55 = vld [vmem:[%s7092_s3 + $0x84] ss:$8 sps:$4 sm:$0xff]   ;;  %v5840_v53 = vld [vmem:[%s7092_s3 + $0x94] ss:$8 sps:$4 sm:$0xff]  }
0x109c   : > { %v3083_v51 = vpop.permute.xlu0 %3082 }
0x109d   : > { %v3094_v57 = vsel %vm1707_vm9, %v3093_v56, %v3083_v51  ;;  %v5835_v51 = vld [vmem:[%s7092_s3 + $0x80] ss:$8 sps:$4 sm:$0xff]   ;;  %v5838_v56 = vld [vmem:[%s7092_s3 + $0x90] ss:$8 sps:$4 sm:$0xff]  }
0x10a0   : > { %v3087_v58 = vpop.permute.xlu1 %3086 }
0x10a1   : > { %v3095_v59 = vsel %vm1709_vm10, %v3094_v57, %v3087_v58  ;;  %v5843_v57 = vld [vmem:[%s7092_s3 + $0xa4] ss:$8 sps:$4 sm:$0xff]   ;;  %v5841_v58 = vld [vmem:[%s7092_s3 + $0xa0] ss:$8 sps:$4 sm:$0xff]  }
0x10a2   : > { %v3096_v60 = vpack.c.bf16 %v3095_v59, %v3095_v59  ;;  %v5844_v59 = vld [vmem:[%s7092_s3 + $0xb0] ss:$8 sps:$4 sm:$0xff]  }
0x10a4   : > { %5583 = vmatmul.mubr.msk.bf16.vlgmr.msra.gmra.mrb[72].mxu1 %vm692_vm2, %v3096_v60  ;;  %v5846_v60 = vld [vmem:[%s7092_s3 + $0xb4] ss:$8 sps:$4 sm:$0xff]  }
0x10a5   : > { %5606 = vmatprep.mubr.msk.bf16.mxu1 %vm5980_vm0, %v5981_v6  ;;  %5599 = vmatpush3.bf16.msra.mxu1 %v5831_v14 }
0x10a6   : > { %5600 = vmatprep.subr.bf16.mxu1 %v5981_v6 }
0x10a9   : > { %5601 = vmatpush3.bf16.msra.mxu1 %v5832_v15 }
0x10aa   : > { %5602 = vmatprep.subr.bf16.mxu1 %v5981_v6 }
0x10ad   : > { %5603 = vmatpush3.bf16.msra.mxu1 %v5833_v29 }
0x10ae   : > { %5604 = vmatprep.subr.bf16.mxu1 %v5981_v6 }
0x10b1   : > { %5605 = vmatpush3.bf16.msra.mxu1 %v5834_v30 }
0x10b2   : > { %5610 = vmatprep.subr.bf16.mxu1 %v5981_v6 }
0x1177   : > { %v3175_v62 = vpop.f32.mrb[72].mxu1 }
0x1178   : > { %v3176_v63 = vadd.f32 %v5045_v61, %v3175_v62  ;;  %v5584_v0 = vpop.f32.mrb[73].mxu1 }
0x1179   : > { %v3178_v1 = vpop.f32.mrb[74].mxu1 }
0x117a   : > { %v5585_v2 = vpop.f32.mrb[75].mxu1  ;;  %v3181_v3 = vadd.f32 %v3176_v63, %v6473_v48  ;;  %v5828_v48 = vld [vmem:[%s7098_s9 + $0x28] sm:$0xff]   ;;  %v5087_v1 = vld [vmem:[%s7102_s13 + $0x1] ss:$0 sm:$0xff] }
0x117b   : > { %5589 = vmatpush3.bf16.msra.mxu0 %v5828_v48 }
0x117c   : > { %v3186_v4 = vsel %vm692_vm2, %v3181_v3, 0.0  ;;  %5590 = vmatprep.subr.bf16.mxu0 %v5981_v6 }
0x117d   : > { %3187 = vadd.xlane.f32.xlu0 %v3186_v4 }
0x117f   : > { %5591 = vmatpush3.bf16.msra.mxu0 %v5829_v12 }
0x1180   : > { %5592 = vmatprep.subr.bf16.mxu0 %v5981_v6 }
0x1183   : > { %5593 = vmatpush3.bf16.msra.mxu0 %v5830_v13 }
0x1184   : > { %3482 = vmatprep.subr.bf16.mxu0 %v5837_v55 }
0x120a   : > { %v3188_v5 = vpop.xlane.xlu0 %3187 }
0x120b   : > { %v3189_v7 = vmul.f32 0.015625, %v3188_v5 }
0x120d   : > { %v3190_v8 = vsub.f32 %v3181_v3, %v3189_v7  ;;  %v5088_v3 = vld [vmem:[%s7103_s14 + $0x1] ss:$0 sm:$0xff] }
0x120f   : > { %v3191_v9 = vmul.f32 %v3190_v8, %v3190_v8 }
0x1211   : > { %v3192_v11 = vsel %vm692_vm2, %v3191_v9, 0.0 }
0x1212   : > { %3193 = vadd.xlane.f32.xlu1 %v3192_v11 }
0x129f   : > { %v3194_v18 = vpop.xlane.xlu1 %3193 }
0x12a0   : > { %v3195_v19 = vmul.f32 0.015625, %v3194_v18 }
0x12a2   : > { %v3196_v21 = vadd.f32 1e-05, %v3195_v19 }
0x12a4   : > { %5931 = vrsqrt.f32 %v3196_v21 }
0x12ae   : > { %v5932_v22 = vpop.eup %5931 }
0x12af   : > { %v3198_v24 = vmul.f32 %v5932_v22, %v3190_v8  ;;  %v5097_v8 = vld [vmem:[%s7093_s4 + $0x4] sm:$0x3] }
0x12b0   : > { %v3432_v9 = vrot.slane %v5097_v8, %v6162_v25  ;;  %v3436_v29 = vrot.slane %v5097_v8, %v6180_v43 }
0x12b1   : > { %v3205_v16 = vmul.f32 %v5053_v23, %v3198_v24 }
0x12b3   : > { %v3212_v28 = vadd.f32 %v5054_v27, %v3205_v16 }
0x12b5   : > { %v3213_v26 = vpack.c.bf16 %v3212_v28, %v3212_v28 }
0x12b7   : > { %5595 = vmatmul.mubr.msk.bf16.vlgmr.msra.gmra.mrb[80].mxu0 %vm692_vm2, %v3213_v26 }
0x12b8   : > { %3514 = vmatprep.mubr.bf16.mxu0 %v5982_v17  ;;  %3483 = vmatpush1.bf16.msra.mxu0 %v5835_v51 }
0x12b9   : > { %3484 = vmatprep.subr.bf16.mxu0 %v5840_v53 }
0x12bc   : > { %3485 = vmatpush1.bf16.msra.mxu0 %v5838_v56 }
0x12bd   : > { %3486 = vmatprep.subr.bf16.mxu0 %v5843_v57 }
0x12c0   : > { %3487 = vmatpush1.bf16.msra.mxu0 %v5841_v58 }
0x12c1   : > { %3488 = vmatprep.subr.bf16.mxu0 %v5846_v60 }
0x12c4   : > { %3489 = vmatpush1.bf16.msra.mxu0 %v5844_v59 }
0x12c5   : > { %5616 = vmatprep.subr.bf16.mxu0 %v5981_v6 }
0x138a   : > { %v3292_v32 = vpop.f32.mrb[80].mxu0 }
0x138b   : > { %v3293_v17 = vadd.f32 %v5064_v31, %v3292_v32  ;;  %v5596_v33 = vpop.f32.mrb[81].mxu0 }
0x138c   : > { %v3295_v34 = vpop.f32.mrb[82].mxu0 }
0x138d   : > { %v3298_v35 = vmax.f32 %v3293_v17, 0.0  ;;  %v5597_v36 = vpop.f32.mrb[83].mxu0 }
0x138f   : > { %v3299_v38 = vpack.c.bf16 %v3298_v35, %v3298_v35 }
0x1391   : > { %5607 = vmatmul.mubr.msk.bf16.vlgmr.msra.gmra.mrb[76].mxu1 %vm692_vm2, %v3299_v38 }
0x1392   : > { %5612 = vmatprep.mubr.msk.bf16.mxu1 %vm5980_vm0, %v5981_v6 }
0x1464   : > { %v3378_v41 = vpop.f32.mrb[76].mxu1 }
0x1465   : > { %v3379_v42 = vadd.f32 %v5079_v39, %v3378_v41  ;;  %v5608_v44 = vpop.f32.mrb[77].mxu1 }
0x1466   : > { %v3381_v37 = vpop.f32.mrb[78].mxu1 }
0x1467   : > { %v5609_v45 = vpop.f32.mrb[79].mxu1  ;;  %v3384_v40 = vadd.f32 %v3379_v42, %v3212_v28 }
0x1469   : > { %v3389_v46 = vsel %vm692_vm2, %v3384_v40, 0.0 }
0x146a   : > { %3390 = vadd.xlane.f32.xlu0 %v3389_v46 }
0x14f7   : > { %v3391_v47 = vpop.xlane.xlu0 %3390 }
0x14f8   : > { %v3392_v49 = vmul.f32 0.015625, %v3391_v47 }
0x14fa   : > { %v3393_v50 = vsub.f32 %v3384_v40, %v3392_v49 }
0x14fc   : > { %v3394_v20 = vmul.f32 %v3393_v50, %v3393_v50 }
0x14fe   : > { %v3395_v54 = vsel %vm692_vm2, %v3394_v20, 0.0 }
0x14ff   : > { %3396 = vadd.xlane.f32.xlu0 %v3395_v54 }
0x158c   : > { %v3397_v61 = vpop.xlane.xlu0 %3396 }
0x158d   : > { %v3398_v62 = vmul.f32 0.015625, %v3397_v61 }
0x158f   : > { %v3399_v63 = vadd.f32 1e-05, %v3398_v62 }
0x1591   : > { %5933 = vrsqrt.f32 %v3399_v63 }
0x159b   : > { %v5934_v0 = vpop.eup %5933 }
0x159c   : > { %v3401_v2 = vmul.f32 %v5934_v0, %v3393_v50 }
0x159e   : > { %v3408_v4 = vmul.f32 %v5087_v1, %v3401_v2 }
0x15a0   : > { %v6782_v5 = vadd.f32 %v5088_v3, %v3408_v4 }
0x15a2   : > { %v3416_v7 = vpack.c.bf16 %v6782_v5, %v6782_v5 }
0x15a4   : > { %5106 = vmatmul.mubr.msk.bf16.vlgmr.msra.gmra.mrb[84].mxu0 %vm692_vm2, %v3416_v7 }
0x15a5   : > { %5618 = vmatprep.mubr.msk.bf16.mxu0 %vm5980_vm0, %v5981_v6 }
0x1677   : > { %v3516_v11 = vpop.f32.mrb[84].mxu0 }
0x1678   : > { %v3517_v52 = vadd.f32 %v3516_v11, %v3432_v9  ;;  %v3518_v48 = vpop.f32.mrb[85].mxu0 }
0x1679   : > { %v3520_v12 = vpop.f32.mrb[86].mxu0  ;;  %v6809_v17 = vadd.f32 %v3518_v48, %v3436_v29 }
0x167a   : > { %v3521_v13 = vpop.f32.mrb[87].mxu0  ;;  %3527 = vrot.lane.b32.xlu0 %v3517_v52, %s7170_s17  ;;  %3524 = vrot.lane.b32.xlu1 %v3517_v52, %s7171_s19  ;;  %v3545_v25 = vpack.c.bf16 %v3517_v52, %v3517_v52 }
0x167b   : > { %v3575_v47 = vpack.c.bf16 %v6809_v17, %v6809_v17 }
0x167d   : > { %v4091_v50 = vsel %vm1305_vm4, %v3575_v47, 0 }
0x167e   : > { %3536 = vrot.lane.b32.xlu0 %v3517_v52, %s7159_s27  ;;  %3530 = vrot.lane.b32.xlu1 %v3517_v52, %s7172_s6 }
0x1682   : > { %3542 = vrot.lane.b32.xlu0 %v3517_v52, %s7161_s18  ;;  %3533 = vrot.lane.b32.xlu1 %v3517_v52, %s7158_s30 }
0x1686   : > { %3539 = vrot.lane.b32.xlu1 %v3517_v52, %s7160_s26 }
0x168a   : > { %3584 = vrot.lane.b32.xlu1 %v3545_v25, %s7162_s22 }
0x16ec   : > { %v3528_v14 = vpop.permute.xlu0 %3527  ;;  %v3525_v15 = vpop.permute.xlu1 %3524 }
0x16ed   : > { %v3547_v18 = vpack.c.bf16 %v3528_v14, %v3528_v14  ;;  %v3546_v19 = vpack.c.bf16 %v3525_v15, %v3525_v15 }
0x16ef   : > { %3633 = vrot.lane.b32.xlu0 %v3546_v19, %s7162_s22  ;;  %3682 = vrot.lane.b32.xlu1 %v3547_v18, %s7162_s22 }
0x16f0   : > { %v3537_v21 = vpop.permute.xlu0 %3536  ;;  %v3531_v22 = vpop.permute.xlu1 %3530 }
0x16f1   : > { %v3548_v23 = vpack.c.bf16 %v3531_v22, %v3531_v22  ;;  %v3550_v27 = vpack.c.bf16 %v3537_v21, %v3537_v21 }
0x16f3   : > { %3731 = vrot.lane.b32.xlu0 %v3548_v23, %s7162_s22 }
0x16f4   : > { %v3534_v24 = vpop.permute.xlu1 %3533  ;;  %v3543_v28 = vpop.permute.xlu0 %3542 }
0x16f5   : > { %v3549_v16 = vpack.c.bf16 %v3534_v24, %v3534_v24  ;;  %v3552_v30 = vpack.c.bf16 %v3543_v28, %v3543_v28 }
0x16f7   : > { %3829 = vrot.lane.b32.xlu0 %v3550_v27, %s7162_s22  ;;  %3780 = vrot.lane.b32.xlu1 %v3549_v16, %s7162_s22 }
0x16f8   : > { %v3540_v26 = vpop.permute.xlu1 %3539 }
0x16f9   : > { %v3551_v31 = vpack.c.bf16 %v3540_v26, %v3540_v26 }
0x16fb   : > { %3927 = vrot.lane.b32.xlu0 %v3552_v30, %s7162_s22  ;;  %3878 = vrot.lane.b32.xlu1 %v3551_v31, %s7162_s22 }
0x16fc   : > { %v3585_v32 = vpop.permute.xlu1 %3584 }
0x16fd   : > { %v3590_v33 = vsel %vm800_vm3, %v3585_v32, 0 }
0x16fe   : > { %5611 = vmatpush3.bf16.xpose.msra.mxu1 %v3590_v33 }
0x16ff   : > { %3554 = vrot.lane.b32.xlu0 %v6809_v17, %s7171_s19  ;;  %5622 = vmatprep.subr.bf16.mxu1 %v5981_v6 }
0x1705   : > { %5613 = vmatmul.mubr.msk.bf16.vlgmr.msra.gmra.mrb[80].mxu1 %vm800_vm3, %v3545_v25 }
0x1706   : > { %5624 = vmatprep.mubr.msk.bf16.mxu1 %vm5980_vm0, %v5981_v6 }
0x1761   : > { %v3634_v43 = vpop.permute.xlu0 %3633  ;;  %v3683_v34 = vpop.permute.xlu1 %3682 }
0x1762   : > { %v3639_v35 = vsel %vm800_vm3, %v3634_v43, 0  ;;  %v3688_v36 = vsel %vm800_vm3, %v3683_v34, 0 }
0x1763   : > { %5617 = vmatpush3.bf16.xpose.msra.mxu0 %v3639_v35  ;;  %5623 = vmatpush3.bf16.xpose.msra.mxu1 %v3688_v36 }
0x1764   : > { %5628 = vmatprep.subr.bf16.mxu0 %v5981_v6  ;;  %5634 = vmatprep.subr.bf16.mxu1 %v5981_v6 }
0x1765   : > { %v3732_v38 = vpop.permute.xlu0 %3731 }
0x1766   : > { %v3737_v41 = vsel %vm800_vm3, %v3732_v38, 0 }
0x1769   : > { %v3781_v39 = vpop.permute.xlu1 %3780  ;;  %v3830_v44 = vpop.permute.xlu0 %3829 }
0x176a   : > { %v3786_v42 = vsel %vm800_vm3, %v3781_v39, 0  ;;  %5619 = vmatmul.mubr.msk.bf16.vlgmr.msra.gmra.mrb[88].mxu0 %vm800_vm3, %v3546_v19  ;;  %5625 = vmatmul.mubr.msk.bf16.vlgmr.msra.gmra.mrb[84].mxu1 %vm800_vm3, %v3547_v18  ;;  %v3835_v45 = vsel %vm800_vm3, %v3830_v44, 0 }
0x176b   : > { %5629 = vmatpush3.bf16.xpose.msra.mxu0 %v3737_v41  ;;  %5635 = vmatpush3.bf16.xpose.msra.mxu1 %v3786_v42 }
0x176c   : > { %5630 = vmatprep.mubr.msk.bf16.mxu0 %vm5980_vm0, %v5981_v6  ;;  %5636 = vmatprep.mubr.msk.bf16.mxu1 %vm5980_vm0, %v5981_v6 }
0x176d   : > { %5640 = vmatprep.subr.bf16.mxu0 %v5981_v6  ;;  %5646 = vmatprep.subr.bf16.mxu1 %v5981_v6  ;;  %v3879_v37 = vpop.permute.xlu1 %3878  ;;  %v3928_v46 = vpop.permute.xlu0 %3927 }
0x176e   : > { %v3884_v40 = vsel %vm800_vm3, %v3879_v37, 0  ;;  %v3933_v49 = vsel %vm800_vm3, %v3928_v46, 0 }
0x1771   : > { %v3555_v20 = vpop.permute.xlu0 %3554 }
0x1772   : > { %5631 = vmatmul.mubr.msk.bf16.vlgmr.msra.gmra.mrb[92].mxu0 %vm800_vm3, %v3548_v23  ;;  %5637 = vmatmul.mubr.msk.bf16.vlgmr.msra.gmra.mrb[88].mxu1 %vm800_vm3, %v3549_v16  ;;  %v3576_v54 = vpack.c.bf16 %v3555_v20, %v3555_v20 }
0x1773   : > { %5641 = vmatpush3.bf16.xpose.msra.mxu0 %v3835_v45  ;;  %5647 = vmatpush3.bf16.xpose.msra.mxu1 %v3884_v40 }
0x1774   : > { %5642 = vmatprep.mubr.msk.bf16.mxu0 %vm5980_vm0, %v5981_v6  ;;  %5648 = vmatprep.mubr.msk.bf16.mxu1 %vm5980_vm0, %v5981_v6  ;;  %v4137_v55 = vsel %vm1305_vm4, %v3576_v54, 0 }
0x1775   : > { %5652 = vmatprep.subr.bf16.mxu0 %v5981_v6  ;;  %5658 = vmatprep.subr.bf16.mxu1 %v5981_v6 }
0x177a   : > { %5643 = vmatmul.mubr.msk.bf16.vlgmr.msra.gmra.mrb[96].mxu0 %vm800_vm3, %v3550_v27  ;;  %5649 = vmatmul.mubr.msk.bf16.vlgmr.msra.gmra.mrb[92].mxu1 %vm800_vm3, %v3551_v31 }
0x177b   : > { %5653 = vmatpush3.bf16.xpose.msra.mxu0 %v3933_v49  ;;  %5659 = vmatpush3.bf16.msra.mxu1 %v4091_v50 }
0x177c   : > { %5654 = vmatprep.mubr.msk.bf16.mxu0 %vm5980_vm0, %v5981_v6  ;;  %5664 = vmatprep.subr.bf16.mxu0 %v5981_v6 }
0x177d   : > { %5660 = vmatprep.mubr.msk.bf16.mxu1 %vm5980_vm0, %v5981_v6  ;;  %5670 = vmatprep.subr.bf16.mxu1 %v5981_v6 }
0x1782   : > { %5655 = vmatmul.mubr.msk.bf16.vlgmr.msra.gmra.mrb[100].mxu0 %vm800_vm3, %v3552_v30 }
0x1783   : > { %5665 = vmatpush3.bf16.msra.mxu0 %v4137_v55  ;;  %5666 = vmatprep.mubr.msk.bf16.mxu0 %vm5980_vm0, %v5981_v6 }
0x1784   : > { %5676 = vmatprep.subr.bf16.mxu0 %v5981_v6 }
0x17d8   : > { %v3626_v51 = vpop.f32.mrb[80].mxu1 }
0x17d9   : > { %v3975_v53 = vmul.f32 0.35355338, %v3626_v51  ;;  %v5614_v56 = vpop.f32.mrb[81].mxu1 }
0x17da   : > { %v3629_v57 = vpop.f32.mrb[82].mxu1 }
0x17db   : > { %v6860_v58 = vadd.f32 %v3975_v53, %v6240_v10  ;;  %v5615_v59 = vpop.f32.mrb[83].mxu1 }
0x17dd   : > { %v3991_v60 = vsel %vm800_vm3, %v6860_v58, -inf }
0x17de   : > { %3992 = vmax.xlane.f32.xlu1 %v3991_v60 }
0x183d   : > { %v3675_v61 = vpop.f32.mrb[88].mxu0  ;;  %v3724_v62 = vpop.f32.mrb[84].mxu1 }
0x183e   : > { %v3976_v63 = vmul.f32 0.35355338, %v3675_v61  ;;  %v3977_v0 = vmul.f32 0.35355338, %v3724_v62  ;;  %v5620_v1 = vpop.f32.mrb[89].mxu0  ;;  %v5626_v2 = vpop.f32.mrb[85].mxu1 }
0x183f   : > { %v3678_v3 = vpop.f32.mrb[90].mxu0  ;;  %v3727_v4 = vpop.f32.mrb[86].mxu1 }
0x1840   : > { %v3984_v7 = vadd.f32 %v3976_v63, %v6240_v10  ;;  %v5621_v8 = vpop.f32.mrb[91].mxu0  ;;  %v5627_v9 = vpop.f32.mrb[87].mxu1  ;;  %v3985_v11 = vadd.f32 %v3977_v0, %v6240_v10 }
0x1842   : > { %v3994_v52 = vsel %vm800_vm3, %v3984_v7, -inf  ;;  %v3997_v13 = vsel %vm800_vm3, %v3985_v11, -inf }
0x1843   : > { %3995 = vmax.xlane.f32.xlu0 %v3994_v52 }
0x1845   : > { %v3773_v48 = vpop.f32.mrb[92].mxu0  ;;  %v3822_v12 = vpop.f32.mrb[88].mxu1 }
0x1846   : > { %v3978_v25 = vmul.f32 0.35355338, %v3773_v48  ;;  %v3979_v14 = vmul.f32 0.35355338, %v3822_v12  ;;  %v5632_v15 = vpop.f32.mrb[93].mxu0  ;;  %v5638_v18 = vpop.f32.mrb[89].mxu1 }
0x1847   : > { %v3776_v19 = vpop.f32.mrb[94].mxu0  ;;  %3998 = vmax.xlane.f32.xlu0 %v3997_v13  ;;  %v3825_v21 = vpop.f32.mrb[90].mxu1 }
0x1848   : > { %v3986_v22 = vadd.f32 %v3978_v25, %v6240_v10  ;;  %v6870_v23 = vadd.f32 %v3979_v14, %v6240_v10  ;;  %v5633_v24 = vpop.f32.mrb[95].mxu0  ;;  %v5639_v27 = vpop.f32.mrb[91].mxu1 }
0x184a   : > { %v4000_v16 = vsel %vm800_vm3, %v3986_v22, -inf  ;;  %v4003_v28 = vsel %vm800_vm3, %v6870_v23, -inf }
0x184b   : > { %4001 = vmax.xlane.f32.xlu1 %v4000_v16  ;;  %4004 = vmax.xlane.f32.xlu0 %v4003_v28 }
0x184d   : > { %v3871_v26 = vpop.f32.mrb[96].mxu0  ;;  %v3920_v29 = vpop.f32.mrb[92].mxu1 }
0x184e   : > { %v3980_v30 = vmul.f32 0.35355338, %v3871_v26  ;;  %v3981_v31 = vmul.f32 0.35355338, %v3920_v29  ;;  %v5644_v32 = vpop.f32.mrb[97].mxu0  ;;  %v5650_v33 = vpop.f32.mrb[93].mxu1 }
0x184f   : > { %v3874_v43 = vpop.f32.mrb[98].mxu0  ;;  %v3923_v34 = vpop.f32.mrb[94].mxu1 }
0x1850   : > { %v3988_v35 = vadd.f32 %v3980_v30, %v6240_v10  ;;  %v3989_v36 = vadd.f32 %v3981_v31, %v6240_v10  ;;  %v5645_v38 = vpop.f32.mrb[99].mxu0  ;;  %v5651_v39 = vpop.f32.mrb[95].mxu1 }
0x1852   : > { %v4006_v41 = vsel %vm800_vm3, %v3988_v35, -inf  ;;  %v4009_v42 = vsel %vm800_vm3, %v3989_v36, -inf }
0x1853   : > { %4007 = vmax.xlane.f32.xlu1 %v4006_v41  ;;  %4010 = vmax.xlane.f32.xlu0 %v4009_v42 }
0x1855   : > { %v3969_v44 = vpop.f32.mrb[100].mxu0 }
0x1856   : > { %v3982_v37 = vmul.f32 0.35355338, %v3969_v44  ;;  %v5656_v45 = vpop.f32.mrb[101].mxu0 }
0x1857   : > { %v3972_v40 = vpop.f32.mrb[102].mxu0 }
0x1858   : > { %v3990_v46 = vadd.f32 %v3982_v37, %v6240_v10  ;;  %v5657_v47 = vpop.f32.mrb[103].mxu0 }
0x185a   : > { %v4012_v49 = vsel %vm800_vm3, %v3990_v46, -inf }
0x185b   : > { %4013 = vmax.xlane.f32.xlu1 %v4012_v49 }
0x1869   : > { %3560 = vrot.lane.b32.xlu0 %v6809_v17, %s7172_s6 }
0x186b   : > { %v3993_v50 = vpop.xlane.xlu1 %3992 }
0x186c   : > { %3557 = vrot.lane.b32.xlu1 %v6809_v17, %s7170_s17  ;;  %v4015_v20 = vsub.f32 %v6860_v58, %v3993_v50 }
0x186e   : > { %v4023_v54 = vmul.f32 1.442695, %v4015_v20 }
0x1870   : > { %5935 = vpow2.f32 %v4023_v54 }
0x187a   : > { %v5936_v55 = vpop.eup %5935 }
0x187b   : > { %v4039_v51 = vsel %vm800_vm3, %v5936_v55, 0.0 }
0x1888   : > { %4040 = vadd.xlane.f32.xlu0 %v4039_v51 }
0x18d0   : > { %v3996_v10 = vpop.xlane.xlu0 %3995 }
0x18d1   : > { %v4016_v53 = vsub.f32 %v3984_v7, %v3996_v10 }
0x18d3   : > { %v4025_v56 = vmul.f32 1.442695, %v4016_v53 }
0x18d4   : > { %v3999_v57 = vpop.xlane.xlu0 %3998 }
0x18d5   : > { %5937 = vpow2.f32 %v4025_v56  ;;  %v4017_v59 = vsub.f32 %v3985_v11, %v3999_v57 }
0x18d7   : > { %v4027_v60 = vmul.f32 1.442695, %v4017_v59 }
0x18d8   : > { %v4002_v0 = vpop.xlane.xlu1 %4001  ;;  %v4005_v2 = vpop.xlane.xlu0 %4004 }
0x18d9   : > { %5939 = vpow2.f32 %v4027_v60  ;;  %v4018_v1 = vsub.f32 %v3986_v22, %v4002_v0  ;;  %v4019_v4 = vsub.f32 %v6870_v23, %v4005_v2 }
0x18db   : > { %v4029_v7 = vmul.f32 1.442695, %v4018_v1  ;;  %v4031_v11 = vmul.f32 1.442695, %v4019_v4 }
0x18dd   : > { %5941 = vpow2.f32 %v4029_v7 }
0x18de   : > { %5943 = vpow2.f32 %v4031_v11 }
0x18df   : > { %v6887_v61 = vpop.eup %5937 }
0x18e0   : > { %v4042_v62 = vsel %vm800_vm3, %v6887_v61, 0.0  ;;  %v4008_v3 = vpop.xlane.xlu1 %4007  ;;  %v4011_v9 = vpop.xlane.xlu0 %4010 }
0x18e1   : > { %4043 = vadd.xlane.f32.xlu1 %v4042_v62  ;;  %v4020_v8 = vsub.f32 %v3988_v35, %v4008_v3  ;;  %v4021_v48 = vsub.f32 %v3989_v36, %v4011_v9 }
0x18e3   : > { %v6891_v58 = vpop.eup %5939  ;;  %v4033_v52 = vmul.f32 1.442695, %v4020_v8  ;;  %v4035_v13 = vmul.f32 1.442695, %v4021_v48 }
0x18e4   : > { %v4045_v63 = vsel %vm800_vm3, %v6891_v58, 0.0  ;;  %v3561_v15 = vpop.permute.xlu0 %3560 }
0x18e5   : > { %4046 = vadd.xlane.f32.xlu0 %v4045_v63  ;;  %5945 = vpow2.f32 %v4033_v52  ;;  %v3578_v39 = vpack.c.bf16 %v3561_v15, %v3561_v15 }
0x18e6   : > { %5947 = vpow2.f32 %v4035_v13 }
0x18e7   : > { %v6900_v18 = vpop.eup %5941  ;;  %v4229_v45 = vsel %vm1305_vm4, %v3578_v39, 0 }
0x18e8   : > { %v4014_v12 = vpop.xlane.xlu1 %4013  ;;  %v6902_v19 = vpop.eup %5943  ;;  %v4048_v22 = vsel %vm800_vm3, %v6900_v18, 0.0 }
0x18e9   : > { %v4022_v25 = vsub.f32 %v3990_v46, %v4014_v12  ;;  %v4051_v27 = vsel %vm800_vm3, %v6902_v19, 0.0 }
0x18eb   : > { %v4037_v14 = vmul.f32 1.442695, %v4022_v25 }
0x18ec   : > { %v3558_v29 = vpop.permute.xlu1 %3557 }
0x18ed   : > { %5949 = vpow2.f32 %v4037_v14  ;;  %v3577_v31 = vpack.c.bf16 %v3558_v29, %v3558_v29  ;;  %v5848_v29 = vld [vmem:[%s7094_s5 + $0x48] sm:$0xff]  }
0x18ef   : > { %v6906_v23 = vpop.eup %5945  ;;  %v4183_v34 = vsel %vm1305_vm4, %v3577_v31, 0  ;;  %v5849_v31 = vld [vmem:[%s7094_s5 + $0x50] sm:$0xff]  }
0x18f0   : > { %v4054_v24 = vsel %vm800_vm3, %v6906_v23, 0.0  ;;  %v6912_v16 = vpop.eup %5947 }
0x18f1   : > { %v4057_v28 = vsel %vm800_vm3, %v6912_v16, 0.0 }
0x18f2   : > { %3566 = vrot.lane.b32.xlu1 %v6809_v17, %s7159_s27 }
0x18f7   : > { %v6916_v26 = vpop.eup %5949 }
0x18f8   : > { %v4060_v33 = vsel %vm800_vm3, %v6916_v26, 0.0 }
0x18fb   : > { %3563 = vrot.lane.b32.xlu0 %v6809_v17, %s7158_s30 }
0x1915   : > { %v4041_v21 = vpop.xlane.xlu0 %4040 }
0x1916   : > { %5951 = vrcp.f32 %v4041_v21  ;;  %4049 = vadd.xlane.f32.xlu1 %v4048_v22 }
0x191a   : > { %4055 = vadd.xlane.f32.xlu1 %v4054_v24  ;;  %4052 = vadd.xlane.f32.xlu0 %v4051_v27 }
0x191e   : > { %4058 = vadd.xlane.f32.xlu1 %v4057_v28 }
0x1920   : > { %v5952_v30 = vpop.eup %5951 }
0x1921   : > { %v4064_v32 = vmul.f32 %v5952_v30, %v5936_v55 }
0x1922   : > { %4061 = vadd.xlane.f32.xlu1 %v4060_v33 }
0x1923   : > { %v4079_v43 = vpack.c.bf16 %v4064_v32, %v4064_v32 }
0x1925   : > { %5661 = vmatmul.mubr.msk.bf16.vlgmr.msra.gmra.mrb[96].mxu1 %vm800_vm3, %v4079_v43 }
0x1926   : > { %5671 = vmatpush3.bf16.msra.mxu1 %v4183_v34  ;;  %5672 = vmatprep.mubr.msk.bf16.mxu1 %vm5980_vm0, %v5981_v6  ;;  %v5850_v34 = vld [vmem:[%s7094_s5 + $0x58] sm:$0xff]  }
0x1927   : > { %5682 = vmatprep.subr.bf16.mxu1 %v5981_v6 }
0x1930   : > { %3569 = vrot.lane.b32.xlu0 %v6809_v17, %s7160_s26 }
0x1933   : > { %3572 = vrot.lane.b32.xlu1 %v6809_v17, %s7161_s18  ;;  %s7178_s18 = sld [smem:[#allocation3_spill]] }
0x196e   : > { %v4044_v35 = vpop.xlane.xlu1 %4043 }
0x196f   : > { %5953 = vrcp.f32 %v4044_v35 }
0x1972   : > { %v4047_v36 = vpop.xlane.xlu0 %4046  ;;  %v3567_v49 = vpop.permute.xlu1 %3566 }
0x1973   : > { %5955 = vrcp.f32 %v4047_v36  ;;  %v3580_v10 = vpack.c.bf16 %v3567_v49, %v3567_v49 }
0x1975   : > { %v4321_v62 = vsel %vm1305_vm4, %v3580_v10, 0 }
0x1976   : > { %v3564_v42 = vpop.permute.xlu0 %3563 }
0x1977   : > { %v3579_v46 = vpack.c.bf16 %v3564_v42, %v3564_v42 }
0x1979   : > { %v5954_v38 = vpop.eup %5953  ;;  %v4275_v47 = vsel %vm1305_vm4, %v3579_v46, 0 }
0x197a   : > { %v4066_v41 = vmul.f32 %v5954_v38, %v6887_v61 }
0x197c   : > { %v4080_v44 = vpack.c.bf16 %v4066_v41, %v4066_v41 }
0x197d   : > { %v5956_v37 = vpop.eup %5955 }
0x197e   : > { %v4068_v40 = vmul.f32 %v5956_v37, %v6891_v58  ;;  %5667 = vmatmul.mubr.msk.bf16.vlgmr.msra.gmra.mrb[104].mxu0 %vm800_vm3, %v4080_v44 }
0x197f   : > { %5677 = vmatpush3.bf16.msra.mxu0 %v4229_v45  ;;  %5678 = vmatprep.mubr.msk.bf16.mxu0 %vm5980_vm0, %v5981_v6 }
0x1980   : > { %v4081_v17 = vpack.c.bf16 %v4068_v40, %v4068_v40  ;;  %5688 = vmatprep.subr.bf16.mxu0 %v5981_v6 }
0x1982   : > { %5673 = vmatmul.mubr.msk.bf16.vlgmr.msra.gmra.mrb[100].mxu1 %vm800_vm3, %v4081_v17 }
0x1983   : > { %5683 = vmatpush3.bf16.msra.mxu1 %v4275_v47  ;;  %5684 = vmatprep.mubr.msk.bf16.mxu1 %vm5980_vm0, %v5981_v6 }
0x1984   : > { %5694 = vmatprep.subr.bf16.mxu1 %v5981_v6 }
0x19a3   : > { %v4050_v50 = vpop.xlane.xlu1 %4049 }
0x19a4   : > { %5957 = vrcp.f32 %v4050_v50 }
0x19a7   : > { %v4056_v20 = vpop.xlane.xlu1 %4055  ;;  %v4053_v54 = vpop.xlane.xlu0 %4052 }
0x19a8   : > { %5959 = vrcp.f32 %v4056_v20 }
0x19a9   : > { %5961 = vrcp.f32 %v4053_v54 }
0x19ab   : > { %v4059_v55 = vpop.xlane.xlu1 %4058  ;;  %v3570_v57 = vpop.permute.xlu0 %3569 }
0x19ac   : > { %5963 = vrcp.f32 %v4059_v55  ;;  %v3581_v63 = vpack.c.bf16 %v3570_v57, %v3570_v57 }
0x19ae   : > { %v5958_v51 = vpop.eup %5957  ;;  %v4367_v7 = vsel %vm1305_vm4, %v3581_v63, 0 }
0x19af   : > { %v4070_v53 = vmul.f32 %v5958_v51, %v6900_v18  ;;  %v4062_v56 = vpop.xlane.xlu1 %4061 }
0x19b0   : > { %5965 = vrcp.f32 %v4062_v56 }
0x19b1   : > { %v4082_v59 = vpack.c.bf16 %v4070_v53, %v4070_v53 }
0x19b2   : > { %v5960_v60 = vpop.eup %5959 }
0x19b3   : > { %v5962_v61 = vpop.eup %5961  ;;  %5679 = vmatmul.mubr.msk.bf16.vlgmr.msra.gmra.mrb[108].mxu0 %vm800_vm3, %v4082_v59  ;;  %v3573_v0 = vpop.permute.xlu1 %3572  ;;  %v4074_v1 = vmul.f32 %v5960_v60, %v6906_v23 }
0x19b4   : > { %v4072_v58 = vmul.f32 %v5962_v61, %v6902_v19  ;;  %5689 = vmatpush3.bf16.msra.mxu0 %v4321_v62  ;;  %5690 = vmatprep.mubr.msk.bf16.mxu0 %vm5980_vm0, %v5981_v6  ;;  %v3582_v4 = vpack.c.bf16 %v3573_v0, %v3573_v0 }
0x19b5   : > { %5700 = vmatprep.subr.bf16.mxu0 %v5981_v6  ;;  %v4084_v8 = vpack.c.bf16 %v4074_v1, %v4074_v1 }
0x19b6   : > { %v4083_v2 = vpack.c.bf16 %v4072_v58, %v4072_v58  ;;  %v5964_v3 = vpop.eup %5963  ;;  %v4413_v52 = vsel %vm1305_vm4, %v3582_v4, 0 }
0x19b7   : > { %v4076_v11 = vmul.f32 %v5964_v3, %v6912_v16 }
0x19b8   : > { %5685 = vmatmul.mubr.msk.bf16.vlgmr.msra.gmra.mrb[104].mxu1 %vm800_vm3, %v4083_v2 }
0x19b9   : > { %5695 = vmatpush3.bf16.msra.mxu1 %v4367_v7  ;;  %5696 = vmatprep.mubr.msk.bf16.mxu1 %vm5980_vm0, %v5981_v6  ;;  %v4085_v12 = vpack.c.bf16 %v4076_v11, %v4076_v11 }
0x19ba   : > { %v5966_v9 = vpop.eup %5965  ;;  %5706 = vmatprep.subr.bf16.mxu1 %v5981_v6 }
0x19bb   : > { %5691 = vmatmul.mubr.msk.bf16.vlgmr.msra.gmra.mrb[112].mxu0 %vm800_vm3, %v4084_v8  ;;  %v4078_v48 = vmul.f32 %v5966_v9, %v6916_v26  ;;  %v5847_v26 = vld [vmem:[%s7094_s5 + $0x40] sm:$0xff]  }
0x19bc   : > { %5701 = vmatpush3.bf16.msra.mxu0 %v4413_v52  ;;  %5702 = vmatprep.mubr.msk.bf16.mxu0 %vm5980_vm0, %v5981_v6 }
0x19bd   : > { %5718 = vmatprep.subr.bf16.mxu0 %v5981_v6  ;;  %v4086_v13 = vpack.c.bf16 %v4078_v48, %v4078_v48 }
0x19c0   : > { %5697 = vmatmul.mubr.msk.bf16.vlgmr.msra.gmra.mrb[108].mxu1 %vm800_vm3, %v4085_v12 }
0x19c1   : > { %5714 = vmatprep.mubr.msk.bf16.mxu1 %vm5980_vm0, %v5981_v6  ;;  %5707 = vmatpush3.bf16.msra.mxu1 %v5847_v26 }
0x19c2   : > { %5708 = vmatprep.subr.bf16.mxu1 %v5981_v6 }
0x19c3   : > { %5703 = vmatmul.mubr.msk.bf16.vlgmr.msra.gmra.mrb[116].mxu0 %vm800_vm3, %v4086_v13 }
0x19c4   : > { %5726 = vmatprep.mubr.msk.bf16.mxu0 %vm5980_vm0, %v5981_v6 }
0x19c5   : > { %5709 = vmatpush3.bf16.msra.mxu1 %v5848_v29  ;;  %v5141_v29 = vld [vmem:[%s7097_s8 + $0x2] ss:$0 sm:$0xff] }
0x19c6   : > { %5710 = vmatprep.subr.bf16.mxu1 %v5981_v6 }
0x19c9   : > { %5711 = vmatpush3.bf16.msra.mxu1 %v5849_v31 }
0x19ca   : > { %5712 = vmatprep.subr.bf16.mxu1 %v5981_v6 }
0x19cd   : > { %5713 = vmatpush3.bf16.msra.mxu1 %v5850_v34 }
0x19ce   : > { %5730 = vmatprep.subr.bf16.mxu1 %v5981_v6 }
0x19f8   : > { %v4127_v25 = vpop.f32.mrb[96].mxu1 }
0x19f9   : > { %v5662_v14 = vpop.f32.mrb[97].mxu1 }
0x19fa   : > { %v4130_v15 = vpop.f32.mrb[98].mxu1 }
0x19fb   : > { %v5663_v18 = vpop.f32.mrb[99].mxu1  ;;  %v5851_v15 = vld [vmem:[%s7098_s9 + $0x40] sm:$0xff]  }
0x19fc   : > { %5719 = vmatpush3.bf16.msra.mxu0 %v5851_v15  ;;  %v5853_v18 = vld [vmem:[%s7098_s9 + $0x50] sm:$0xff]  }
0x19fd   : > { %5720 = vmatprep.subr.bf16.mxu0 %v5981_v6 }
0x1a51   : > { %v4173_v19 = vpop.f32.mrb[104].mxu0 }
0x1a52   : > { %v5668_v21 = vpop.f32.mrb[105].mxu0  ;;  %4456 = vrot.lane.b32.xlu0 %v4173_v19, %s7163_s29  ;;  %v5854_v19 = vld [vmem:[%s7098_s9 + $0x58] sm:$0xff]  }
0x1a53   : > { %v4176_v22 = vpop.f32.mrb[106].mxu0  ;;  %v5855_v21 = vld [vmem:[%s7100_s11 + $0x40] sm:$0xff]  }
0x1a54   : > { %v5669_v23 = vpop.f32.mrb[107].mxu0  ;;  %v5856_v22 = vld [vmem:[%s7100_s11 + $0x48] sm:$0xff]  }
0x1a55   : > { %v4219_v24 = vpop.f32.mrb[100].mxu1 }
0x1a56   : > { %4460 = vrot.lane.b32.xlu1 %v4219_v24, %s7164_s1  ;;  %v5674_v27 = vpop.f32.mrb[101].mxu1 }
0x1a57   : > { %v4222_v16 = vpop.f32.mrb[102].mxu1 }
0x1a58   : > { %v5675_v28 = vpop.f32.mrb[103].mxu1 }
0x1a59   : > { %v5140_v28 = vld [vmem:[%s7096_s7 + $0x2] ss:$0 sm:$0xff] }
0x1a86   : > { %v4265_v30 = vpop.f32.mrb[108].mxu0 }
0x1a87   : > { %4464 = vrot.lane.b32.xlu0 %v4265_v30, %s7166_s23  ;;  %v5680_v32 = vpop.f32.mrb[109].mxu0  ;;  %s7173_s23 = sld [smem:[#allocation7_spill]] }
0x1a88   : > { %v4268_v33 = vpop.f32.mrb[110].mxu0 }
0x1a89   : > { %v5681_v43 = vpop.f32.mrb[111].mxu0  ;;  %v5857_v33 = vld [vmem:[%s7100_s11 + $0x50] sm:$0xff]  }
0x1a8a   : > { %v5858_v43 = vld [vmem:[%s7100_s11 + $0x58] sm:$0xff]  }
0x1a8b   : > { %v4311_v35 = vpop.f32.mrb[104].mxu1 }
0x1a8c   : > { %4468 = vrot.lane.b32.xlu1 %v4311_v35, %s7165_s21  ;;  %v5686_v36 = vpop.f32.mrb[105].mxu1 }
0x1a8d   : > { %v4314_v38 = vpop.f32.mrb[106].mxu1  ;;  %v5132_v2 = vld [vmem:[%s7173_s23 + $0x2] ss:$0 sm:$0xff]  ;;  %s7179_s23 = sld [smem:[#allocation11_spill]] }
0x1a8e   : > { %v5687_v39 = vpop.f32.mrb[107].mxu1  ;;  %v4357_v41 = vpop.f32.mrb[112].mxu0 }
0x1a8f   : > { %4472 = vrot.lane.b32.xlu0 %v4357_v41, %s7167_s28  ;;  %v5692_v42 = vpop.f32.mrb[113].mxu0  ;;  %s7174_s28 = sld [smem:[#allocation8_spill]] }
0x1a90   : > { %v4360_v44 = vpop.f32.mrb[114].mxu0 }
0x1a91   : > { %v5693_v37 = vpop.f32.mrb[115].mxu0 }
0x1a92   : > { %v5166_v37 = vld [vmem:[%s7175_s12 + $0x2] ss:$0 sm:$0xff]  ;;  %s7181_s12 = sld [smem:[#allocation12_spill]] }
0x1a93   : > { %v4403_v45 = vpop.f32.mrb[108].mxu1 }
0x1a94   : > { %4476 = vrot.lane.b32.xlu1 %v4403_v45, %s7168_s0  ;;  %v5698_v40 = vpop.f32.mrb[109].mxu1 }
0x1a95   : > { %v4406_v46 = vpop.f32.mrb[110].mxu1  ;;  %v5151_v34 = vld [vmem:[%s7174_s28 + $0x2] ss:$0 sm:$0xff]  ;;  %s7180_s28 = sshll.u32 %s7178_s18, 3 }
0x1a96   : > { %v5699_v17 = vpop.f32.mrb[111].mxu1  ;;  %v4449_v47 = vpop.f32.mrb[116].mxu0 }
0x1a97   : > { %4480 = vrot.lane.b32.xlu0 %v4449_v47, %s7169_s2  ;;  %v5704_v49 = vpop.f32.mrb[117].mxu0 }
0x1a98   : > { %v4452_v50 = vpop.f32.mrb[118].mxu0  ;;  %s543_s16 = scalar_lea.vmem %s7181_s12, %s7180_s28 }
0x1a99   : > { %v5705_v20 = vpop.f32.mrb[119].mxu0 }
0x1ac4   : > { %v4457_v54 = vpop.permute.xlu0 %4456 }
0x1ac5   : > { %v4483_v53 = vsel %vm800_vm3, %v4127_v25, %v4457_v54 }
0x1ac8   : > { %v4461_v55 = vpop.permute.xlu1 %4460 }
0x1ac9   : > { %v4484_v56 = vsel %vm1700_vm6, %v4483_v53, %v4461_v55  ;;  %v5859_v53 = vld [vmem:[%s7176_s24] sm:$0xff]  }
0x1af9   : > { %v4465_v51 = vpop.permute.xlu0 %4464 }
0x1afa   : > { %v4485_v59 = vsel %vm1702_vm7, %v4484_v56, %v4465_v51  ;;  %v5860_v56 = vld [vmem:[%s7177_s20 + $0x8] sm:$0xff]  }
0x1afe   : > { %v4469_v10 = vpop.permute.xlu1 %4468 }
0x1aff   : > { %v4486_v61 = vsel %vm557_vm1, %v4485_v59, %v4469_v10  ;;  %v5862_v59 = vld [vmem:[%s7177_s20 + $0x18] sm:$0xff]  }
0x1b01   : > { %v4473_v57 = vpop.permute.xlu0 %4472 }
0x1b02   : > { %v4487_v62 = vsel %vm1705_vm8, %v4486_v61, %v4473_v57  ;;  %v5861_v57 = vld [vmem:[%s7177_s20 + $0x10] sm:$0xff]  }
0x1b06   : > { %v4477_v60 = vpop.permute.xlu1 %4476 }
0x1b07   : > { %v4488_v58 = vsel %vm1707_vm9, %v4487_v62, %v4477_v60 }
0x1b09   : > { %v4481_v63 = vpop.permute.xlu0 %4480 }
0x1b0a   : > { %v4489_v0 = vsel %vm1709_vm10, %v4488_v58, %v4481_v63  ;;  %v5174_v63 = vld [vmem:[%s7102_s13 + $0x2] ss:$0 sm:$0xff] }
0x1b0b   : > { %v4490_v1 = vpack.c.bf16 %v4489_v0, %v4489_v0 }
0x1b0d   : > { %5715 = vmatmul.mubr.msk.bf16.vlgmr.msra.gmra.mrb[112].mxu1 %vm692_vm2, %v4490_v1  ;;  %v5175_v1 = vld [vmem:[%s7103_s14 + $0x2] ss:$0 sm:$0xff] }
0x1b0e   : > { %5738 = vmatprep.mubr.msk.bf16.mxu1 %vm5980_vm0, %v5981_v6  ;;  %5731 = vmatpush3.bf16.msra.mxu1 %v5855_v21 }
0x1b0f   : > { %5732 = vmatprep.subr.bf16.mxu1 %v5981_v6 }
0x1b12   : > { %5733 = vmatpush3.bf16.msra.mxu1 %v5856_v22 }
0x1b13   : > { %5734 = vmatprep.subr.bf16.mxu1 %v5981_v6 }
0x1b16   : > { %5735 = vmatpush3.bf16.msra.mxu1 %v5857_v33 }
0x1b17   : > { %5736 = vmatprep.subr.bf16.mxu1 %v5981_v6 }
0x1b1a   : > { %5737 = vmatpush3.bf16.msra.mxu1 %v5858_v43 }
0x1be0   : > { %v4569_v3 = vpop.f32.mrb[112].mxu1 }
0x1be1   : > { %v4570_v4 = vadd.f32 %v5132_v2, %v4569_v3  ;;  %v5716_v7 = vpop.f32.mrb[113].mxu1 }
0x1be2   : > { %v4572_v8 = vpop.f32.mrb[114].mxu1 }
0x1be3   : > { %v4575_v9 = vadd.f32 %v4570_v4, %v6782_v5  ;;  %v5717_v11 = vpop.f32.mrb[115].mxu1  ;;  %v5852_v5 = vld [vmem:[%s7098_s9 + $0x48] sm:$0xff]  }
0x1be4   : > { %5721 = vmatpush3.bf16.msra.mxu0 %v5852_v5 }
0x1be5   : > { %v4580_v52 = vsel %vm692_vm2, %v4575_v9, 0.0  ;;  %5722 = vmatprep.subr.bf16.mxu0 %v5981_v6 }
0x1be6   : > { %4581 = vadd.xlane.f32.xlu1 %v4580_v52 }
0x1be8   : > { %5723 = vmatpush3.bf16.msra.mxu0 %v5853_v18 }
0x1be9   : > { %5724 = vmatprep.subr.bf16.mxu0 %v5981_v6 }
0x1bec   : > { %5725 = vmatpush3.bf16.msra.mxu0 %v5854_v19 }
0x1bed   : > { %5742 = vmatprep.subr.bf16.mxu0 %v5981_v6 }
0x1c73   : > { %v4582_v48 = vpop.xlane.xlu1 %4581 }
0x1c74   : > { %v4583_v12 = vmul.f32 0.015625, %v4582_v48 }
0x1c76   : > { %v4584_v13 = vsub.f32 %v4575_v9, %v4583_v12 }
0x1c78   : > { %v4585_v25 = vmul.f32 %v4584_v13, %v4584_v13 }
0x1c7a   : > { %v4586_v14 = vsel %vm692_vm2, %v4585_v25, 0.0 }
0x1c7b   : > { %4587 = vadd.xlane.f32.xlu0 %v4586_v14 }
0x1d08   : > { %v4588_v23 = vpop.xlane.xlu0 %4587 }
0x1d09   : > { %v4589_v24 = vmul.f32 0.015625, %v4588_v23 }
0x1d0b   : > { %v4590_v27 = vadd.f32 1e-05, %v4589_v24 }
0x1d0d   : > { %5967 = vrsqrt.f32 %v4590_v27 }
0x1d17   : > { %v5968_v16 = vpop.eup %5967 }
0x1d18   : > { %v4592_v26 = vmul.f32 %v5968_v16, %v4584_v13 }
0x1d1a   : > { %v4599_v30 = vmul.f32 %v5140_v28, %v4592_v26 }
0x1d1c   : > { %v4606_v31 = vadd.f32 %v5141_v29, %v4599_v30 }
0x1d1e   : > { %v4607_v32 = vpack.c.bf16 %v4606_v31, %v4606_v31 }
0x1d20   : > { %5727 = vmatmul.mubr.msk.bf16.vlgmr.msra.gmra.mrb[120].mxu0 %vm692_vm2, %v4607_v32 }
0x1d21   : > { %5750 = vmatprep.mubr.msk.bf16.mxu0 %vm5980_vm0, %v5981_v6  ;;  %5743 = vmatpush3.bf16.msra.mxu0 %v5859_v53 }
0x1d22   : > { %5744 = vmatprep.subr.bf16.mxu0 %v5981_v6 }
0x1d25   : > { %5745 = vmatpush3.bf16.msra.mxu0 %v5860_v56 }
0x1d26   : > { %5746 = vmatprep.subr.bf16.mxu0 %v5981_v6 }
0x1d29   : > { %5747 = vmatpush3.bf16.msra.mxu0 %v5861_v57 }
0x1d2a   : > { %5748 = vmatprep.subr.bf16.mxu0 %v5981_v6  ;;  %v5176_v6 = vld [vmem:[%s7179_s23] ss:$0 sm:$0xff] }
0x1d2d   : > { %5749 = vmatpush3.bf16.msra.mxu0 %v5862_v59 }
0x1df3   : > { %v4686_v35 = vpop.f32.mrb[120].mxu0 }
0x1df4   : > { %v4687_v36 = vadd.f32 %v5151_v34, %v4686_v35  ;;  %v5728_v38 = vpop.f32.mrb[121].mxu0 }
0x1df5   : > { %v4689_v39 = vpop.f32.mrb[122].mxu0 }
0x1df6   : > { %v4692_v41 = vmax.f32 %v4687_v36, 0.0  ;;  %v5729_v42 = vpop.f32.mrb[123].mxu0 }
0x1df8   : > { %v4693_v44 = vpack.c.bf16 %v4692_v41, %v4692_v41 }
0x1dfa   : > { %5739 = vmatmul.mubr.msk.bf16.vlgmr.msra.gmra.mrb[116].mxu1 %vm692_vm2, %v4693_v44 }
0x1ecd   : > { %v4772_v45 = vpop.f32.mrb[116].mxu1 }
0x1ece   : > { %v4773_v40 = vadd.f32 %v5166_v37, %v4772_v45  ;;  %v5740_v46 = vpop.f32.mrb[117].mxu1 }
0x1ecf   : > { %v4775_v17 = vpop.f32.mrb[118].mxu1 }
0x1ed0   : > { %v4778_v47 = vadd.f32 %v4773_v40, %v4606_v31  ;;  %v5741_v49 = vpop.f32.mrb[119].mxu1 }
0x1ed2   : > { %v4783_v50 = vsel %vm692_vm2, %v4778_v47, 0.0 }
0x1ed3   : > { %4784 = vadd.xlane.f32.xlu0 %v4783_v50 }
0x1f60   : > { %v4785_v20 = vpop.xlane.xlu0 %4784 }
0x1f61   : > { %v4786_v54 = vmul.f32 0.015625, %v4785_v20 }
0x1f63   : > { %v4787_v55 = vsub.f32 %v4778_v47, %v4786_v54 }
0x1f65   : > { %v4788_v51 = vmul.f32 %v4787_v55, %v4787_v55 }
0x1f67   : > { %v4789_v10 = vsel %vm692_vm2, %v4788_v51, 0.0 }
0x1f68   : > { %4790 = vadd.xlane.f32.xlu1 %v4789_v10 }
0x1ff5   : > { %v4791_v60 = vpop.xlane.xlu1 %4790 }
0x1ff6   : > { %v4792_v61 = vmul.f32 0.015625, %v4791_v60 }
0x1ff8   : > { %v4793_v62 = vadd.f32 1e-05, %v4792_v61 }
0x1ffa   : > { %5969 = vrsqrt.f32 %v4793_v62 }
0x2004   : > { %v5970_v58 = vpop.eup %5969 }
0x2005   : > { %v4795_v0 = vmul.f32 %v5970_v58, %v4787_v55 }
0x2007   : > { %v4802_v2 = vmul.f32 %v5174_v63, %v4795_v0 }
0x2009   : > { %v4809_v3 = vadd.f32 %v5175_v1, %v4802_v2 }
0x200b   : > { %v4810_v4 = vpack.c.bf16 %v4809_v3, %v4809_v3 }
0x200d   : > { %5751 = vmatmul.mubr.msk.bf16.vlgmr.msra.gmra.mrb[124].mxu0 %vm692_vm2, %v4810_v4 }
0x20e0   : > { %v4887_v7 = vpop.f32.mrb[124].mxu0 }
0x20e1   : > { %v4888_v8 = vadd.f32 %v5176_v6, %v4887_v7  ;;  %v5752_v9 = vpop.f32.mrb[125].mxu0 }
0x20e2   : > { %v4890_v11 = vpop.f32.mrb[126].mxu0 }
0x20e3   : > { %4893 = vst.msk [vmem:[%s543_s16] sm:$0xff] %vm557_vm1, %v4888_v8  ;;  %v5753_v52 = vpop.f32.mrb[127].mxu0 }
0x20e4 PF: > { %s7182_s25 = sld [smem:[#allocation2_spill]] }
0x20ea   : > { %s27_s24 = sadd.s32 1, %s7182_s25  }
0x20eb   : > { %p24_p4 = scmp.ge.s32.totalorder %s27_s24, 4  }
0x20ed   :  { %26 = sbr.rel (!%p24_p4) target bundleno = 10 (0xa), region = 142 }

</bundles_post_ra>
